<compile_context>
chip_gen: v6e
topology: v6e:2x2x1
jax: 0.10.0
libtpu: 0.0.40
codegen_flags: <defaults>
</compile_context>

<pallas_src>
import math

import jax
import jax.numpy as jnp
from jax.experimental import pallas as pl
from jax.experimental.pallas import tpu as pltpu

# ------------------------------- model config --------------------------------
X_DIM = 16
Y_DIM = 16
Z_DIM = 8
V_DIM = 8
BATCH = 2
N_SAMPLES = 8          # must be != 1 (mirrors the `if w.shape[-1] != 1` branch)

_LOG_2PI = math.log(2.0 * math.pi)

# ------------------------------ padded layout ---------------------------------
D_IN = 16              # X_DIM / Y_DIM (already lane-friendly enough for K dim)
D_H200 = 256           # hidden 200 -> 256
D_H500 = 512           # hidden 500 -> 512
D_ENC = 64             # LinearMap output 50 -> 64
D_LAT = 16             # z / v latent 8 -> 16 (also covers 16-wide logits heads)
BIAS_COLS = 512
N_BIAS_ROWS = 24       # 22 real biases, padded to a multiple of 8 rows

# --- W256 blob (all weights with 256-wide outputs), row offsets --------------
R_ZQ_W1, R_ZQ_W2 = 0, 16
R_XE_W1 = 272
R_ZXE_W1, R_ZVE_W1, R_VE_W1 = 288, 304, 320
R_YGZ_W1, R_YGZ_W2 = 336, 352
W256_ROWS = 608
# --- W64 blob (LinearMap second layers, 64-wide outputs) ----------------------
R_XE_W2, R_ZXE_W2, R_ZVE_W2, R_VE_W2 = 0, 256, 512, 768
W64_ROWS = 1024
# --- HE blob (early 16-wide heads: z_given_x mean/logvar, y_given_z out) ------
R_ZQ_WM, R_ZQ_WLV, R_YGZ_W3 = 0, 256, 512
HE_ROWS = 768
# --- W512 blob (late 512-wide weights, manually prefetched) -------------------
R_VGX_W1A, R_VGX_W1B, R_VGX_W2 = 0, 64, 128
R_XGZ_W1A, R_XGZ_W1B, R_XGZ_W2 = 640, 704, 768
W512_ROWS = 1280
# --- HL blob (late 16-wide heads, manually prefetched) ------------------------
R_VGX_WM, R_VGX_WLV, R_XGZ_W3 = 0, 512, 1024
HL_ROWS = 1536
# --- bias table rows ----------------------------------------------------------
B_ZQ_1, B_ZQ_2, B_ZQ_M, B_ZQ_LV = 0, 1, 2, 3
B_XE_1, B_XE_2 = 4, 5
B_ZXE_1, B_ZXE_2 = 6, 7
B_ZVE_1, B_ZVE_2 = 8, 9
B_VE_1, B_VE_2 = 10, 11
B_VGX_1, B_VGX_2, B_VGX_M, B_VGX_LV = 12, 13, 14, 15
B_YGZ_1, B_YGZ_2, B_YGZ_3 = 16, 17, 18
B_XGZ_1, B_XGZ_2, B_XGZ_3 = 19, 20, 21


# --------------------------------- kernel -------------------------------------
def hybrid_iwae_kernel(x_ref, y_ref, eps_z_ref, eps_v_ref,
                       w256_ref, w64_ref, he_ref, b_ref,
                       w512_hbm, hl_hbm,
                       w_ref,
                       w512_vmem, hl_vmem, dma_sem):
    # Kick off prefetch of the big "late-stage" weight blobs (~1.3 MB bf16);
    # the DMA overlaps the early small-MLP compute below.
    cp_w512 = pltpu.make_async_copy(w512_hbm, w512_vmem, dma_sem.at[0])
    cp_hl = pltpu.make_async_copy(hl_hbm, hl_vmem, dma_sem.at[1])
    cp_w512.start()
    cp_hl.start()

    def dot(h, w):
        # bf16 MXU matmul with f32 accumulation; elementwise math stays f32.
        return jnp.dot(h.astype(jnp.bfloat16), w,
                       preferred_element_type=jnp.float32)

    def bias(row, width):
        return b_ref[row:row + 1, :width]          # (1, width) f32, broadcasts

    def softplus(t):
        return jnp.maximum(t, 0.0) + jnp.log1p(jnp.exp(-jnp.abs(t)))

    def bern_ll(logits, target):
        return jnp.sum(target * logits - softplus(logits),
                       axis=-1, keepdims=True)

    x = x_ref[...]                                  # (N, 16), {0, 1}
    y = y_ref[...]                                  # (N, 16)
    eps_z = eps_z_ref[...]                          # (N, 16), cols >= Z_DIM are 0
    eps_v = eps_v_ref[...]                          # (N, 16), cols >= V_DIM are 0

    # ------------- q(z | x): Gaussian encoder 16 -> 256 -> 256 -> (16|16) -----
    h = jnp.maximum(dot(x, w256_ref[R_ZQ_W1:R_ZQ_W1 + D_IN, :])
                    + bias(B_ZQ_1, D_H200), 0.0)
    h = jnp.maximum(dot(h, w256_ref[R_ZQ_W2:R_ZQ_W2 + D_H200, :])
                    + bias(B_ZQ_2, D_H200), 0.0)
    z_mean = dot(h, he_ref[R_ZQ_WM:R_ZQ_WM + D_H200, :]) + bias(B_ZQ_M, D_LAT)
    z_logv = dot(h, he_ref[R_ZQ_WLV:R_ZQ_WLV + D_H200, :]) + bias(B_ZQ_LV, D_LAT)
    z = z_mean + jnp.exp(0.5 * z_logv) * eps_z      # padded cols stay exactly 0
    logq_z = (-0.5 * _LOG_2PI * Z_DIM
              - 0.5 * jnp.sum(z_logv + eps_z * eps_z, axis=-1, keepdims=True))

    # ------------- deterministic LinearMaps: in -> 256 -> 64 (50 padded) ------
    def linear_map(inp, w1_row, w1_rows, b1_row, w2_row, b2_row):
        t = jnp.maximum(dot(inp, w256_ref[w1_row:w1_row + w1_rows, :])
                        + bias(b1_row, D_H200), 0.0)
        return dot(t, w64_ref[w2_row:w2_row + D_H200, :]) + bias(b2_row, D_ENC)

    x_red = linear_map(x, R_XE_W1, D_IN, B_XE_1, R_XE_W2, B_XE_2)
    z_red_xz = linear_map(z, R_ZXE_W1, D_LAT, B_ZXE_1, R_ZXE_W2, B_ZXE_2)
    z_red_zv = linear_map(z, R_ZVE_W1, D_LAT, B_ZVE_1, R_ZVE_W2, B_ZVE_2)

    # ------------- p(y | z): decoder 16 -> 256 -> 256 -> 16 (early stage) -----
    hy = jnp.maximum(dot(z, w256_ref[R_YGZ_W1:R_YGZ_W1 + D_LAT, :])
                     + bias(B_YGZ_1, D_H200), 0.0)
    hy = jnp.maximum(dot(hy, w256_ref[R_YGZ_W2:R_YGZ_W2 + D_H200, :])
                     + bias(B_YGZ_2, D_H200), 0.0)
    y_logits = dot(hy, he_ref[R_YGZ_W3:R_YGZ_W3 + D_H200, :]) + bias(B_YGZ_3, D_LAT)
    ll_y = bern_ll(y_logits, y)

    logp_z = -0.5 * _LOG_2PI * Z_DIM - 0.5 * jnp.sum(z * z, axis=-1, keepdims=True)

    # ------------- late 512-wide stages: prefetched weights must have landed --
    cp_w512.wait()
    cp_hl.wait()

    # q(v | x, z): split contraction replaces cat((x_red, z_red_xz), -1) @ W1
    hv = jnp.maximum(dot(x_red, w512_vmem[R_VGX_W1A:R_VGX_W1A + D_ENC, :])
                     + dot(z_red_xz, w512_vmem[R_VGX_W1B:R_VGX_W1B + D_ENC, :])
                     + bias(B_VGX_1, D_H500), 0.0)
    hv = jnp.maximum(dot(hv, w512_vmem[R_VGX_W2:R_VGX_W2 + D_H500, :])
                     + bias(B_VGX_2, D_H500), 0.0)
    v_mean = dot(hv, hl_vmem[R_VGX_WM:R_VGX_WM + D_H500, :]) + bias(B_VGX_M, D_LAT)
    v_logv = dot(hv, hl_vmem[R_VGX_WLV:R_VGX_WLV + D_H500, :]) + bias(B_VGX_LV, D_LAT)
    v = v_mean + jnp.exp(0.5 * v_logv) * eps_v
    logq_v = (-0.5 * _LOG_2PI * V_DIM
              - 0.5 * jnp.sum(v_logv + eps_v * eps_v, axis=-1, keepdims=True))
    logp_v = -0.5 * _LOG_2PI * V_DIM - 0.5 * jnp.sum(v * v, axis=-1, keepdims=True)

    v_red = linear_map(v, R_VE_W1, D_LAT, B_VE_1, R_VE_W2, B_VE_2)

    # p(x | z, v): split contraction replaces cat((z_red_zv, v_red), -1) @ W1
    hx = jnp.maximum(dot(z_red_zv, w512_vmem[R_XGZ_W1A:R_XGZ_W1A + D_ENC, :])
                     + dot(v_red, w512_vmem[R_XGZ_W1B:R_XGZ_W1B + D_ENC, :])
                     + bias(B_XGZ_1, D_H500), 0.0)
    hx = jnp.maximum(dot(hx, w512_vmem[R_XGZ_W2:R_XGZ_W2 + D_H500, :])
                     + bias(B_XGZ_2, D_H500), 0.0)
    x_logits = dot(hx, hl_vmem[R_XGZ_W3:R_XGZ_W3 + D_H500, :]) + bias(B_XGZ_3, D_LAT)
    ll_x = bern_ll(x_logits, x)

    # ------------- per-(batch, sample) importance log-weight ------------------
    w_col = ll_x + ll_y + logp_z + logp_v - logq_z - logq_v        # (N, 1)
    # lane-broadcast so the store is a full, unmasked (N, 128) vst
    w_ref[...] = jnp.broadcast_to(w_col, w_ref.shape)


# --------------------------------- wrapper ------------------------------------
def hybrid_iwae_forward(x, y, packed, eps_z, eps_v, n_samples):
    """x: [B, X_DIM], y: [B, Y_DIM]; eps_z: [B, S, Z_DIM], eps_v: [B, S, V_DIM]."""
    w256, w64, he, bias_tbl, w512, hl = packed
    B = x.shape[0]
    S = n_samples
    N = B * S

    # repeat_newdim(x, n_samples, -2), flatten (B, S) -> rows
    x_rep = jnp.repeat(x[:, None, :], S, axis=1).reshape(N, X_DIM).astype(jnp.float32)
    y_rep = jnp.repeat(y[:, None, :], S, axis=1).reshape(N, Y_DIM).astype(jnp.float32)
    eps_z_p = jnp.pad(eps_z.reshape(N, Z_DIM).astype(jnp.float32),
                      ((0, 0), (0, D_LAT - Z_DIM)))
    eps_v_p = jnp.pad(eps_v.reshape(N, V_DIM).astype(jnp.float32),
                      ((0, 0), (0, D_LAT - V_DIM)))

    blocked_inputs = [x_rep, y_rep, eps_z_p, eps_v_p, w256, w64, he, bias_tbl]
    in_specs = [pl.BlockSpec(a.shape, lambda i: (0, 0)) for a in blocked_inputs]
    in_specs += [pl.BlockSpec(memory_space=pl.ANY),       # W512 blob (prefetched)
                 pl.BlockSpec(memory_space=pl.ANY)]       # HL blob (prefetched)

    w_out = pl.pallas_call(
        hybrid_iwae_kernel,
        out_shape=jax.ShapeDtypeStruct((N, 128), jnp.float32),
        grid=(1,),
        in_specs=in_specs,
        out_specs=pl.BlockSpec((N, 128), lambda i: (0, 0)),
        scratch_shapes=[
            pltpu.VMEM((W512_ROWS, D_H500), jnp.bfloat16),
            pltpu.VMEM((HL_ROWS, D_LAT), jnp.bfloat16),
            pltpu.SemaphoreType.DMA((2,)),
        ],
        compiler_params=pltpu.CompilerParams(
            dimension_semantics=("arbitrary",),
            vmem_limit_bytes=16 << 20,
        ),
    )(*blocked_inputs, w512, hl)

    # tiny per-sample reduction kept in glue (w.shape[-1] != 1 branch)
    w = w_out[:, 0].reshape(B, S)
    elbo = jnp.mean(w, axis=-1)                                    # [B]
    iw_elbo = jax.nn.logsumexp(w, axis=-1) - jnp.log(float(S))     # [B]
    return iw_elbo, elbo


# --------------------------- deterministic init --------------------------------
def _init_linear(key, fan_in, fan_out):
    kw, kb = jax.random.split(key)
    W = jax.random.normal(kw, (fan_in, fan_out), jnp.float32) / math.sqrt(fan_in)
    b = 0.01 * jax.random.normal(kb, (fan_out,), jnp.float32)
    return W, b


def _init_mlp(key, dims):
    keys = jax.random.split(key, len(dims) - 1)
    return [_init_linear(k, di, do) for k, di, do in zip(keys, dims[:-1], dims[1:])]


def _init_gaussian(key, din, hidden, dout):
    k1, k2, k3 = jax.random.split(key, 3)
    trunk = _init_mlp(k1, [din] + hidden)
    return trunk + [_init_linear(k2, hidden[-1], dout),
                    _init_linear(k3, hidden[-1], dout)]


def init_params(key):
    ks = jax.random.split(key, 8)
    return {
        "zq":  _init_gaussian(ks[0], X_DIM, [200, 200], Z_DIM),   # z_given_x
        "xe":  _init_mlp(ks[1], [X_DIM, 200, 50]),                # x_encoder
        "zxe": _init_mlp(ks[2], [Z_DIM, 200, 50]),                # z_encoder_xz
        "zve": _init_mlp(ks[3], [Z_DIM, 200, 50]),                # z_encoder_zv
        "ve":  _init_mlp(ks[4], [V_DIM, 200, 50]),                # v_encoder
        "vgx": _init_gaussian(ks[5], 100, [500, 500], V_DIM),     # v_given_xz
        "ygz": _init_mlp(ks[6], [Z_DIM, 200, 200, Y_DIM]),        # y_given_z
        "xgz": _init_mlp(ks[7], [100, 500, 500, X_DIM]),          # x_given_zv
    }


# ------------------------- packing into padded blobs ---------------------------
def _padw(W, rows, cols):
    return jnp.pad(W, ((0, rows - W.shape[0]), (0, cols - W.shape[1])))


def pack_params(p):
    zq, xe, zxe, zve, ve = p["zq"], p["xe"], p["zxe"], p["zve"], p["ve"]
    vgx, ygz, xgz = p["vgx"], p["ygz"], p["xgz"]
    bf = jnp.bfloat16

    w256 = jnp.concatenate([
        _padw(zq[0][0], D_IN, D_H200),  _padw(zq[1][0], D_H200, D_H200),
        _padw(xe[0][0], D_IN, D_H200),
        _padw(zxe[0][0], D_LAT, D_H200), _padw(zve[0][0], D_LAT, D_H200),
        _padw(ve[0][0], D_LAT, D_H200),
        _padw(ygz[0][0], D_LAT, D_H200), _padw(ygz[1][0], D_H200, D_H200),
    ], axis=0).astype(bf)

    w64 = jnp.concatenate([
        _padw(xe[1][0], D_H200, D_ENC), _padw(zxe[1][0], D_H200, D_ENC),
        _padw(zve[1][0], D_H200, D_ENC), _padw(ve[1][0], D_H200, D_ENC),
    ], axis=0).astype(bf)

    he = jnp.concatenate([
        _padw(zq[2][0], D_H200, D_LAT), _padw(zq[3][0], D_H200, D_LAT),
        _padw(ygz[2][0], D_H200, D_LAT),
    ], axis=0).astype(bf)

    vgx_w1, xgz_w1 = vgx[0][0], xgz[0][0]
    w512 = jnp.concatenate([
        _padw(vgx_w1[:50], D_ENC, D_H500), _padw(vgx_w1[50:], D_ENC, D_H500),
        _padw(vgx[1][0], D_H500, D_H500),
        _padw(xgz_w1[:50], D_ENC, D_H500), _padw(xgz_w1[50:], D_ENC, D_H500),
        _padw(xgz[1][0], D_H500, D_H500),
    ], axis=0).astype(bf)

    hl = jnp.concatenate([
        _padw(vgx[2][0], D_H500, D_LAT), _padw(vgx[3][0], D_H500, D_LAT),
        _padw(xgz[2][0], D_H500, D_LAT),
    ], axis=0).astype(bf)

    bias_rows = [
        zq[0][1], zq[1][1], zq[2][1], zq[3][1],
        xe[0][1], xe[1][1],
        zxe[0][1], zxe[1][1],
        zve[0][1], zve[1][1],
        ve[0][1], ve[1][1],
        vgx[0][1], vgx[1][1], vgx[2][1], vgx[3][1],
        ygz[0][1], ygz[1][1], ygz[2][1],
        xgz[0][1], xgz[1][1], xgz[2][1],
    ]
    bias_tbl = jnp.concatenate(
        [jnp.pad(b, (0, BIAS_COLS - b.shape[0]))[None, :] for b in bias_rows]
        + [jnp.zeros((N_BIAS_ROWS - len(bias_rows), BIAS_COLS), jnp.float32)],
        axis=0)

    assert w256.shape == (W256_ROWS, D_H200)
    assert w64.shape == (W64_ROWS, D_ENC)
    assert he.shape == (HE_ROWS, D_LAT)
    assert w512.shape == (W512_ROWS, D_H500)
    assert hl.shape == (HL_ROWS, D_LAT)
    assert bias_tbl.shape == (N_BIAS_ROWS, BIAS_COLS)
    return w256, w64, he, bias_tbl, w512, hl


# ----------------------------------- main ---------------------------------------
if __name__ == "__main__":
    key = jax.random.PRNGKey(0)
    kp, kx, ky, kez, kev = jax.random.split(key, 5)

    params = init_params(kp)
    packed = pack_params(params)

    x = (jax.random.uniform(kx, (BATCH, X_DIM)) > 0.5).astype(jnp.float32)
    y = (jax.random.uniform(ky, (BATCH, Y_DIM)) > 0.5).astype(jnp.float32)
    # reparameterization noise generated host-side and passed to the kernel
    eps_z = jax.random.normal(kez, (BATCH, N_SAMPLES, Z_DIM), jnp.float32)
    eps_v = jax.random.normal(kev, (BATCH, N_SAMPLES, V_DIM), jnp.float32)

    iw_elbo, elbo = hybrid_iwae_forward(x, y, packed, eps_z, eps_v, N_SAMPLES)
    jax.block_until_ready((iw_elbo, elbo))

    assert iw_elbo.shape == (BATCH,) and elbo.shape == (BATCH,)
    assert bool(jnp.all(jnp.isfinite(iw_elbo))) and bool(jnp.all(jnp.isfinite(elbo)))
    print("KERNEL_OK")
</pallas_src>

<mosaic_0001>
module attributes {stable_mosaic.version = 11 : i64} {
  func.func @hybrid_iwae_kernel(%arg0: i32, %arg1: memref<16x16xf32, #tpu.memory_space<vmem>>, %arg2: memref<16x16xf32, #tpu.memory_space<vmem>>, %arg3: memref<16x16xf32, #tpu.memory_space<vmem>>, %arg4: memref<16x16xf32, #tpu.memory_space<vmem>>, %arg5: memref<608x256xbf16, #tpu.memory_space<vmem>>, %arg6: memref<1024x64xbf16, #tpu.memory_space<vmem>>, %arg7: memref<768x16xbf16, #tpu.memory_space<vmem>>, %arg8: memref<24x512xf32, #tpu.memory_space<vmem>>, %arg9: memref<1280x512xbf16, #tpu.memory_space<any>>, %arg10: memref<1536x16xbf16, #tpu.memory_space<any>>, %arg11: memref<16x128xf32, #tpu.memory_space<vmem>>, %arg12: memref<1280x512xbf16, #tpu.memory_space<vmem>>, %arg13: memref<1536x16xbf16, #tpu.memory_space<vmem>>, %arg14: memref<2x!tpu.dma_semaphore, #tpu.memory_space<semaphore_mem>>) attributes {dimension_semantics = [#tpu.dimension_semantics<arbitrary>], iteration_bounds = array<i64: 1>, scalar_prefetch = 0 : i64, scratch_operands = 3 : i64, tpu.core_type = #tpu.core_type<tc>, window_params = [{pipeline_mode = #tpu.pipeline_mode<synchronous>, transform_indices = @transform_0, window_bounds = array<i64: 16, 16>}, {pipeline_mode = #tpu.pipeline_mode<synchronous>, transform_indices = @transform_1, window_bounds = array<i64: 16, 16>}, {pipeline_mode = #tpu.pipeline_mode<synchronous>, transform_indices = @transform_2, window_bounds = array<i64: 16, 16>}, {pipeline_mode = #tpu.pipeline_mode<synchronous>, transform_indices = @transform_3, window_bounds = array<i64: 16, 16>}, {pipeline_mode = #tpu.pipeline_mode<synchronous>, transform_indices = @transform_4, window_bounds = array<i64: 608, 256>}, {pipeline_mode = #tpu.pipeline_mode<synchronous>, transform_indices = @transform_5, window_bounds = array<i64: 1024, 64>}, {pipeline_mode = #tpu.pipeline_mode<synchronous>, transform_indices = @transform_6, window_bounds = array<i64: 768, 16>}, {pipeline_mode = #tpu.pipeline_mode<synchronous>, transform_indices = @transform_7, window_bounds = array<i64: 24, 512>}, {}, {}, {pipeline_mode = #tpu.pipeline_mode<synchronous>, transform_indices = @transform_10, window_bounds = array<i64: 16, 128>}]} {
    %c0_i32 = arith.constant 0 : i32
    %0 = tpu.memref_slice %arg14[%c0_i32] : memref<2x!tpu.dma_semaphore, #tpu.memory_space<semaphore_mem>> -> memref<1x!tpu.dma_semaphore, #tpu.memory_space<semaphore_mem>>
    %1 = tpu.memref_squeeze %0 : memref<1x!tpu.dma_semaphore, #tpu.memory_space<semaphore_mem>> -> memref<!tpu.dma_semaphore, #tpu.memory_space<semaphore_mem>>
    tpu.enqueue_dma source(%arg9 : memref<1280x512xbf16, #tpu.memory_space<any>>) target(%arg12 : memref<1280x512xbf16, #tpu.memory_space<vmem>>) target_semaphore(%1 : memref<!tpu.dma_semaphore, #tpu.memory_space<semaphore_mem>>)
    %c1_i32 = arith.constant 1 : i32
    %2 = tpu.memref_slice %arg14[%c1_i32] : memref<2x!tpu.dma_semaphore, #tpu.memory_space<semaphore_mem>> -> memref<1x!tpu.dma_semaphore, #tpu.memory_space<semaphore_mem>>
    %3 = tpu.memref_squeeze %2 : memref<1x!tpu.dma_semaphore, #tpu.memory_space<semaphore_mem>> -> memref<!tpu.dma_semaphore, #tpu.memory_space<semaphore_mem>>
    tpu.enqueue_dma source(%arg10 : memref<1536x16xbf16, #tpu.memory_space<any>>) target(%arg13 : memref<1536x16xbf16, #tpu.memory_space<vmem>>) target_semaphore(%3 : memref<!tpu.dma_semaphore, #tpu.memory_space<semaphore_mem>>)
    %c0 = arith.constant 0 : index
    %c0_0 = arith.constant 0 : index
    %4 = vector.load %arg1[%c0, %c0_0] : memref<16x16xf32, #tpu.memory_space<vmem>>, vector<16x16xf32>
    %c0_1 = arith.constant 0 : index
    %c0_2 = arith.constant 0 : index
    %5 = vector.load %arg2[%c0_1, %c0_2] : memref<16x16xf32, #tpu.memory_space<vmem>>, vector<16x16xf32>
    %c0_3 = arith.constant 0 : index
    %c0_4 = arith.constant 0 : index
    %6 = vector.load %arg3[%c0_3, %c0_4] : memref<16x16xf32, #tpu.memory_space<vmem>>, vector<16x16xf32>
    %c0_5 = arith.constant 0 : index
    %c0_6 = arith.constant 0 : index
    %7 = vector.load %arg4[%c0_5, %c0_6] : memref<16x16xf32, #tpu.memory_space<vmem>>, vector<16x16xf32>
    %c0_7 = arith.constant 0 : index
    %c0_8 = arith.constant 0 : index
    %8 = vector.load %arg5[%c0_7, %c0_8] : memref<608x256xbf16, #tpu.memory_space<vmem>>, vector<16x256xbf16>
    %9 = arith.truncf %4 : vector<16x16xf32> to vector<16x16xbf16>
    %cst = arith.constant dense<0.000000e+00> : vector<16x256xf32>
    %10 = tpu.matmul %9, %8, %cst {dimension_numbers = #tpu.dot_dimension_numbers<[1], [0], [0], [1], [0, 0, 1, 1], [], []>} : vector<16x16xbf16>, vector<16x256xbf16>, vector<16x256xf32> -> vector<16x256xf32>
    %c0_9 = arith.constant 0 : index
    %c0_10 = arith.constant 0 : index
    %11 = vector.load %arg8[%c0_9, %c0_10] : memref<24x512xf32, #tpu.memory_space<vmem>>, vector<1x256xf32>
    %12 = vector.broadcast %11 : vector<1x256xf32> to vector<16x256xf32>
    %13 = arith.addf %10, %12 : vector<16x256xf32>
    %cst_11 = arith.constant 0.000000e+00 : f32
    %14 = vector.broadcast %cst_11 : f32 to vector<16x256xf32>
    %15 = arith.maximumf %13, %14 : vector<16x256xf32>
    %c16 = arith.constant 16 : index
    %c0_12 = arith.constant 0 : index
    %16 = vector.load %arg5[%c16, %c0_12] : memref<608x256xbf16, #tpu.memory_space<vmem>>, vector<256x256xbf16>
    %17 = arith.truncf %15 : vector<16x256xf32> to vector<16x256xbf16>
    %cst_13 = arith.constant dense<0.000000e+00> : vector<16x256xf32>
    %18 = tpu.matmul %17, %16, %cst_13 {dimension_numbers = #tpu.dot_dimension_numbers<[1], [0], [0], [1], [0, 0, 1, 1], [], []>} : vector<16x256xbf16>, vector<256x256xbf16>, vector<16x256xf32> -> vector<16x256xf32>
    %c1 = arith.constant 1 : index
    %c0_14 = arith.constant 0 : index
    %19 = vector.load %arg8[%c1, %c0_14] : memref<24x512xf32, #tpu.memory_space<vmem>>, vector<1x256xf32>
    %20 = vector.broadcast %19 : vector<1x256xf32> to vector<16x256xf32>
    %21 = arith.addf %18, %20 : vector<16x256xf32>
    %cst_15 = arith.constant 0.000000e+00 : f32
    %22 = vector.broadcast %cst_15 : f32 to vector<16x256xf32>
    %23 = arith.maximumf %21, %22 : vector<16x256xf32>
    %c0_16 = arith.constant 0 : index
    %c0_17 = arith.constant 0 : index
    %24 = vector.load %arg7[%c0_16, %c0_17] : memref<768x16xbf16, #tpu.memory_space<vmem>>, vector<256x16xbf16>
    %25 = arith.truncf %23 : vector<16x256xf32> to vector<16x256xbf16>
    %cst_18 = arith.constant dense<0.000000e+00> : vector<16x16xf32>
    %26 = tpu.matmul %25, %24, %cst_18 {dimension_numbers = #tpu.dot_dimension_numbers<[1], [0], [0], [1], [0, 0, 1, 1], [], []>} : vector<16x256xbf16>, vector<256x16xbf16>, vector<16x16xf32> -> vector<16x16xf32>
    %c2 = arith.constant 2 : index
    %c0_19 = arith.constant 0 : index
    %27 = vector.load %arg8[%c2, %c0_19] : memref<24x512xf32, #tpu.memory_space<vmem>>, vector<1x16xf32>
    %28 = vector.broadcast %27 : vector<1x16xf32> to vector<16x16xf32>
    %29 = arith.addf %26, %28 : vector<16x16xf32>
    %c256 = arith.constant 256 : index
    %c0_20 = arith.constant 0 : index
    %30 = vector.load %arg7[%c256, %c0_20] : memref<768x16xbf16, #tpu.memory_space<vmem>>, vector<256x16xbf16>
    %31 = arith.truncf %23 : vector<16x256xf32> to vector<16x256xbf16>
    %cst_21 = arith.constant dense<0.000000e+00> : vector<16x16xf32>
    %32 = tpu.matmul %31, %30, %cst_21 {dimension_numbers = #tpu.dot_dimension_numbers<[1], [0], [0], [1], [0, 0, 1, 1], [], []>} : vector<16x256xbf16>, vector<256x16xbf16>, vector<16x16xf32> -> vector<16x16xf32>
    %c3 = arith.constant 3 : index
    %c0_22 = arith.constant 0 : index
    %33 = vector.load %arg8[%c3, %c0_22] : memref<24x512xf32, #tpu.memory_space<vmem>>, vector<1x16xf32>
    %34 = vector.broadcast %33 : vector<1x16xf32> to vector<16x16xf32>
    %35 = arith.addf %32, %34 : vector<16x16xf32>
    %cst_23 = arith.constant 5.000000e-01 : f32
    %36 = vector.broadcast %cst_23 : f32 to vector<16x16xf32>
    %37 = arith.mulf %36, %35 : vector<16x16xf32>
    %38 = math.exp %37 : vector<16x16xf32>
    %39 = arith.mulf %38, %6 : vector<16x16xf32>
    %40 = arith.addf %29, %39 : vector<16x16xf32>
    %41 = arith.mulf %6, %6 : vector<16x16xf32>
    %42 = arith.addf %35, %41 : vector<16x16xf32>
    %cst_24 = arith.constant dense<0.000000e+00> : vector<16xf32>
    %43 = vector.multi_reduction <add>, %42, %cst_24 [1] : vector<16x16xf32> to vector<16xf32>
    %44 = vector.shape_cast %43 : vector<16xf32> to vector<16x1xf32>
    %cst_25 = arith.constant 5.000000e-01 : f32
    %45 = vector.broadcast %cst_25 : f32 to vector<16x1xf32>
    %46 = arith.mulf %45, %44 : vector<16x1xf32>
    %cst_26 = arith.constant -7.35150814 : f32
    %47 = vector.broadcast %cst_26 : f32 to vector<16x1xf32>
    %48 = arith.subf %47, %46 : vector<16x1xf32>
    %c272 = arith.constant 272 : index
    %c0_27 = arith.constant 0 : index
    %49 = vector.load %arg5[%c272, %c0_27] : memref<608x256xbf16, #tpu.memory_space<vmem>>, vector<16x256xbf16>
    %50 = arith.truncf %4 : vector<16x16xf32> to vector<16x16xbf16>
    %cst_28 = arith.constant dense<0.000000e+00> : vector<16x256xf32>
    %51 = tpu.matmul %50, %49, %cst_28 {dimension_numbers = #tpu.dot_dimension_numbers<[1], [0], [0], [1], [0, 0, 1, 1], [], []>} : vector<16x16xbf16>, vector<16x256xbf16>, vector<16x256xf32> -> vector<16x256xf32>
    %c4 = arith.constant 4 : index
    %c0_29 = arith.constant 0 : index
    %52 = vector.load %arg8[%c4, %c0_29] : memref<24x512xf32, #tpu.memory_space<vmem>>, vector<1x256xf32>
    %53 = vector.broadcast %52 : vector<1x256xf32> to vector<16x256xf32>
    %54 = arith.addf %51, %53 : vector<16x256xf32>
    %cst_30 = arith.constant 0.000000e+00 : f32
    %55 = vector.broadcast %cst_30 : f32 to vector<16x256xf32>
    %56 = arith.maximumf %54, %55 : vector<16x256xf32>
    %c0_31 = arith.constant 0 : index
    %c0_32 = arith.constant 0 : index
    %57 = vector.load %arg6[%c0_31, %c0_32] : memref<1024x64xbf16, #tpu.memory_space<vmem>>, vector<256x64xbf16>
    %58 = arith.truncf %56 : vector<16x256xf32> to vector<16x256xbf16>
    %cst_33 = arith.constant dense<0.000000e+00> : vector<16x64xf32>
    %59 = tpu.matmul %58, %57, %cst_33 {dimension_numbers = #tpu.dot_dimension_numbers<[1], [0], [0], [1], [0, 0, 1, 1], [], []>} : vector<16x256xbf16>, vector<256x64xbf16>, vector<16x64xf32> -> vector<16x64xf32>
    %c5 = arith.constant 5 : index
    %c0_34 = arith.constant 0 : index
    %60 = vector.load %arg8[%c5, %c0_34] : memref<24x512xf32, #tpu.memory_space<vmem>>, vector<1x64xf32>
    %61 = vector.broadcast %60 : vector<1x64xf32> to vector<16x64xf32>
    %62 = arith.addf %59, %61 : vector<16x64xf32>
    %c288 = arith.constant 288 : index
    %c0_35 = arith.constant 0 : index
    %63 = vector.load %arg5[%c288, %c0_35] : memref<608x256xbf16, #tpu.memory_space<vmem>>, vector<16x256xbf16>
    %64 = arith.truncf %40 : vector<16x16xf32> to vector<16x16xbf16>
    %cst_36 = arith.constant dense<0.000000e+00> : vector<16x256xf32>
    %65 = tpu.matmul %64, %63, %cst_36 {dimension_numbers = #tpu.dot_dimension_numbers<[1], [0], [0], [1], [0, 0, 1, 1], [], []>} : vector<16x16xbf16>, vector<16x256xbf16>, vector<16x256xf32> -> vector<16x256xf32>
    %c6 = arith.constant 6 : index
    %c0_37 = arith.constant 0 : index
    %66 = vector.load %arg8[%c6, %c0_37] : memref<24x512xf32, #tpu.memory_space<vmem>>, vector<1x256xf32>
    %67 = vector.broadcast %66 : vector<1x256xf32> to vector<16x256xf32>
    %68 = arith.addf %65, %67 : vector<16x256xf32>
    %cst_38 = arith.constant 0.000000e+00 : f32
    %69 = vector.broadcast %cst_38 : f32 to vector<16x256xf32>
    %70 = arith.maximumf %68, %69 : vector<16x256xf32>
    %c256_39 = arith.constant 256 : index
    %c0_40 = arith.constant 0 : index
    %71 = vector.load %arg6[%c256_39, %c0_40] : memref<1024x64xbf16, #tpu.memory_space<vmem>>, vector<256x64xbf16>
    %72 = arith.truncf %70 : vector<16x256xf32> to vector<16x256xbf16>
    %cst_41 = arith.constant dense<0.000000e+00> : vector<16x64xf32>
    %73 = tpu.matmul %72, %71, %cst_41 {dimension_numbers = #tpu.dot_dimension_numbers<[1], [0], [0], [1], [0, 0, 1, 1], [], []>} : vector<16x256xbf16>, vector<256x64xbf16>, vector<16x64xf32> -> vector<16x64xf32>
    %c7 = arith.constant 7 : index
    %c0_42 = arith.constant 0 : index
    %74 = vector.load %arg8[%c7, %c0_42] : memref<24x512xf32, #tpu.memory_space<vmem>>, vector<1x64xf32>
    %75 = vector.broadcast %74 : vector<1x64xf32> to vector<16x64xf32>
    %76 = arith.addf %73, %75 : vector<16x64xf32>
    %c304 = arith.constant 304 : index
    %c0_43 = arith.constant 0 : index
    %77 = vector.load %arg5[%c304, %c0_43] : memref<608x256xbf16, #tpu.memory_space<vmem>>, vector<16x256xbf16>
    %78 = arith.truncf %40 : vector<16x16xf32> to vector<16x16xbf16>
    %cst_44 = arith.constant dense<0.000000e+00> : vector<16x256xf32>
    %79 = tpu.matmul %78, %77, %cst_44 {dimension_numbers = #tpu.dot_dimension_numbers<[1], [0], [0], [1], [0, 0, 1, 1], [], []>} : vector<16x16xbf16>, vector<16x256xbf16>, vector<16x256xf32> -> vector<16x256xf32>
    %c8 = arith.constant 8 : index
    %c0_45 = arith.constant 0 : index
    %80 = vector.load %arg8[%c8, %c0_45] : memref<24x512xf32, #tpu.memory_space<vmem>>, vector<1x256xf32>
    %81 = vector.broadcast %80 : vector<1x256xf32> to vector<16x256xf32>
    %82 = arith.addf %79, %81 : vector<16x256xf32>
    %cst_46 = arith.constant 0.000000e+00 : f32
    %83 = vector.broadcast %cst_46 : f32 to vector<16x256xf32>
    %84 = arith.maximumf %82, %83 : vector<16x256xf32>
    %c512 = arith.constant 512 : index
    %c0_47 = arith.constant 0 : index
    %85 = vector.load %arg6[%c512, %c0_47] : memref<1024x64xbf16, #tpu.memory_space<vmem>>, vector<256x64xbf16>
    %86 = arith.truncf %84 : vector<16x256xf32> to vector<16x256xbf16>
    %cst_48 = arith.constant dense<0.000000e+00> : vector<16x64xf32>
    %87 = tpu.matmul %86, %85, %cst_48 {dimension_numbers = #tpu.dot_dimension_numbers<[1], [0], [0], [1], [0, 0, 1, 1], [], []>} : vector<16x256xbf16>, vector<256x64xbf16>, vector<16x64xf32> -> vector<16x64xf32>
    %c9 = arith.constant 9 : index
    %c0_49 = arith.constant 0 : index
    %88 = vector.load %arg8[%c9, %c0_49] : memref<24x512xf32, #tpu.memory_space<vmem>>, vector<1x64xf32>
    %89 = vector.broadcast %88 : vector<1x64xf32> to vector<16x64xf32>
    %90 = arith.addf %87, %89 : vector<16x64xf32>
    %c336 = arith.constant 336 : index
    %c0_50 = arith.constant 0 : index
    %91 = vector.load %arg5[%c336, %c0_50] : memref<608x256xbf16, #tpu.memory_space<vmem>>, vector<16x256xbf16>
    %92 = arith.truncf %40 : vector<16x16xf32> to vector<16x16xbf16>
    %cst_51 = arith.constant dense<0.000000e+00> : vector<16x256xf32>
    %93 = tpu.matmul %92, %91, %cst_51 {dimension_numbers = #tpu.dot_dimension_numbers<[1], [0], [0], [1], [0, 0, 1, 1], [], []>} : vector<16x16xbf16>, vector<16x256xbf16>, vector<16x256xf32> -> vector<16x256xf32>
    %c16_52 = arith.constant 16 : index
    %c0_53 = arith.constant 0 : index
    %94 = vector.load %arg8[%c16_52, %c0_53] : memref<24x512xf32, #tpu.memory_space<vmem>>, vector<1x256xf32>
    %95 = vector.broadcast %94 : vector<1x256xf32> to vector<16x256xf32>
    %96 = arith.addf %93, %95 : vector<16x256xf32>
    %cst_54 = arith.constant 0.000000e+00 : f32
    %97 = vector.broadcast %cst_54 : f32 to vector<16x256xf32>
    %98 = arith.maximumf %96, %97 : vector<16x256xf32>
    %c352 = arith.constant 352 : index
    %c0_55 = arith.constant 0 : index
    %99 = vector.load %arg5[%c352, %c0_55] : memref<608x256xbf16, #tpu.memory_space<vmem>>, vector<256x256xbf16>
    %100 = arith.truncf %98 : vector<16x256xf32> to vector<16x256xbf16>
    %cst_56 = arith.constant dense<0.000000e+00> : vector<16x256xf32>
    %101 = tpu.matmul %100, %99, %cst_56 {dimension_numbers = #tpu.dot_dimension_numbers<[1], [0], [0], [1], [0, 0, 1, 1], [], []>} : vector<16x256xbf16>, vector<256x256xbf16>, vector<16x256xf32> -> vector<16x256xf32>
    %c17 = arith.constant 17 : index
    %c0_57 = arith.constant 0 : index
    %102 = vector.load %arg8[%c17, %c0_57] : memref<24x512xf32, #tpu.memory_space<vmem>>, vector<1x256xf32>
    %103 = vector.broadcast %102 : vector<1x256xf32> to vector<16x256xf32>
    %104 = arith.addf %101, %103 : vector<16x256xf32>
    %cst_58 = arith.constant 0.000000e+00 : f32
    %105 = vector.broadcast %cst_58 : f32 to vector<16x256xf32>
    %106 = arith.maximumf %104, %105 : vector<16x256xf32>
    %c512_59 = arith.constant 512 : index
    %c0_60 = arith.constant 0 : index
    %107 = vector.load %arg7[%c512_59, %c0_60] : memref<768x16xbf16, #tpu.memory_space<vmem>>, vector<256x16xbf16>
    %108 = arith.truncf %106 : vector<16x256xf32> to vector<16x256xbf16>
    %cst_61 = arith.constant dense<0.000000e+00> : vector<16x16xf32>
    %109 = tpu.matmul %108, %107, %cst_61 {dimension_numbers = #tpu.dot_dimension_numbers<[1], [0], [0], [1], [0, 0, 1, 1], [], []>} : vector<16x256xbf16>, vector<256x16xbf16>, vector<16x16xf32> -> vector<16x16xf32>
    %c18 = arith.constant 18 : index
    %c0_62 = arith.constant 0 : index
    %110 = vector.load %arg8[%c18, %c0_62] : memref<24x512xf32, #tpu.memory_space<vmem>>, vector<1x16xf32>
    %111 = vector.broadcast %110 : vector<1x16xf32> to vector<16x16xf32>
    %112 = arith.addf %109, %111 : vector<16x16xf32>
    %113 = arith.mulf %5, %112 : vector<16x16xf32>
    %cst_63 = arith.constant 0.000000e+00 : f32
    %114 = vector.broadcast %cst_63 : f32 to vector<16x16xf32>
    %115 = arith.maximumf %112, %114 : vector<16x16xf32>
    %116 = math.absf %112 : vector<16x16xf32>
    %cst_64 = arith.constant 0.000000e+00 : f32
    %117 = vector.broadcast %cst_64 : f32 to vector<16x16xf32>
    %118 = arith.subf %117, %116 : vector<16x16xf32>
    %119 = math.exp %118 : vector<16x16xf32>
    %120 = math.log1p %119 : vector<16x16xf32>
    %121 = arith.addf %115, %120 : vector<16x16xf32>
    %122 = arith.subf %113, %121 : vector<16x16xf32>
    %cst_65 = arith.constant dense<0.000000e+00> : vector<16xf32>
    %123 = vector.multi_reduction <add>, %122, %cst_65 [1] : vector<16x16xf32> to vector<16xf32>
    %124 = vector.shape_cast %123 : vector<16xf32> to vector<16x1xf32>
    %125 = arith.mulf %40, %40 : vector<16x16xf32>
    %cst_66 = arith.constant dense<0.000000e+00> : vector<16xf32>
    %126 = vector.multi_reduction <add>, %125, %cst_66 [1] : vector<16x16xf32> to vector<16xf32>
    %127 = vector.shape_cast %126 : vector<16xf32> to vector<16x1xf32>
    %cst_67 = arith.constant 5.000000e-01 : f32
    %128 = vector.broadcast %cst_67 : f32 to vector<16x1xf32>
    %129 = arith.mulf %128, %127 : vector<16x1xf32>
    %cst_68 = arith.constant -7.35150814 : f32
    %130 = vector.broadcast %cst_68 : f32 to vector<16x1xf32>
    %131 = arith.subf %130, %129 : vector<16x1xf32>
    %c0_i32_69 = arith.constant 0 : i32
    %132 = tpu.memref_slice %arg14[%c0_i32_69] : memref<2x!tpu.dma_semaphore, #tpu.memory_space<semaphore_mem>> -> memref<1x!tpu.dma_semaphore, #tpu.memory_space<semaphore_mem>>
    %133 = tpu.memref_squeeze %132 : memref<1x!tpu.dma_semaphore, #tpu.memory_space<semaphore_mem>> -> memref<!tpu.dma_semaphore, #tpu.memory_space<semaphore_mem>>
    tpu.wait_dma2 semaphore(%133 : memref<!tpu.dma_semaphore, #tpu.memory_space<semaphore_mem>>) src(%arg9 : memref<1280x512xbf16, #tpu.memory_space<any>>) dst(%arg12 : memref<1280x512xbf16, #tpu.memory_space<vmem>>)
    %c1_i32_70 = arith.constant 1 : i32
    %134 = tpu.memref_slice %arg14[%c1_i32_70] : memref<2x!tpu.dma_semaphore, #tpu.memory_space<semaphore_mem>> -> memref<1x!tpu.dma_semaphore, #tpu.memory_space<semaphore_mem>>
    %135 = tpu.memref_squeeze %134 : memref<1x!tpu.dma_semaphore, #tpu.memory_space<semaphore_mem>> -> memref<!tpu.dma_semaphore, #tpu.memory_space<semaphore_mem>>
    tpu.wait_dma2 semaphore(%135 : memref<!tpu.dma_semaphore, #tpu.memory_space<semaphore_mem>>) src(%arg10 : memref<1536x16xbf16, #tpu.memory_space<any>>) dst(%arg13 : memref<1536x16xbf16, #tpu.memory_space<vmem>>)
    %c0_71 = arith.constant 0 : index
    %c0_72 = arith.constant 0 : index
    %136 = vector.load %arg12[%c0_71, %c0_72] : memref<1280x512xbf16, #tpu.memory_space<vmem>>, vector<64x512xbf16>
    %137 = arith.truncf %62 : vector<16x64xf32> to vector<16x64xbf16>
    %cst_73 = arith.constant dense<0.000000e+00> : vector<16x512xf32>
    %138 = tpu.matmul %137, %136, %cst_73 {dimension_numbers = #tpu.dot_dimension_numbers<[1], [0], [0], [1], [0, 0, 1, 1], [], []>} : vector<16x64xbf16>, vector<64x512xbf16>, vector<16x512xf32> -> vector<16x512xf32>
    %c64 = arith.constant 64 : index
    %c0_74 = arith.constant 0 : index
    %139 = vector.load %arg12[%c64, %c0_74] : memref<1280x512xbf16, #tpu.memory_space<vmem>>, vector<64x512xbf16>
    %140 = arith.truncf %76 : vector<16x64xf32> to vector<16x64xbf16>
    %cst_75 = arith.constant dense<0.000000e+00> : vector<16x512xf32>
    %141 = tpu.matmul %140, %139, %cst_75 {dimension_numbers = #tpu.dot_dimension_numbers<[1], [0], [0], [1], [0, 0, 1, 1], [], []>} : vector<16x64xbf16>, vector<64x512xbf16>, vector<16x512xf32> -> vector<16x512xf32>
    %142 = arith.addf %138, %141 : vector<16x512xf32>
    %c12 = arith.constant 12 : index
    %c0_76 = arith.constant 0 : index
    %143 = vector.load %arg8[%c12, %c0_76] : memref<24x512xf32, #tpu.memory_space<vmem>>, vector<1x512xf32>
    %144 = vector.broadcast %143 : vector<1x512xf32> to vector<16x512xf32>
    %145 = arith.addf %142, %144 : vector<16x512xf32>
    %cst_77 = arith.constant 0.000000e+00 : f32
    %146 = vector.broadcast %cst_77 : f32 to vector<16x512xf32>
    %147 = arith.maximumf %145, %146 : vector<16x512xf32>
    %c128 = arith.constant 128 : index
    %c0_78 = arith.constant 0 : index
    %148 = vector.load %arg12[%c128, %c0_78] : memref<1280x512xbf16, #tpu.memory_space<vmem>>, vector<512x512xbf16>
    %149 = arith.truncf %147 : vector<16x512xf32> to vector<16x512xbf16>
    %cst_79 = arith.constant dense<0.000000e+00> : vector<16x512xf32>
    %150 = tpu.matmul %149, %148, %cst_79 {dimension_numbers = #tpu.dot_dimension_numbers<[1], [0], [0], [1], [0, 0, 1, 1], [], []>} : vector<16x512xbf16>, vector<512x512xbf16>, vector<16x512xf32> -> vector<16x512xf32>
    %c13 = arith.constant 13 : index
    %c0_80 = arith.constant 0 : index
    %151 = vector.load %arg8[%c13, %c0_80] : memref<24x512xf32, #tpu.memory_space<vmem>>, vector<1x512xf32>
    %152 = vector.broadcast %151 : vector<1x512xf32> to vector<16x512xf32>
    %153 = arith.addf %150, %152 : vector<16x512xf32>
    %cst_81 = arith.constant 0.000000e+00 : f32
    %154 = vector.broadcast %cst_81 : f32 to vector<16x512xf32>
    %155 = arith.maximumf %153, %154 : vector<16x512xf32>
    %c0_82 = arith.constant 0 : index
    %c0_83 = arith.constant 0 : index
    %156 = vector.load %arg13[%c0_82, %c0_83] : memref<1536x16xbf16, #tpu.memory_space<vmem>>, vector<512x16xbf16>
    %157 = arith.truncf %155 : vector<16x512xf32> to vector<16x512xbf16>
    %cst_84 = arith.constant dense<0.000000e+00> : vector<16x16xf32>
    %158 = tpu.matmul %157, %156, %cst_84 {dimension_numbers = #tpu.dot_dimension_numbers<[1], [0], [0], [1], [0, 0, 1, 1], [], []>} : vector<16x512xbf16>, vector<512x16xbf16>, vector<16x16xf32> -> vector<16x16xf32>
    %c14 = arith.constant 14 : index
    %c0_85 = arith.constant 0 : index
    %159 = vector.load %arg8[%c14, %c0_85] : memref<24x512xf32, #tpu.memory_space<vmem>>, vector<1x16xf32>
    %160 = vector.broadcast %159 : vector<1x16xf32> to vector<16x16xf32>
    %161 = arith.addf %158, %160 : vector<16x16xf32>
    %c512_86 = arith.constant 512 : index
    %c0_87 = arith.constant 0 : index
    %162 = vector.load %arg13[%c512_86, %c0_87] : memref<1536x16xbf16, #tpu.memory_space<vmem>>, vector<512x16xbf16>
    %163 = arith.truncf %155 : vector<16x512xf32> to vector<16x512xbf16>
    %cst_88 = arith.constant dense<0.000000e+00> : vector<16x16xf32>
    %164 = tpu.matmul %163, %162, %cst_88 {dimension_numbers = #tpu.dot_dimension_numbers<[1], [0], [0], [1], [0, 0, 1, 1], [], []>} : vector<16x512xbf16>, vector<512x16xbf16>, vector<16x16xf32> -> vector<16x16xf32>
    %c15 = arith.constant 15 : index
    %c0_89 = arith.constant 0 : index
    %165 = vector.load %arg8[%c15, %c0_89] : memref<24x512xf32, #tpu.memory_space<vmem>>, vector<1x16xf32>
    %166 = vector.broadcast %165 : vector<1x16xf32> to vector<16x16xf32>
    %167 = arith.addf %164, %166 : vector<16x16xf32>
    %cst_90 = arith.constant 5.000000e-01 : f32
    %168 = vector.broadcast %cst_90 : f32 to vector<16x16xf32>
    %169 = arith.mulf %168, %167 : vector<16x16xf32>
    %170 = math.exp %169 : vector<16x16xf32>
    %171 = arith.mulf %170, %7 : vector<16x16xf32>
    %172 = arith.addf %161, %171 : vector<16x16xf32>
    %173 = arith.mulf %7, %7 : vector<16x16xf32>
    %174 = arith.addf %167, %173 : vector<16x16xf32>
    %cst_91 = arith.constant dense<0.000000e+00> : vector<16xf32>
    %175 = vector.multi_reduction <add>, %174, %cst_91 [1] : vector<16x16xf32> to vector<16xf32>
    %176 = vector.shape_cast %175 : vector<16xf32> to vector<16x1xf32>
    %cst_92 = arith.constant 5.000000e-01 : f32
    %177 = vector.broadcast %cst_92 : f32 to vector<16x1xf32>
    %178 = arith.mulf %177, %176 : vector<16x1xf32>
    %cst_93 = arith.constant -7.35150814 : f32
    %179 = vector.broadcast %cst_93 : f32 to vector<16x1xf32>
    %180 = arith.subf %179, %178 : vector<16x1xf32>
    %181 = arith.mulf %172, %172 : vector<16x16xf32>
    %cst_94 = arith.constant dense<0.000000e+00> : vector<16xf32>
    %182 = vector.multi_reduction <add>, %181, %cst_94 [1] : vector<16x16xf32> to vector<16xf32>
    %183 = vector.shape_cast %182 : vector<16xf32> to vector<16x1xf32>
    %cst_95 = arith.constant 5.000000e-01 : f32
    %184 = vector.broadcast %cst_95 : f32 to vector<16x1xf32>
    %185 = arith.mulf %184, %183 : vector<16x1xf32>
    %cst_96 = arith.constant -7.35150814 : f32
    %186 = vector.broadcast %cst_96 : f32 to vector<16x1xf32>
    %187 = arith.subf %186, %185 : vector<16x1xf32>
    %c320 = arith.constant 320 : index
    %c0_97 = arith.constant 0 : index
    %188 = vector.load %arg5[%c320, %c0_97] : memref<608x256xbf16, #tpu.memory_space<vmem>>, vector<16x256xbf16>
    %189 = arith.truncf %172 : vector<16x16xf32> to vector<16x16xbf16>
    %cst_98 = arith.constant dense<0.000000e+00> : vector<16x256xf32>
    %190 = tpu.matmul %189, %188, %cst_98 {dimension_numbers = #tpu.dot_dimension_numbers<[1], [0], [0], [1], [0, 0, 1, 1], [], []>} : vector<16x16xbf16>, vector<16x256xbf16>, vector<16x256xf32> -> vector<16x256xf32>
    %c10 = arith.constant 10 : index
    %c0_99 = arith.constant 0 : index
    %191 = vector.load %arg8[%c10, %c0_99] : memref<24x512xf32, #tpu.memory_space<vmem>>, vector<1x256xf32>
    %192 = vector.broadcast %191 : vector<1x256xf32> to vector<16x256xf32>
    %193 = arith.addf %190, %192 : vector<16x256xf32>
    %cst_100 = arith.constant 0.000000e+00 : f32
    %194 = vector.broadcast %cst_100 : f32 to vector<16x256xf32>
    %195 = arith.maximumf %193, %194 : vector<16x256xf32>
    %c768 = arith.constant 768 : index
    %c0_101 = arith.constant 0 : index
    %196 = vector.load %arg6[%c768, %c0_101] : memref<1024x64xbf16, #tpu.memory_space<vmem>>, vector<256x64xbf16>
    %197 = arith.truncf %195 : vector<16x256xf32> to vector<16x256xbf16>
    %cst_102 = arith.constant dense<0.000000e+00> : vector<16x64xf32>
    %198 = tpu.matmul %197, %196, %cst_102 {dimension_numbers = #tpu.dot_dimension_numbers<[1], [0], [0], [1], [0, 0, 1, 1], [], []>} : vector<16x256xbf16>, vector<256x64xbf16>, vector<16x64xf32> -> vector<16x64xf32>
    %c11 = arith.constant 11 : index
    %c0_103 = arith.constant 0 : index
    %199 = vector.load %arg8[%c11, %c0_103] : memref<24x512xf32, #tpu.memory_space<vmem>>, vector<1x64xf32>
    %200 = vector.broadcast %199 : vector<1x64xf32> to vector<16x64xf32>
    %201 = arith.addf %198, %200 : vector<16x64xf32>
    %c640 = arith.constant 640 : index
    %c0_104 = arith.constant 0 : index
    %202 = vector.load %arg12[%c640, %c0_104] : memref<1280x512xbf16, #tpu.memory_space<vmem>>, vector<64x512xbf16>
    %203 = arith.truncf %90 : vector<16x64xf32> to vector<16x64xbf16>
    %cst_105 = arith.constant dense<0.000000e+00> : vector<16x512xf32>
    %204 = tpu.matmul %203, %202, %cst_105 {dimension_numbers = #tpu.dot_dimension_numbers<[1], [0], [0], [1], [0, 0, 1, 1], [], []>} : vector<16x64xbf16>, vector<64x512xbf16>, vector<16x512xf32> -> vector<16x512xf32>
    %c704 = arith.constant 704 : index
    %c0_106 = arith.constant 0 : index
    %205 = vector.load %arg12[%c704, %c0_106] : memref<1280x512xbf16, #tpu.memory_space<vmem>>, vector<64x512xbf16>
    %206 = arith.truncf %201 : vector<16x64xf32> to vector<16x64xbf16>
    %cst_107 = arith.constant dense<0.000000e+00> : vector<16x512xf32>
    %207 = tpu.matmul %206, %205, %cst_107 {dimension_numbers = #tpu.dot_dimension_numbers<[1], [0], [0], [1], [0, 0, 1, 1], [], []>} : vector<16x64xbf16>, vector<64x512xbf16>, vector<16x512xf32> -> vector<16x512xf32>
    %208 = arith.addf %204, %207 : vector<16x512xf32>
    %c19 = arith.constant 19 : index
    %c0_108 = arith.constant 0 : index
    %209 = vector.load %arg8[%c19, %c0_108] : memref<24x512xf32, #tpu.memory_space<vmem>>, vector<1x512xf32>
    %210 = vector.broadcast %209 : vector<1x512xf32> to vector<16x512xf32>
    %211 = arith.addf %208, %210 : vector<16x512xf32>
    %cst_109 = arith.constant 0.000000e+00 : f32
    %212 = vector.broadcast %cst_109 : f32 to vector<16x512xf32>
    %213 = arith.maximumf %211, %212 : vector<16x512xf32>
    %c768_110 = arith.constant 768 : index
    %c0_111 = arith.constant 0 : index
    %214 = vector.load %arg12[%c768_110, %c0_111] : memref<1280x512xbf16, #tpu.memory_space<vmem>>, vector<512x512xbf16>
    %215 = arith.truncf %213 : vector<16x512xf32> to vector<16x512xbf16>
    %cst_112 = arith.constant dense<0.000000e+00> : vector<16x512xf32>
    %216 = tpu.matmul %215, %214, %cst_112 {dimension_numbers = #tpu.dot_dimension_numbers<[1], [0], [0], [1], [0, 0, 1, 1], [], []>} : vector<16x512xbf16>, vector<512x512xbf16>, vector<16x512xf32> -> vector<16x512xf32>
    %c20 = arith.constant 20 : index
    %c0_113 = arith.constant 0 : index
    %217 = vector.load %arg8[%c20, %c0_113] : memref<24x512xf32, #tpu.memory_space<vmem>>, vector<1x512xf32>
    %218 = vector.broadcast %217 : vector<1x512xf32> to vector<16x512xf32>
    %219 = arith.addf %216, %218 : vector<16x512xf32>
    %cst_114 = arith.constant 0.000000e+00 : f32
    %220 = vector.broadcast %cst_114 : f32 to vector<16x512xf32>
    %221 = arith.maximumf %219, %220 : vector<16x512xf32>
    %c1024 = arith.constant 1024 : index
    %c0_115 = arith.constant 0 : index
    %222 = vector.load %arg13[%c1024, %c0_115] : memref<1536x16xbf16, #tpu.memory_space<vmem>>, vector<512x16xbf16>
    %223 = arith.truncf %221 : vector<16x512xf32> to vector<16x512xbf16>
    %cst_116 = arith.constant dense<0.000000e+00> : vector<16x16xf32>
    %224 = tpu.matmul %223, %222, %cst_116 {dimension_numbers = #tpu.dot_dimension_numbers<[1], [0], [0], [1], [0, 0, 1, 1], [], []>} : vector<16x512xbf16>, vector<512x16xbf16>, vector<16x16xf32> -> vector<16x16xf32>
    %c21 = arith.constant 21 : index
    %c0_117 = arith.constant 0 : index
    %225 = vector.load %arg8[%c21, %c0_117] : memref<24x512xf32, #tpu.memory_space<vmem>>, vector<1x16xf32>
    %226 = vector.broadcast %225 : vector<1x16xf32> to vector<16x16xf32>
    %227 = arith.addf %224, %226 : vector<16x16xf32>
    %228 = arith.mulf %4, %227 : vector<16x16xf32>
    %cst_118 = arith.constant 0.000000e+00 : f32
    %229 = vector.broadcast %cst_118 : f32 to vector<16x16xf32>
    %230 = arith.maximumf %227, %229 : vector<16x16xf32>
    %231 = math.absf %227 : vector<16x16xf32>
    %cst_119 = arith.constant 0.000000e+00 : f32
    %232 = vector.broadcast %cst_119 : f32 to vector<16x16xf32>
    %233 = arith.subf %232, %231 : vector<16x16xf32>
    %234 = math.exp %233 : vector<16x16xf32>
    %235 = math.log1p %234 : vector<16x16xf32>
    %236 = arith.addf %230, %235 : vector<16x16xf32>
    %237 = arith.subf %228, %236 : vector<16x16xf32>
    %cst_120 = arith.constant dense<0.000000e+00> : vector<16xf32>
    %238 = vector.multi_reduction <add>, %237, %cst_120 [1] : vector<16x16xf32> to vector<16xf32>
    %239 = vector.shape_cast %238 : vector<16xf32> to vector<16x1xf32>
    %240 = arith.addf %239, %124 : vector<16x1xf32>
    %241 = arith.addf %240, %131 : vector<16x1xf32>
    %242 = arith.addf %241, %187 : vector<16x1xf32>
    %243 = arith.subf %242, %48 : vector<16x1xf32>
    %244 = arith.subf %243, %180 : vector<16x1xf32>
    %245 = vector.shape_cast %244 : vector<16x1xf32> to vector<16x1xf32>
    %246 = vector.broadcast %245 : vector<16x1xf32> to vector<16x128xf32>
    %c0_121 = arith.constant 0 : index
    %c0_122 = arith.constant 0 : index
    %247 = vector.load %arg11[%c0_121, %c0_122] : memref<16x128xf32, #tpu.memory_space<vmem>>, vector<16x128xf32>
    tpu.vector_store %arg11[%c0_121, %c0_122], %246 {strides = array<i32>} : memref<16x128xf32, #tpu.memory_space<vmem>>, vector<16x128xf32>,
    return
  }
  func.func @transform_0(%arg0: i32) -> (i32, i32) {
    %c0_i32 = arith.constant 0 : i32
    %c0_i32_0 = arith.constant 0 : i32
    %c0_i32_1 = arith.constant 0 : i32
    return %c0_i32, %c0_i32_0 : i32, i32
  }
  func.func @transform_1(%arg0: i32) -> (i32, i32) {
    %c0_i32 = arith.constant 0 : i32
    %c0_i32_0 = arith.constant 0 : i32
    %c0_i32_1 = arith.constant 0 : i32
    return %c0_i32, %c0_i32_0 : i32, i32
  }
  func.func @transform_2(%arg0: i32) -> (i32, i32) {
    %c0_i32 = arith.constant 0 : i32
    %c0_i32_0 = arith.constant 0 : i32
    %c0_i32_1 = arith.constant 0 : i32
    return %c0_i32, %c0_i32_0 : i32, i32
  }
  func.func @transform_3(%arg0: i32) -> (i32, i32) {
    %c0_i32 = arith.constant 0 : i32
    %c0_i32_0 = arith.constant 0 : i32
    %c0_i32_1 = arith.constant 0 : i32
    return %c0_i32, %c0_i32_0 : i32, i32
  }
  func.func @transform_4(%arg0: i32) -> (i32, i32) {
    %c0_i32 = arith.constant 0 : i32
    %c0_i32_0 = arith.constant 0 : i32
    %c0_i32_1 = arith.constant 0 : i32
    return %c0_i32, %c0_i32_0 : i32, i32
  }
  func.func @transform_5(%arg0: i32) -> (i32, i32) {
    %c0_i32 = arith.constant 0 : i32
    %c0_i32_0 = arith.constant 0 : i32
    %c0_i32_1 = arith.constant 0 : i32
    return %c0_i32, %c0_i32_0 : i32, i32
  }
  func.func @transform_6(%arg0: i32) -> (i32, i32) {
    %c0_i32 = arith.constant 0 : i32
    %c0_i32_0 = arith.constant 0 : i32
    %c0_i32_1 = arith.constant 0 : i32
    return %c0_i32, %c0_i32_0 : i32, i32
  }
  func.func @transform_7(%arg0: i32) -> (i32, i32) {
    %c0_i32 = arith.constant 0 : i32
    %c0_i32_0 = arith.constant 0 : i32
    %c0_i32_1 = arith.constant 0 : i32
    return %c0_i32, %c0_i32_0 : i32, i32
  }
  func.func @transform_10(%arg0: i32) -> (i32, i32) {
    %c0_i32 = arith.constant 0 : i32
    %c0_i32_0 = arith.constant 0 : i32
    %c0_i32_1 = arith.constant 0 : i32
    return %c0_i32, %c0_i32_0 : i32, i32
  }
}

</mosaic_0001>

<bundles_post_ra>
// kernel: tpu_custom_call.1
= control target key start
LH: loop header
LB: loop body
LE: loop exit
PB: predicated region body
PF: predicated region fallthrough
CT: control target
= control target key end

     0   :  { %15 = vsyncpa [#allocation6], 0  ;;  %s9550_s0 = inlined_call_operand.hbm [shape: f32[16,16], index: 0, kind: input, shape index: {}]   ;;  %s9551_s1 = inlined_call_operand.hbm [shape: f32[16,16], index: 1, kind: input, shape index: {}]   ;;  %s9552_s2 = inlined_call_operand.hbm [shape: f32[16,16], index: 2, kind: input, shape index: {}]   ;;  %s9553_s3 = inlined_call_operand.hbm [shape: f32[16,16], index: 3, kind: input, shape index: {}]   ;;  %s9554_s4 = inlined_call_operand.vmem [shape: bf16[608,256], index: 4, kind: input, shape index: {}]   ;;  %s9555_s5 = inlined_call_operand.vmem [shape: bf16[1024,64], index: 5, kind: input, shape index: {}]   ;;  %s9556_s6 = inlined_call_operand.vmem [shape: bf16[768,16], index: 6, kind: input, shape index: {}]   ;;  %s9557_s7 = inlined_call_operand.hbm [shape: f32[24,512], index: 7, kind: input, shape index: {}]   ;;  %s9558_s8 = inlined_call_operand.hbm [shape: bf16[1280,512], index: 8, kind: input, shape index: {}]   ;;  %s9559_s9 = inlined_call_operand.vmem [shape: bf16[1536,16], index: 9, kind: input, shape index: {}]   ;;  %s9560_s10 = inlined_call_operand.hbm [shape: f32[16,128], index: 10, kind: output, shape index: {}]  }
   0x1   :  { %16 = vsyncpa [#allocation9], 0 }
   0x2   :  { %17 = vsyncpa [#allocation12], 0 }
   0x3   :  { %18 = vsyncpa [#allocation7], 0  ;;  %s8414_s13 = smov [#allocation8]   ;;  %s8415_s15 = smov [#allocation11]  }
   0x4   :  { %s36_s14 = sshll.u32 %s8414_s13, 4  ;;  %s60_s16 = sshll.u32 %s8415_s15, 4  ;;  %s37_s14 = int_to_ptr.vmem [resolvable:$true] %s36_s14  ;;  %s61_s16 = int_to_ptr.vmem [resolvable:$true] %s60_s16 }
   0x5   :  { %s8270_s17 = scalar_lea.vmem %s37_s14, 256  ;;  %p8275_p1 = scmp.lt.s32.totalorder %s37_s14, %s37_s14 }
   0x6   :  { %p8271_p0 = scmp.ne.s32.totalorder %s37_s14, %s8270_s17  ;;  %p8276_p2 = scmp.lt.s32.totalorder %s8270_s17, %s8270_s17 }
   0x8   :  { %p8277_p3 = por %p8276_p2, %p8275_p1 }
   0xa   :  { %p8278_p4 = pnand %p8277_p3, %p8271_p0 }
   0xc   :  { %8281 = shalt.err (!%p8278_p4)
}
   0xd   :  { %s8416_s18 = smov 128   ;;  %s8417_s19 = smov 8  }
   0xe   :  { %42 = dma.hbm_to_vmem [thread:$0]  %s9551_s1, 256, %s37_s14, [#allocation9], %s8416_s18, %s8416_s18, %s8417_s19  }
   0xf   :  { %s8290_s22 = scalar_lea.vmem %s61_s16, 256  ;;  %p8295_p6 = scmp.lt.s32.totalorder %s61_s16, %s61_s16 }
  0x10   :  { %p8291_p5 = scmp.ne.s32.totalorder %s61_s16, %s8290_s22  ;;  %p8296_p7 = scmp.lt.s32.totalorder %s8290_s22, %s8290_s22 }
  0x12   :  { %p8297_p8 = por %p8296_p7, %p8295_p6 }
  0x14   :  { %p8298_p9 = pnand %p8297_p8, %p8291_p5 }
  0x16   :  { %8301 = shalt.err (!%p8298_p9)
}
  0x17   :  { %66 = dma.hbm_to_vmem [thread:$0]  %s9553_s3, 256, %s61_s16, [#allocation12], %s8416_s18, %s8416_s18, %s8417_s19  }
  0x18   :  { %s8418_s25 = smov [#allocation5]   ;;  %s8419_s27 = smov [#allocation10]  }
  0x19   :  { %s24_s26 = sshll.u32 %s8418_s25, 4  ;;  %s48_s28 = sshll.u32 %s8419_s27, 4  ;;  %s25_s26 = int_to_ptr.vmem [resolvable:$true] %s24_s26  ;;  %s49_s28 = int_to_ptr.vmem [resolvable:$true] %s48_s28 }
  0x1a   :  { %s8310_s1 = scalar_lea.vmem %s25_s26, 256  ;;  %p8315_p11 = scmp.lt.s32.totalorder %s25_s26, %s25_s26 }
  0x1b   :  { %p8311_p10 = scmp.ne.s32.totalorder %s25_s26, %s8310_s1  ;;  %p8316_p12 = scmp.lt.s32.totalorder %s8310_s1, %s8310_s1 }
  0x1d   :  { %p8317_p13 = por %p8316_p12, %p8315_p11 }
  0x1f   :  { %p8318_p0 = pnand %p8317_p13, %p8311_p10 }
  0x21   :  { %8321 = shalt.err (!%p8318_p0)
}
  0x22   :  { %30 = dma.hbm_to_vmem [thread:$0]  %s9550_s0, 256, %s25_s26, [#allocation6], %s8416_s18, %s8416_s18, %s8417_s19  }
  0x23   :  { %s8330_s3 = scalar_lea.vmem %s49_s28, 256  ;;  %p8335_p2 = scmp.lt.s32.totalorder %s49_s28, %s49_s28 }
  0x24   :  { %p8331_p1 = scmp.ne.s32.totalorder %s49_s28, %s8330_s3  ;;  %p8336_p3 = scmp.lt.s32.totalorder %s8330_s3, %s8330_s3 }
  0x26   :  { %p8337_p4 = por %p8336_p3, %p8335_p2 }
  0x28   :  { %p8338_p5 = pnand %p8337_p4, %p8331_p1 }
  0x2a   :  { %8341 = shalt.err (!%p8338_p5)
}
  0x2b   :  { %54 = dma.hbm_to_vmem [thread:$0]  %s9552_s2, 256, %s49_s28, [#allocation9], %s8416_s18, %s8416_s18, %s8417_s19  }
  0x2c   :  { %s8420_s13 = smov [#allocation13]  }
  0x2d   :  { %s78_s14 = sshll.u32 %s8420_s13, 4  ;;  %s79_s14 = int_to_ptr.vmem [resolvable:$true] %s78_s14 }
  0x2e   :  { %s8350_s15 = scalar_lea.vmem %s79_s14, 1536  ;;  %p8355_p7 = scmp.lt.s32.totalorder %s79_s14, %s79_s14 }
  0x2f   :  { %p8351_p6 = scmp.ne.s32.totalorder %s79_s14, %s8350_s15  ;;  %p8356_p8 = scmp.lt.s32.totalorder %s8350_s15, %s8350_s15 }
  0x31   :  { %p8357_p9 = por %p8356_p8, %p8355_p7 }
  0x33   :  { %p8358_p10 = pnand %p8357_p9, %p8351_p6 }
  0x35   :  { %8361 = shalt.err (!%p8358_p10)
}
  0x36   :  { %s8421_s0 = smov 512   ;;  %s8422_s16 = smov 32  }
  0x37   :  { %84 = dma.hbm_to_vmem [thread:$0]  %s9557_s7, 1536, %s79_s14, [#allocation12], %s8421_s0, %s8421_s0, %s8422_s16  }
  0x38   :  { %8402 = dma.done.wait [#allocation6], 256  }
  0x39   :  { %8403 = vsyncadd [#allocation6], 4294967040 }
  0x3a   :  { %8404 = dma.done.wait [#allocation9], 512  }
  0x3b   :  { %8405 = vsyncadd [#allocation9], 4294966784 }
  0x3c   :  { %8406 = dma.done.wait [#allocation12], 1792  }
  0x3d   :  { %8407 = vsyncadd [#allocation12], 4294965504  ;;  %s8423_s2 = smov [#allocation2]  }
  0x3e   :  { %s108_s21 = sshll.u32 %s8423_s2, 4  ;;  %s109_s21 = int_to_ptr.vmem [resolvable:$true] %s108_s21 }
  0x3f   :  { %s8370_s22 = scalar_lea.vmem %s109_s21, 40960  ;;  %p8375_p12 = scmp.lt.s32.totalorder %s109_s21, %s109_s21 }
  0x40   :  { %p8371_p11 = scmp.ne.s32.totalorder %s109_s21, %s8370_s22  ;;  %p8376_p13 = scmp.lt.s32.totalorder %s8370_s22, %s8370_s22 }
  0x42   :  { %p8377_p0 = por %p8376_p13, %p8375_p12 }
  0x44   :  { %p8378_p1 = pnand %p8377_p0, %p8371_p11 }
  0x46   :  { %8381 = shalt.err (!%p8378_p1)  }
  0x47   :  { %111 = dma.hbm_to_vmem [thread:$0]  %s9558_s8, 40960, %s109_s21, [#allocation4]  ;;  %v146_v0 = vld [vmem:[%s9559_s9] sm:$0xff]  ;;  %v148_v1 = vld [vmem:[%s9559_s9 + $0x8] sm:$0xff]  ;;  %v150_v2 = vld [vmem:[%s9559_s9 + $0x10] sm:$0xff] }
  0x48   :  { %147 = vst [vmem:[#allocation3] sm:$0xff] %v146_v0  ;;  %149 = vst [vmem:[#allocation3 + $0x8] sm:$0xff] %v148_v1  ;;  %v152_v3 = vld [vmem:[%s9559_s9 + $0x18] sm:$0xff]  ;;  %v154_v4 = vld [vmem:[%s9559_s9 + $0x20] sm:$0xff] }
  0x49   :  { %151 = vst [vmem:[#allocation3 + $0x10] sm:$0xff] %v150_v2  ;;  %v156_v5 = vld [vmem:[%s9559_s9 + $0x28] sm:$0xff]  ;;  %153 = vst [vmem:[#allocation3 + $0x18] sm:$0xff] %v152_v3  ;;  %v158_v6 = vld [vmem:[%s9559_s9 + $0x30] sm:$0xff] }
  0x4a   :  { %155 = vst [vmem:[#allocation3 + $0x20] sm:$0xff] %v154_v4  ;;  %157 = vst [vmem:[#allocation3 + $0x28] sm:$0xff] %v156_v5  ;;  %v160_v7 = vld [vmem:[%s9559_s9 + $0x38] sm:$0xff]  ;;  %v162_v8 = vld [vmem:[%s9559_s9 + $0x40] sm:$0xff] }
  0x4b   :  { %159 = vst [vmem:[#allocation3 + $0x30] sm:$0xff] %v158_v6  ;;  %161 = vst [vmem:[#allocation3 + $0x38] sm:$0xff] %v160_v7  ;;  %v164_v9 = vld [vmem:[%s9559_s9 + $0x48] sm:$0xff]  ;;  %v166_v10 = vld [vmem:[%s9559_s9 + $0x50] sm:$0xff] }
  0x4c   :  { %163 = vst [vmem:[#allocation3 + $0x40] sm:$0xff] %v162_v8  ;;  %v168_v11 = vld [vmem:[%s9559_s9 + $0x58] sm:$0xff]  ;;  %165 = vst [vmem:[#allocation3 + $0x48] sm:$0xff] %v164_v9  ;;  %v170_v12 = vld [vmem:[%s9559_s9 + $0x60] sm:$0xff] }
  0x4d   :  { %167 = vst [vmem:[#allocation3 + $0x50] sm:$0xff] %v166_v10  ;;  %169 = vst [vmem:[#allocation3 + $0x58] sm:$0xff] %v168_v11  ;;  %v172_v13 = vld [vmem:[%s9559_s9 + $0x68] sm:$0xff]  ;;  %v174_v14 = vld [vmem:[%s9559_s9 + $0x70] sm:$0xff] }
  0x4e   :  { %171 = vst [vmem:[#allocation3 + $0x60] sm:$0xff] %v170_v12  ;;  %173 = vst [vmem:[#allocation3 + $0x68] sm:$0xff] %v172_v13  ;;  %v176_v15 = vld [vmem:[%s9559_s9 + $0x78] sm:$0xff]  ;;  %v178_v16 = vld [vmem:[%s9559_s9 + $0x80] sm:$0xff] }
  0x4f   :  { %175 = vst [vmem:[#allocation3 + $0x70] sm:$0xff] %v174_v14  ;;  %v180_v17 = vld [vmem:[%s9559_s9 + $0x88] sm:$0xff]  ;;  %177 = vst [vmem:[#allocation3 + $0x78] sm:$0xff] %v176_v15  ;;  %v182_v18 = vld [vmem:[%s9559_s9 + $0x90] sm:$0xff] }
  0x50   :  { %179 = vst [vmem:[#allocation3 + $0x80] sm:$0xff] %v178_v16  ;;  %181 = vst [vmem:[#allocation3 + $0x88] sm:$0xff] %v180_v17  ;;  %v184_v19 = vld [vmem:[%s9559_s9 + $0x98] sm:$0xff]  ;;  %v186_v20 = vld [vmem:[%s9559_s9 + $0xa0] sm:$0xff] }
  0x51   :  { %183 = vst [vmem:[#allocation3 + $0x90] sm:$0xff] %v182_v18  ;;  %185 = vst [vmem:[#allocation3 + $0x98] sm:$0xff] %v184_v19  ;;  %v188_v21 = vld [vmem:[%s9559_s9 + $0xa8] sm:$0xff]  ;;  %v190_v22 = vld [vmem:[%s9559_s9 + $0xb0] sm:$0xff] }
  0x52   :  { %187 = vst [vmem:[#allocation3 + $0xa0] sm:$0xff] %v186_v20  ;;  %v192_v23 = vld [vmem:[%s9559_s9 + $0xb8] sm:$0xff]  ;;  %189 = vst [vmem:[#allocation3 + $0xa8] sm:$0xff] %v188_v21  ;;  %v194_v24 = vld [vmem:[%s9559_s9 + $0xc0] sm:$0xff] }
  0x53   :  { %191 = vst [vmem:[#allocation3 + $0xb0] sm:$0xff] %v190_v22  ;;  %193 = vst [vmem:[#allocation3 + $0xb8] sm:$0xff] %v192_v23  ;;  %v196_v25 = vld [vmem:[%s9559_s9 + $0xc8] sm:$0xff]  ;;  %v198_v26 = vld [vmem:[%s9559_s9 + $0xd0] sm:$0xff] }
  0x54   :  { %195 = vst [vmem:[#allocation3 + $0xc0] sm:$0xff] %v194_v24  ;;  %197 = vst [vmem:[#allocation3 + $0xc8] sm:$0xff] %v196_v25  ;;  %v200_v27 = vld [vmem:[%s9559_s9 + $0xd8] sm:$0xff]  ;;  %v202_v28 = vld [vmem:[%s9559_s9 + $0xe0] sm:$0xff] }
  0x55   :  { %199 = vst [vmem:[#allocation3 + $0xd0] sm:$0xff] %v198_v26  ;;  %v204_v29 = vld [vmem:[%s9559_s9 + $0xe8] sm:$0xff]  ;;  %201 = vst [vmem:[#allocation3 + $0xd8] sm:$0xff] %v200_v27  ;;  %v206_v30 = vld [vmem:[%s9559_s9 + $0xf0] sm:$0xff] }
  0x56   :  { %203 = vst [vmem:[#allocation3 + $0xe0] sm:$0xff] %v202_v28  ;;  %205 = vst [vmem:[#allocation3 + $0xe8] sm:$0xff] %v204_v29  ;;  %v208_v31 = vld [vmem:[%s9559_s9 + $0xf8] sm:$0xff]  ;;  %v210_v32 = vld [vmem:[%s9559_s9 + $0x100] sm:$0xff] }
  0x57   :  { %207 = vst [vmem:[#allocation3 + $0xf0] sm:$0xff] %v206_v30  ;;  %209 = vst [vmem:[#allocation3 + $0xf8] sm:$0xff] %v208_v31  ;;  %v212_v33 = vld [vmem:[%s9559_s9 + $0x108] sm:$0xff]  ;;  %v214_v34 = vld [vmem:[%s9559_s9 + $0x110] sm:$0xff] }
  0x58   :  { %211 = vst [vmem:[#allocation3 + $0x100] sm:$0xff] %v210_v32  ;;  %v216_v35 = vld [vmem:[%s9559_s9 + $0x118] sm:$0xff]  ;;  %213 = vst [vmem:[#allocation3 + $0x108] sm:$0xff] %v212_v33  ;;  %v218_v36 = vld [vmem:[%s9559_s9 + $0x120] sm:$0xff] }
  0x59   :  { %215 = vst [vmem:[#allocation3 + $0x110] sm:$0xff] %v214_v34  ;;  %217 = vst [vmem:[#allocation3 + $0x118] sm:$0xff] %v216_v35  ;;  %v220_v37 = vld [vmem:[%s9559_s9 + $0x128] sm:$0xff]  ;;  %v222_v38 = vld [vmem:[%s9559_s9 + $0x130] sm:$0xff] }
  0x5a   :  { %219 = vst [vmem:[#allocation3 + $0x120] sm:$0xff] %v218_v36  ;;  %221 = vst [vmem:[#allocation3 + $0x128] sm:$0xff] %v220_v37  ;;  %v224_v39 = vld [vmem:[%s9559_s9 + $0x138] sm:$0xff]  ;;  %v226_v40 = vld [vmem:[%s9559_s9 + $0x140] sm:$0xff] }
  0x5b   :  { %223 = vst [vmem:[#allocation3 + $0x130] sm:$0xff] %v222_v38  ;;  %v228_v41 = vld [vmem:[%s9559_s9 + $0x148] sm:$0xff]  ;;  %225 = vst [vmem:[#allocation3 + $0x138] sm:$0xff] %v224_v39  ;;  %v230_v42 = vld [vmem:[%s9559_s9 + $0x150] sm:$0xff] }
  0x5c   :  { %227 = vst [vmem:[#allocation3 + $0x140] sm:$0xff] %v226_v40  ;;  %229 = vst [vmem:[#allocation3 + $0x148] sm:$0xff] %v228_v41  ;;  %v232_v43 = vld [vmem:[%s9559_s9 + $0x158] sm:$0xff]  ;;  %v234_v44 = vld [vmem:[%s9559_s9 + $0x160] sm:$0xff] }
  0x5d   :  { %231 = vst [vmem:[#allocation3 + $0x150] sm:$0xff] %v230_v42  ;;  %233 = vst [vmem:[#allocation3 + $0x158] sm:$0xff] %v232_v43  ;;  %v236_v45 = vld [vmem:[%s9559_s9 + $0x168] sm:$0xff]  ;;  %v238_v46 = vld [vmem:[%s9559_s9 + $0x170] sm:$0xff] }
  0x5e   :  { %235 = vst [vmem:[#allocation3 + $0x160] sm:$0xff] %v234_v44  ;;  %v240_v47 = vld [vmem:[%s9559_s9 + $0x178] sm:$0xff]  ;;  %237 = vst [vmem:[#allocation3 + $0x168] sm:$0xff] %v236_v45  ;;  %v242_v48 = vld [vmem:[%s9559_s9 + $0x180] sm:$0xff] }
  0x5f   :  { %239 = vst [vmem:[#allocation3 + $0x170] sm:$0xff] %v238_v46  ;;  %241 = vst [vmem:[#allocation3 + $0x178] sm:$0xff] %v240_v47  ;;  %v244_v49 = vld [vmem:[%s9559_s9 + $0x188] sm:$0xff]  ;;  %v246_v50 = vld [vmem:[%s9559_s9 + $0x190] sm:$0xff] }
  0x60   :  { %243 = vst [vmem:[#allocation3 + $0x180] sm:$0xff] %v242_v48  ;;  %245 = vst [vmem:[#allocation3 + $0x188] sm:$0xff] %v244_v49  ;;  %v248_v51 = vld [vmem:[%s9559_s9 + $0x198] sm:$0xff]  ;;  %v250_v52 = vld [vmem:[%s9559_s9 + $0x1a0] sm:$0xff] }
  0x61   :  { %247 = vst [vmem:[#allocation3 + $0x190] sm:$0xff] %v246_v50  ;;  %v252_v53 = vld [vmem:[%s9559_s9 + $0x1a8] sm:$0xff]  ;;  %249 = vst [vmem:[#allocation3 + $0x198] sm:$0xff] %v248_v51  ;;  %v254_v54 = vld [vmem:[%s9559_s9 + $0x1b0] sm:$0xff] }
  0x62   :  { %251 = vst [vmem:[#allocation3 + $0x1a0] sm:$0xff] %v250_v52  ;;  %253 = vst [vmem:[#allocation3 + $0x1a8] sm:$0xff] %v252_v53  ;;  %v256_v55 = vld [vmem:[%s9559_s9 + $0x1b8] sm:$0xff]  ;;  %v258_v56 = vld [vmem:[%s9559_s9 + $0x1c0] sm:$0xff] }
  0x63   :  { %255 = vst [vmem:[#allocation3 + $0x1b0] sm:$0xff] %v254_v54  ;;  %257 = vst [vmem:[#allocation3 + $0x1b8] sm:$0xff] %v256_v55  ;;  %v260_v57 = vld [vmem:[%s9559_s9 + $0x1c8] sm:$0xff]  ;;  %v262_v58 = vld [vmem:[%s9559_s9 + $0x1d0] sm:$0xff] }
  0x64   :  { %259 = vst [vmem:[#allocation3 + $0x1c0] sm:$0xff] %v258_v56  ;;  %v264_v59 = vld [vmem:[%s9559_s9 + $0x1d8] sm:$0xff]  ;;  %261 = vst [vmem:[#allocation3 + $0x1c8] sm:$0xff] %v260_v57  ;;  %v266_v60 = vld [vmem:[%s9559_s9 + $0x1e0] sm:$0xff] }
  0x65   :  { %263 = vst [vmem:[#allocation3 + $0x1d0] sm:$0xff] %v262_v58  ;;  %265 = vst [vmem:[#allocation3 + $0x1d8] sm:$0xff] %v264_v59  ;;  %v268_v61 = vld [vmem:[%s9559_s9 + $0x1e8] sm:$0xff]  ;;  %v270_v62 = vld [vmem:[%s9559_s9 + $0x1f0] sm:$0xff] }
  0x66   :  { %267 = vst [vmem:[#allocation3 + $0x1e0] sm:$0xff] %v266_v60  ;;  %269 = vst [vmem:[#allocation3 + $0x1e8] sm:$0xff] %v268_v61  ;;  %v272_v63 = vld [vmem:[%s9559_s9 + $0x1f8] sm:$0xff]  ;;  %v274_v0 = vld [vmem:[%s9559_s9 + $0x200] sm:$0xff] }
  0x67   :  { %271 = vst [vmem:[#allocation3 + $0x1f0] sm:$0xff] %v270_v62  ;;  %v276_v1 = vld [vmem:[%s9559_s9 + $0x208] sm:$0xff]  ;;  %273 = vst [vmem:[#allocation3 + $0x1f8] sm:$0xff] %v272_v63  ;;  %v278_v2 = vld [vmem:[%s9559_s9 + $0x210] sm:$0xff] }
  0x68   :  { %275 = vst [vmem:[#allocation3 + $0x200] sm:$0xff] %v274_v0  ;;  %277 = vst [vmem:[#allocation3 + $0x208] sm:$0xff] %v276_v1  ;;  %v280_v3 = vld [vmem:[%s9559_s9 + $0x218] sm:$0xff]  ;;  %v282_v4 = vld [vmem:[%s9559_s9 + $0x220] sm:$0xff] }
  0x69   :  { %279 = vst [vmem:[#allocation3 + $0x210] sm:$0xff] %v278_v2  ;;  %281 = vst [vmem:[#allocation3 + $0x218] sm:$0xff] %v280_v3  ;;  %v284_v5 = vld [vmem:[%s9559_s9 + $0x228] sm:$0xff]  ;;  %v286_v6 = vld [vmem:[%s9559_s9 + $0x230] sm:$0xff] }
  0x6a   :  { %283 = vst [vmem:[#allocation3 + $0x220] sm:$0xff] %v282_v4  ;;  %v288_v7 = vld [vmem:[%s9559_s9 + $0x238] sm:$0xff]  ;;  %285 = vst [vmem:[#allocation3 + $0x228] sm:$0xff] %v284_v5  ;;  %v290_v8 = vld [vmem:[%s9559_s9 + $0x240] sm:$0xff] }
  0x6b   :  { %287 = vst [vmem:[#allocation3 + $0x230] sm:$0xff] %v286_v6  ;;  %289 = vst [vmem:[#allocation3 + $0x238] sm:$0xff] %v288_v7  ;;  %v292_v9 = vld [vmem:[%s9559_s9 + $0x248] sm:$0xff]  ;;  %v294_v10 = vld [vmem:[%s9559_s9 + $0x250] sm:$0xff] }
  0x6c   :  { %291 = vst [vmem:[#allocation3 + $0x240] sm:$0xff] %v290_v8  ;;  %293 = vst [vmem:[#allocation3 + $0x248] sm:$0xff] %v292_v9  ;;  %v296_v11 = vld [vmem:[%s9559_s9 + $0x258] sm:$0xff]  ;;  %v298_v12 = vld [vmem:[%s9559_s9 + $0x260] sm:$0xff] }
  0x6d   :  { %295 = vst [vmem:[#allocation3 + $0x250] sm:$0xff] %v294_v10  ;;  %v300_v13 = vld [vmem:[%s9559_s9 + $0x268] sm:$0xff]  ;;  %297 = vst [vmem:[#allocation3 + $0x258] sm:$0xff] %v296_v11  ;;  %v302_v14 = vld [vmem:[%s9559_s9 + $0x270] sm:$0xff] }
  0x6e   :  { %299 = vst [vmem:[#allocation3 + $0x260] sm:$0xff] %v298_v12  ;;  %301 = vst [vmem:[#allocation3 + $0x268] sm:$0xff] %v300_v13  ;;  %v304_v15 = vld [vmem:[%s9559_s9 + $0x278] sm:$0xff]  ;;  %v306_v16 = vld [vmem:[%s9559_s9 + $0x280] sm:$0xff] }
  0x6f   :  { %303 = vst [vmem:[#allocation3 + $0x270] sm:$0xff] %v302_v14  ;;  %305 = vst [vmem:[#allocation3 + $0x278] sm:$0xff] %v304_v15  ;;  %v308_v17 = vld [vmem:[%s9559_s9 + $0x288] sm:$0xff]  ;;  %v310_v18 = vld [vmem:[%s9559_s9 + $0x290] sm:$0xff] }
  0x70   :  { %307 = vst [vmem:[#allocation3 + $0x280] sm:$0xff] %v306_v16  ;;  %v312_v19 = vld [vmem:[%s9559_s9 + $0x298] sm:$0xff]  ;;  %309 = vst [vmem:[#allocation3 + $0x288] sm:$0xff] %v308_v17  ;;  %v314_v20 = vld [vmem:[%s9559_s9 + $0x2a0] sm:$0xff] }
  0x71   :  { %311 = vst [vmem:[#allocation3 + $0x290] sm:$0xff] %v310_v18  ;;  %313 = vst [vmem:[#allocation3 + $0x298] sm:$0xff] %v312_v19  ;;  %v316_v21 = vld [vmem:[%s9559_s9 + $0x2a8] sm:$0xff]  ;;  %v318_v22 = vld [vmem:[%s9559_s9 + $0x2b0] sm:$0xff] }
  0x72   :  { %315 = vst [vmem:[#allocation3 + $0x2a0] sm:$0xff] %v314_v20  ;;  %317 = vst [vmem:[#allocation3 + $0x2a8] sm:$0xff] %v316_v21  ;;  %v320_v23 = vld [vmem:[%s9559_s9 + $0x2b8] sm:$0xff]  ;;  %v322_v24 = vld [vmem:[%s9559_s9 + $0x2c0] sm:$0xff] }
  0x73   :  { %319 = vst [vmem:[#allocation3 + $0x2b0] sm:$0xff] %v318_v22  ;;  %v324_v25 = vld [vmem:[%s9559_s9 + $0x2c8] sm:$0xff]  ;;  %321 = vst [vmem:[#allocation3 + $0x2b8] sm:$0xff] %v320_v23  ;;  %v326_v26 = vld [vmem:[%s9559_s9 + $0x2d0] sm:$0xff] }
  0x74   :  { %323 = vst [vmem:[#allocation3 + $0x2c0] sm:$0xff] %v322_v24  ;;  %325 = vst [vmem:[#allocation3 + $0x2c8] sm:$0xff] %v324_v25  ;;  %v328_v27 = vld [vmem:[%s9559_s9 + $0x2d8] sm:$0xff]  ;;  %v330_v28 = vld [vmem:[%s9559_s9 + $0x2e0] sm:$0xff] }
  0x75   :  { %327 = vst [vmem:[#allocation3 + $0x2d0] sm:$0xff] %v326_v26  ;;  %329 = vst [vmem:[#allocation3 + $0x2d8] sm:$0xff] %v328_v27  ;;  %v332_v29 = vld [vmem:[%s9559_s9 + $0x2e8] sm:$0xff]  ;;  %v334_v30 = vld [vmem:[%s9559_s9 + $0x2f0] sm:$0xff] }
  0x76   :  { %331 = vst [vmem:[#allocation3 + $0x2e0] sm:$0xff] %v330_v28  ;;  %v336_v31 = vld [vmem:[%s9559_s9 + $0x2f8] sm:$0xff]  ;;  %333 = vst [vmem:[#allocation3 + $0x2e8] sm:$0xff] %v332_v29 }
  0x77   :  { %335 = vst [vmem:[#allocation3 + $0x2f0] sm:$0xff] %v334_v30  ;;  %337 = vst [vmem:[#allocation3 + $0x2f8] sm:$0xff] %v336_v31 }
  0x78   :  { %345 = vsyncadd [#allocation4 + $0x1], 12288  ;;  %v8799_v32 = vld [vmem:[#allocation11] sm:$0xff]  ;;  %v8801_v33 = vld [vmem:[#allocation11 + $0x8] sm:$0xff]  ;;  %v8424_v35 = vmov 0   ;;  %vm379_vm0 = vcmask 130048   ;;  %v359_v18 = vlaneseq }
  0x79   :  { %v7436_v34 = vld [vmem:[%s9554_s4 + $0x4] ss:$8 sps:$4 sm:$0xff]   ;;  %415 = vmatprep.mubr.bf16.mxu0 %v8424_v35  ;;  %v7438_v36 = vld [vmem:[%s9554_s4] ss:$8 sps:$4 sm:$0xff]   ;;  %v7442_v42 = vld [vmem:[%s9554_s4 + $0x74] ss:$8 sps:$4 sm:$0xff]  }
  0x7a   :  { %v8810_v37 = vld [vmem:[#allocation5] sm:$0xff]  ;;  %v8812_v38 = vld [vmem:[#allocation5 + $0x8] sm:$0xff]  ;;  %397 = vmatprep.subr.bf16.mxu0 %v7436_v34  ;;  %v7444_v43 = vld [vmem:[%s9554_s4 + $0x70] ss:$8 sps:$4 sm:$0xff]   ;;  %v8946_v19 = vshrl.u32 %v359_v18, 7 }
  0x7b   :  { %v8816_v39 = vpack.c.bf16 %v8812_v38, %v8810_v37  ;;  %v7439_v40 = vld [vmem:[%s9554_s4 + $0x84] ss:$8 sps:$4 sm:$0xff]   ;;  %398 = vmatpush1.bf16.msra.mxu0 %v7438_v36  ;;  %v7441_v41 = vld [vmem:[%s9554_s4 + $0x80] ss:$8 sps:$4 sm:$0xff]   ;;  %v7448_v46 = vld [vmem:[%s9554_s4 + $0x54] ss:$8 sps:$4 sm:$0xff]  }
  0x7c   :  { %637 = vmatprep.subr.bf16.mxu1 %v7439_v40  ;;  %v7445_v44 = vld [vmem:[%s9554_s4 + $0x64] ss:$8 sps:$4 sm:$0xff]   ;;  %v7447_v45 = vld [vmem:[%s9554_s4 + $0x60] ss:$8 sps:$4 sm:$0xff]   ;;  %v7450_v47 = vld [vmem:[%s9554_s4 + $0x50] ss:$8 sps:$4 sm:$0xff]  }
  0x7d   :  { %638 = vmatpush1.bf16.msra.mxu1 %v7441_v41  ;;  %v7451_v48 = vld [vmem:[%s9554_s4 + $0x44] ss:$8 sps:$4 sm:$0xff]   ;;  %v7453_v49 = vld [vmem:[%s9554_s4 + $0x40] ss:$8 sps:$4 sm:$0xff]   ;;  %v7454_v50 = vld [vmem:[%s9554_s4 + $0x34] ss:$8 sps:$4 sm:$0xff]  }
  0x7e   :  { %6520 = vmatmul.mubr.msk.bf16.vlgmr.msra.gmra.mxu0 %vm379_vm0, %v8816_v39  ;;  %639 = vmatprep.subr.bf16.mxu1 %v7442_v42  ;;  %v7456_v51 = vld [vmem:[%s9554_s4 + $0x30] ss:$8 sps:$4 sm:$0xff]   ;;  %v7457_v52 = vld [vmem:[%s9554_s4 + $0x24] ss:$8 sps:$4 sm:$0xff]   ;;  %v7459_v53 = vld [vmem:[%s9554_s4 + $0x20] ss:$8 sps:$4 sm:$0xff]  }
  0x7f   :  { %v7460_v54 = vld [vmem:[%s9554_s4 + $0x14] ss:$8 sps:$4 sm:$0xff]   ;;  %v7462_v55 = vld [vmem:[%s9554_s4 + $0x10] ss:$8 sps:$4 sm:$0xff]   ;;  %v7463_v56 = vld [vmem:[%s9554_s4 + $0x104] ss:$8 sps:$4 sm:$0xff]  }
  0x80   :  { %v7465_v57 = vld [vmem:[%s9554_s4 + $0x100] ss:$8 sps:$4 sm:$0xff]   ;;  %v7466_v58 = vld [vmem:[%s9554_s4 + $0xf4] ss:$8 sps:$4 sm:$0xff]   ;;  %v7468_v59 = vld [vmem:[%s9554_s4 + $0xf0] ss:$8 sps:$4 sm:$0xff]  }
  0x81   :  { %640 = vmatpush1.bf16.msra.mxu1 %v7444_v43  ;;  %v7469_v60 = vld [vmem:[%s9554_s4 + $0xe4] ss:$8 sps:$4 sm:$0xff]   ;;  %v7471_v61 = vld [vmem:[%s9554_s4 + $0xe0] ss:$8 sps:$4 sm:$0xff]   ;;  %v7472_v62 = vld [vmem:[%s9554_s4 + $0xd4] ss:$8 sps:$4 sm:$0xff]  }
  0x82   :  { %641 = vmatprep.subr.bf16.mxu1 %v7445_v44  ;;  %v7474_v63 = vld [vmem:[%s9554_s4 + $0xd0] ss:$8 sps:$4 sm:$0xff]   ;;  %v7475_v0 = vld [vmem:[%s9554_s4 + $0xc4] ss:$8 sps:$4 sm:$0xff]   ;;  %v7477_v1 = vld [vmem:[%s9554_s4 + $0xc0] ss:$8 sps:$4 sm:$0xff]  }
  0x83   :  { %v7478_v2 = vld [vmem:[%s9554_s4 + $0xb4] ss:$8 sps:$4 sm:$0xff]   ;;  %v7480_v3 = vld [vmem:[%s9554_s4 + $0xb0] ss:$8 sps:$4 sm:$0xff]   ;;  %v7481_v4 = vld [vmem:[%s9554_s4 + $0xa4] ss:$8 sps:$4 sm:$0xff]  }
  0x84   :  { %v7483_v5 = vld [vmem:[%s9554_s4 + $0xa0] ss:$8 sps:$4 sm:$0xff]   ;;  %v7484_v6 = vld [vmem:[%s9554_s4 + $0x94] ss:$8 sps:$4 sm:$0xff]   ;;  %v7486_v7 = vld [vmem:[%s9554_s4 + $0x90] ss:$8 sps:$4 sm:$0xff]  }
  0x85   :  { %642 = vmatpush1.bf16.msra.mxu1 %v7447_v45  ;;  %v7487_v8 = vld [vmem:[%s9556_s6 + $0x78] sm:$0xff]   ;;  %v7489_v10 = vld [vmem:[%s9556_s6 + $0x70] sm:$0xff]   ;;  %v7491_v12 = vld [vmem:[%s9556_s6 + $0x68] sm:$0xff]   ;;  %v8949_v20 = vsub.s32 1, %v8946_v19  ;;  %v8952_v21 = vsub.s32 0, %v8946_v19 }
  0x86   :  { %643 = vmatprep.subr.bf16.mxu1 %v7448_v46  ;;  %v7488_v9 = vld [vmem:[%s9556_s6 + $0x38] sm:$0xff]   ;;  %7138 = vmatprep.subr.bf16.mxu0 %v7487_v8  ;;  %v7490_v11 = vld [vmem:[%s9556_s6 + $0x30] sm:$0xff]   ;;  %v7492_v13 = vld [vmem:[%s9556_s6 + $0x28] sm:$0xff]  }
  0x87   :  { %7139 = vmatpush3.bf16.msra.mxu0 %v7488_v9  ;;  %v7493_v14 = vld [vmem:[%s9556_s6 + $0x60] sm:$0xff]   ;;  %v7495_v16 = vld [vmem:[%s9556_s6 + $0x58] sm:$0xff]   ;;  %v7497_v45 = vld [vmem:[%s9556_s6 + $0x50] sm:$0xff]  }
  0x88   :  { %7140 = vmatprep.subr.bf16.mxu0 %v7489_v10  ;;  %v7494_v15 = vld [vmem:[%s9556_s6 + $0x20] sm:$0xff]   ;;  %v7496_v17 = vld [vmem:[%s9556_s6 + $0x18] sm:$0xff]   ;;  %v7498_v46 = vld [vmem:[%s9556_s6 + $0x10] sm:$0xff]  }
  0x89   :  { %644 = vmatpush1.bf16.msra.mxu1 %v7450_v47  ;;  %v357_v22 = vld [vmem:[#allocation13] ss:$8 sm:$0x3]  ;;  %v7506_v8 = vld [vmem:[%s9556_s6 + $0xb0] sm:$0xff]  }
  0x8a   :  { %645 = vmatprep.subr.bf16.mxu1 %v7451_v48  ;;  %v366_v24 = vrot.slane %v357_v22, %v8949_v20  ;;  %v362_v25 = vrot.slane %v357_v22, %v8952_v21  ;;  %v7499_v47 = vld [vmem:[%s9556_s6 + $0x48] sm:$0xff]   ;;  %v7517_v22 = vld [vmem:[%s9556_s6 + $0xc0] sm:$0xff]  }
  0x8b   :  { %7141 = vmatpush3.bf16.msra.mxu0 %v7490_v11  ;;  %v7500_v48 = vld [vmem:[%s9556_s6 + $0x8] sm:$0xff]   ;;  %v7509_v11 = vld [vmem:[%s9556_s6 + $0xe0] sm:$0xff]  }
  0x8c   :  { %7142 = vmatprep.subr.bf16.mxu0 %v7491_v12  ;;  %v7507_v9 = vld [vmem:[%s9556_s6 + $0xe8] sm:$0xff]   ;;  %v7510_v12 = vld [vmem:[%s9556_s6 + $0xa0] sm:$0xff]  }
  0x8d   :  { %646 = vmatpush1.bf16.msra.mxu1 %v7453_v49  ;;  %v7501_v49 = vld [vmem:[%s9556_s6 + $0x40] sm:$0xff]   ;;  %v7508_v10 = vld [vmem:[%s9556_s6 + $0xa8] sm:$0xff]  }
  0x8e   :  { %647 = vmatprep.subr.bf16.mxu1 %v7454_v50  ;;  %v7502_v50 = vld [vmem:[%s9556_s6] sm:$0xff]   ;;  %v7516_v18 = vld [vmem:[%s9556_s6 + $0x88] sm:$0xff]  }
  0x8f   :  { %7143 = vmatpush3.bf16.msra.mxu0 %v7492_v13  ;;  %v7511_v13 = vld [vmem:[%s9556_s6 + $0xd8] sm:$0xff]  }
  0x90   :  { %7144 = vmatprep.subr.bf16.mxu0 %v7493_v14  ;;  %v7512_v14 = vld [vmem:[%s9556_s6 + $0x98] sm:$0xff]  }
  0x91   :  { %648 = vmatpush1.bf16.msra.mxu1 %v7456_v51  ;;  %v7503_v51 = vld [vmem:[%s9556_s6 + $0xf8] sm:$0xff]  }
  0x92   :  { %649 = vmatprep.subr.bf16.mxu1 %v7457_v52  ;;  %v7519_v52 = vld [vmem:[%s9554_s4 + $0x110] ss:$8 sps:$4 sm:$0xff]  }
  0x93   :  { %7145 = vmatpush3.bf16.msra.mxu0 %v7494_v15  ;;  %v7513_v15 = vld [vmem:[%s9556_s6 + $0xd0] sm:$0xff]  }
  0x94   :  { %7146 = vmatprep.subr.bf16.mxu0 %v7495_v16  ;;  %v7514_v16 = vld [vmem:[%s9556_s6 + $0x90] sm:$0xff]  }
  0x95   :  { %650 = vmatpush1.bf16.msra.mxu1 %v7459_v53  ;;  %v7521_v53 = vld [vmem:[%s9554_s4 + $0x114] ss:$8 sps:$4 sm:$0xff]  }
  0x96   :  { %651 = vmatprep.subr.bf16.mxu1 %v7460_v54  ;;  %v465_v54 = vld [vmem:[#allocation13 + $0x1] ss:$8 sm:$0x3] }
  0x97   :  { %7147 = vmatpush3.bf16.msra.mxu0 %v7496_v17  ;;  %v7515_v17 = vld [vmem:[%s9556_s6 + $0xc8] sm:$0xff]  }
  0x98   :  { %7148 = vmatprep.subr.bf16.mxu0 %v7497_v45 }
  0x99   :  { %652 = vmatpush1.bf16.msra.mxu1 %v7462_v55 }
  0x9a   :  { %653 = vmatprep.subr.bf16.mxu1 %v7463_v56  ;;  %v474_v56 = vrot.slane %v465_v54, %v8949_v20 }
  0x9b   :  { %7149 = vmatpush3.bf16.msra.mxu0 %v7498_v46 }
  0x9c   :  { %7150 = vmatprep.subr.bf16.mxu0 %v7499_v47  ;;  %v7534_v47 = vld [vmem:[%s9555_s5 + $0x48] sm:$0xff]  }
  0x9d   :  { %654 = vmatpush2.bf16.msra.mxu1 %v7465_v57  ;;  %v470_v57 = vrot.slane %v465_v54, %v8952_v21 }
  0x9e   :  { %655 = vmatprep.subr.bf16.mxu1 %v7466_v58 }
  0x9f   :  { %7151 = vmatpush3.bf16.msra.mxu0 %v7500_v48 }
  0xa0   :  { %7152 = vmatprep.subr.bf16.mxu0 %v7501_v49 }
  0xa1   :  { %656 = vmatpush2.bf16.msra.mxu1 %v7468_v59 }
  0xa2   :  { %657 = vmatprep.subr.bf16.mxu1 %v7469_v60 }
  0xa3   :  { %7153 = vmatpush3.bf16.msra.mxu0 %v7502_v50  ;;  %v7535_v50 = vld [vmem:[%s9555_s5 + $0x8] sm:$0xff]  }
  0xa4   :  { %7160 = vmatprep.subr.bf16.mxu0 %v7503_v51 }
  0xa5   :  { %658 = vmatpush2.bf16.msra.mxu1 %v7471_v61 }
  0xa6   :  { %659 = vmatprep.subr.bf16.mxu1 %v7472_v62 }
  0xa9   :  { %660 = vmatpush2.bf16.msra.mxu1 %v7474_v63 }
  0xaa   :  { %661 = vmatprep.subr.bf16.mxu1 %v7475_v0 }
  0xad   :  { %662 = vmatpush2.bf16.msra.mxu1 %v7477_v1 }
  0xae   :  { %663 = vmatprep.subr.bf16.mxu1 %v7478_v2 }
  0xb1   :  { %664 = vmatpush2.bf16.msra.mxu1 %v7480_v3 }
  0xb2   :  { %665 = vmatprep.subr.bf16.mxu1 %v7481_v4 }
  0xb5   :  { %666 = vmatpush2.bf16.msra.mxu1 %v7483_v5  ;;  %v7504_v5 = vld [vmem:[%s9556_s6 + $0xb8] sm:$0xff]  }
  0xb6   :  { %667 = vmatprep.subr.bf16.mxu1 %v7484_v6 }
  0xb9   :  { %668 = vmatpush2.bf16.msra.mxu1 %v7486_v7  ;;  %v7505_v7 = vld [vmem:[%s9556_s6 + $0xf0] sm:$0xff]  }
  0xba   :  { %1089 = vmatprep.subr.bf16.mxu1 %v7521_v53 }
 0x13e   :  { %v417_v23 = vpop.f32.mrf.mxu0 }
 0x13f   :  { %v418_v30 = vadd.f32 %v417_v23, %v362_v25  ;;  %v7518_v23 = vld [vmem:[%s9556_s6 + $0x80] sm:$0xff]  }
 0x140   :  { %v419_v26 = vpop.f32.mrf.mxu0 }
 0x141   :  { %v420_v28 = vadd.f32 %v419_v26, %v366_v24  ;;  %v426_v42 = vmax.f32 %v418_v30, 0.0  ;;  %v7524_v26 = vld [vmem:[%s9555_s5 + $0x70] sm:$0xff]   ;;  %v7528_v30 = vld [vmem:[%s9555_s5 + $0x60] sm:$0xff]  }
 0x142   :  { %v421_v27 = vpop.f32.mrf.mxu0 }
 0x143   :  { %v422_v29 = vadd.f32 %v421_v27, %v362_v25  ;;  %v427_v40 = vmax.f32 %v420_v28, 0.0  ;;  %v7523_v25 = vld [vmem:[%s9555_s5 + $0x38] sm:$0xff]   ;;  %v7525_v27 = vld [vmem:[%s9555_s5 + $0x30] sm:$0xff]   ;;  %v7526_v28 = vld [vmem:[%s9555_s5 + $0x68] sm:$0xff]  }
 0x144   :  { %v423_v31 = vpop.f32.mrf.mxu0 }
 0x145   :  { %v424_v34 = vadd.f32 %v423_v31, %v366_v24  ;;  %v428_v36 = vmax.f32 %v422_v29, 0.0  ;;  %v7522_v24 = vld [vmem:[%s9555_s5 + $0x78] sm:$0xff]   ;;  %v7527_v29 = vld [vmem:[%s9555_s5 + $0x28] sm:$0xff]   ;;  %v7529_v31 = vld [vmem:[%s9555_s5 + $0x20] sm:$0xff]  }
 0x147   :  { %v429_v41 = vmax.f32 %v424_v34, 0.0  ;;  %v462_v44 = vpack.c.bf16 %v428_v36, %v426_v42  ;;  %v7530_v34 = vld [vmem:[%s9555_s5 + $0x58] sm:$0xff]   ;;  %v7533_v42 = vld [vmem:[%s9555_s5 + $0x10] sm:$0xff]  }
 0x148   :  { %v7531_v36 = vld [vmem:[%s9555_s5 + $0x18] sm:$0xff]  }
 0x149   :  { %v463_v43 = vpack.c.bf16 %v429_v41, %v427_v40  ;;  %v7532_v41 = vld [vmem:[%s9555_s5 + $0x50] sm:$0xff]  }
 0x14b   :  { %669 = vmatprep.mubr.bf16.mxu1 %v463_v43  ;;  %v1053_v43 = vld [vmem:[#allocation13 + $0x4] ss:$8 sm:$0x3] }
 0x14c   :  { %670 = vmatmul.mubr.bf16.vlgmr.msra.gmra.mxu1 %v462_v44  ;;  %v1058_v45 = vrot.slane %v1053_v43, %v8952_v21  ;;  %v1062_v49 = vrot.slane %v1053_v43, %v8949_v20 }
 0x14d   :  { %1107 = vmatprep.mubr.bf16.mxu1 %v8424_v35  ;;  %1090 = vmatpush1.bf16.msra.mxu1 %v7519_v52 }
 0x154   :  { %6587 = vmatmul.mubr.msk.bf16.vlgmr.msra.gmra.mxu1 %vm379_vm0, %v8816_v39 }
 0x155   :  { %1355 = vmatprep.mubr.bf16.mxu1 %v8424_v35 }
 0x20c   :  { %v671_v55 = vpop.f32.mrf.mxu1 }
 0x20d   :  { %v672_v62 = vadd.f32 %v671_v55, %v470_v57 }
 0x20e   :  { %v673_v58 = vpop.f32.mrf.mxu1 }
 0x20f   :  { %v674_v60 = vadd.f32 %v673_v58, %v474_v56  ;;  %v680_v4 = vmax.f32 %v672_v62, 0.0 }
 0x210   :  { %v675_v59 = vpop.f32.mrf.mxu1 }
 0x211   :  { %v676_v61 = vadd.f32 %v675_v59, %v470_v57  ;;  %v681_v2 = vmax.f32 %v674_v60, 0.0  ;;  %v7537_v59 = vld [vmem:[%s9555_s5] sm:$0xff]  }
 0x212   :  { %v677_v63 = vpop.f32.mrf.mxu1 }
 0x213   :  { %v678_v0 = vadd.f32 %v677_v63, %v474_v56  ;;  %v682_v1 = vmax.f32 %v676_v61, 0.0  ;;  %v7536_v56 = vld [vmem:[%s9555_s5 + $0x40] sm:$0xff]  }
 0x214   :  { %v1109_v40 = vpop.f32.mrf.mxu1  ;;  %v7538_v63 = vld [vmem:[%s9554_s4 + $0x120] ss:$8 sps:$4 sm:$0xff]  }
 0x215   :  { %v683_v3 = vmax.f32 %v678_v0, 0.0  ;;  %v716_v6 = vpack.c.bf16 %v682_v1, %v680_v4  ;;  %v1110_v48 = vadd.f32 %v1109_v40, %v1058_v45  ;;  %v7540_v0 = vld [vmem:[%s9554_s4 + $0x124] ss:$8 sps:$4 sm:$0xff]   ;;  %v7541_v1 = vld [vmem:[%s9554_s4 + $0x130] ss:$8 sps:$4 sm:$0xff]  }
 0x216   :  { %v1111_v44 = vpop.f32.mrf.mxu1  ;;  %1337 = vmatprep.subr.bf16.mxu1 %v7540_v0  ;;  %v7556_v0 = vld [vmem:[%s9555_s5 + $0xe0] sm:$0xff]  }
 0x217   :  { %v717_v39 = vpack.c.bf16 %v683_v3, %v681_v2  ;;  %v1112_v52 = vadd.f32 %v1111_v44, %v1062_v49  ;;  %v1118_v54 = vmax.f32 %v1110_v48, 0.0  ;;  %v7543_v2 = vld [vmem:[%s9554_s4 + $0x134] ss:$8 sps:$4 sm:$0xff]   ;;  %1338 = vmatpush1.bf16.msra.mxu1 %v7538_v63  ;;  %v7555_v63 = vld [vmem:[%s9555_s5 + $0x128] sm:$0xff]  }
 0x218   :  { %v1113_v46 = vpop.f32.mrf.mxu1 }
 0x219   :  { %847 = vmatprep.mubr.bf16.mxu0 %v717_v39  ;;  %v1114_v55 = vadd.f32 %v1113_v46, %v1058_v45  ;;  %v1119_v57 = vmax.f32 %v1112_v52, 0.0  ;;  %v7544_v52 = vld [vmem:[%s9555_s5 + $0xf8] sm:$0xff]  }
 0x21a   :  { %848 = vmatmul.mubr.bf16.vlgmr.msra.gmra.mxu0 %v716_v6  ;;  %v1115_v51 = vpop.f32.mrf.mxu1  ;;  %7204 = vmatprep.subr.bf16.mxu1 %v7544_v52  ;;  %v1545_v52 = vld [vmem:[#allocation13 + $0x20] ss:$8 sm:$0x3] }
 0x21b   :  { %7161 = vmatpush3.bf16.msra.mxu0 %v7504_v5  ;;  %1017 = vmatprep.mubr.bf16.mxu0 %v717_v39  ;;  %v1116_v53 = vadd.f32 %v1115_v51, %v1062_v49  ;;  %v1120_v60 = vmax.f32 %v1114_v55, 0.0  ;;  %v7547_v55 = vld [vmem:[%s9555_s5 + $0x138] sm:$0xff]  }
 0x21c   :  { %7162 = vmatprep.subr.bf16.mxu0 %v7505_v7  ;;  %v350_v7 = vld [vmem:[#allocation10] sm:$0xff] }
 0x21d   :  { %v1121_v58 = vmax.f32 %v1116_v53, 0.0  ;;  %v1154_v62 = vpack.c.bf16 %v1120_v60, %v1118_v54  ;;  %v7545_v53 = vld [vmem:[%s9555_s5 + $0xb8] sm:$0xff]   ;;  %v7552_v60 = vld [vmem:[%s9555_s5 + $0xe8] sm:$0xff]  }
 0x21e   :  { %v7546_v54 = vld [vmem:[%s9555_s5 + $0x178] sm:$0xff]  }
 0x21f   :  { %7163 = vmatpush3.bf16.msra.mxu0 %v7506_v8  ;;  %v1155_v61 = vpack.c.bf16 %v1121_v58, %v1119_v57  ;;  %v888_v8 = vld [vmem:[#allocation13 + $0x3] ss:$0 sm:$0xff]  ;;  %v7550_v57 = vld [vmem:[%s9555_s5 + $0x170] sm:$0xff]  }
 0x220   :  { %7164 = vmatprep.subr.bf16.mxu0 %v7507_v9  ;;  %v7549_v58 = vld [vmem:[%s9555_s5 + $0xb0] sm:$0xff]  }
 0x223   :  { %7165 = vmatpush3.bf16.msra.mxu0 %v7508_v10 }
 0x224   :  { %7166 = vmatprep.subr.bf16.mxu0 %v7509_v11  ;;  %v1036_v11 = vmul.f32 %v350_v7, %v350_v7 }
 0x227   :  { %7167 = vmatpush3.bf16.msra.mxu0 %v7510_v12 }
 0x228   :  { %7168 = vmatprep.subr.bf16.mxu0 %v7511_v13  ;;  %v351_v13 = vld [vmem:[#allocation10 + $0x8] sm:$0xff] }
 0x22b   :  { %7169 = vmatpush3.bf16.msra.mxu0 %v7512_v14 }
 0x22c   :  { %7170 = vmatprep.subr.bf16.mxu0 %v7513_v15 }
 0x22f   :  { %7171 = vmatpush3.bf16.msra.mxu0 %v7514_v16 }
 0x230   :  { %7172 = vmatprep.subr.bf16.mxu0 %v7515_v17 }
 0x233   :  { %7173 = vmatpush3.bf16.msra.mxu0 %v7516_v18 }
 0x234   :  { %7174 = vmatprep.subr.bf16.mxu0 %v7517_v22  ;;  %v1037_v22 = vmul.f32 %v351_v13, %v351_v13 }
 0x237   :  { %7175 = vmatpush3.bf16.msra.mxu0 %v7518_v23 }
 0x238   :  { %7182 = vmatprep.subr.bf16.mxu0 %v7522_v24 }
 0x23a   :  { %1018 = vmatmul.mubr.bf16.vlgmr.msra.gmra.mxu0 %v716_v6 }
 0x23b   :  { %7183 = vmatpush3.bf16.msra.mxu0 %v7523_v25  ;;  %1285 = vmatprep.mubr.bf16.mxu0 %v1155_v61  ;;  %v7554_v61 = vld [vmem:[%s9555_s5 + $0x168] sm:$0xff]  }
 0x23c   :  { %7184 = vmatprep.subr.bf16.mxu0 %v7524_v26 }
 0x23f   :  { %7185 = vmatpush3.bf16.msra.mxu0 %v7525_v27 }
 0x240   :  { %7186 = vmatprep.subr.bf16.mxu0 %v7526_v28 }
 0x243   :  { %7187 = vmatpush3.bf16.msra.mxu0 %v7527_v29 }
 0x244   :  { %7188 = vmatprep.subr.bf16.mxu0 %v7528_v30 }
 0x247   :  { %7189 = vmatpush3.bf16.msra.mxu0 %v7529_v31  ;;  %v718_v31 = vld [vmem:[#allocation13 + $0x2] ss:$0 sm:$0xff] }
 0x248   :  { %7190 = vmatprep.subr.bf16.mxu0 %v7530_v34 }
 0x24b   :  { %7191 = vmatpush3.bf16.msra.mxu0 %v7531_v36 }
 0x24c   :  { %7192 = vmatprep.subr.bf16.mxu0 %v7532_v41 }
 0x24f   :  { %7193 = vmatpush3.bf16.msra.mxu0 %v7533_v42 }
 0x250   :  { %7194 = vmatprep.subr.bf16.mxu0 %v7534_v47 }
 0x253   :  { %7195 = vmatpush3.bf16.msra.mxu0 %v7535_v50 }
 0x254   :  { %7196 = vmatprep.subr.bf16.mxu0 %v7536_v56  ;;  %v7548_v56 = vld [vmem:[%s9555_s5 + $0xf0] sm:$0xff]  }
 0x257   :  { %7197 = vmatpush3.bf16.msra.mxu0 %v7537_v59  ;;  %v7551_v59 = vld [vmem:[%s9555_s5 + $0x130] sm:$0xff]  }
 0x258   :  { %1581 = vmatprep.subr.bf16.mxu0 %v7543_v2  ;;  %v7557_v2 = vld [vmem:[%s9555_s5 + $0xa0] sm:$0xff]  }
 0x25a   :  { %1286 = vmatmul.mubr.bf16.vlgmr.msra.gmra.mxu0 %v1154_v62  ;;  %v7553_v62 = vld [vmem:[%s9555_s5 + $0xa8] sm:$0xff]  }
 0x25b   :  { %1599 = vmatprep.mubr.bf16.mxu0 %v8424_v35  ;;  %1582 = vmatpush1.bf16.msra.mxu0 %v7541_v1  ;;  %v7558_v1 = vld [vmem:[%s9555_s5 + $0x160] sm:$0xff]  }
 0x25c   :  { %7226 = vmatprep.subr.bf16.mxu0 %v7546_v54 }
 0x2da   :  { %v7154_v3 = vpop.f32.mrf.mxu0 }
 0x2dc   :  { %v7155_v4 = vpop.f32.mrf.mxu0 }
 0x2dd   :  { %v7156_v30 = vadd.f32 %v7155_v4, %v7154_v3  ;;  %v7559_v3 = vld [vmem:[%s9555_s5 + $0x120] sm:$0xff]   ;;  %v7560_v4 = vld [vmem:[%s9555_s5 + $0xd8] sm:$0xff]  }
 0x2de   :  { %v7157_v39 = vpop.f32.mrf.mxu0 }
 0x2df   :  { %v850_v36 = vadd.f32 %v7156_v30, %v718_v31  ;;  %v7575_v30 = vld [vmem:[%s9555_s5 + $0x100] sm:$0xff]  }
 0x2e0   :  { %v7158_v5 = vpop.f32.mrf.mxu0 }
 0x2e1   :  { %v7159_v40 = vadd.f32 %v7158_v5, %v7157_v39  ;;  %v7562_v39 = vld [vmem:[%s9555_s5 + $0x158] sm:$0xff]  }
 0x2e2   :  { %v7561_v5 = vld [vmem:[%s9555_s5 + $0x98] sm:$0xff]  }
 0x2e3   :  { %v853_v44 = vadd.f32 %v7159_v40, %v718_v31  ;;  %v7578_v31 = vld [vmem:[%s9554_s4 + $0x154] ss:$8 sps:$4 sm:$0xff]  }
 0x2fa   :  { %v7176_v6 = vpop.f32.mrf.mxu0 }
 0x2fc   :  { %v7177_v9 = vpop.f32.mrf.mxu0 }
 0x2fd   :  { %v7178_v10 = vadd.f32 %v7177_v9, %v7176_v6  ;;  %v7563_v6 = vld [vmem:[%s9555_s5 + $0x118] sm:$0xff]  }
 0x2fe   :  { %v7179_v12 = vpop.f32.mrf.mxu0 }
 0x2ff   :  { %v1020_v14 = vadd.f32 %v7178_v10, %v888_v8 }
 0x300   :  { %v7180_v15 = vpop.f32.mrf.mxu0 }
 0x301   :  { %v1026_v16 = vmul.f32 0.5, %v1020_v14  ;;  %v7181_v17 = vadd.f32 %v7180_v15, %v7179_v12  ;;  %v1038_v18 = vadd.f32 %v1036_v11, %v1020_v14  ;;  %v7564_v15 = vld [vmem:[%s9555_s5 + $0xd0] sm:$0xff]  }
 0x303   :  { %v1028_v23 = vmul.f32 1.442695, %v1026_v16  ;;  %v1023_v24 = vadd.f32 %v7181_v17, %v888_v8  ;;  %v1040_v25 = vsel %vm379_vm0, %v1038_v18, 0.0  ;;  %v1156_v8 = vld [vmem:[#allocation13 + $0x5] ss:$0 sm:$0xff]  ;;  %v7566_v16 = vld [vmem:[%s9555_s5 + $0x150] sm:$0xff]  }
 0x304   :  { %1041 = vadd.xlane.f32.xlu0 %v1040_v25  ;;  %v7565_v18 = vld [vmem:[%s9555_s5 + $0x90] sm:$0xff]   ;;  %v7569_v25 = vld [vmem:[%s9555_s5 + $0x88] sm:$0xff]  }
 0x305   :  { %7643 = vpow2.f32 %v1028_v23  ;;  %v1027_v26 = vmul.f32 0.5, %v1023_v24  ;;  %v1039_v27 = vadd.f32 %v1037_v22, %v1023_v24  ;;  %v7567_v22 = vld [vmem:[%s9555_s5 + $0x110] sm:$0xff]   ;;  %v7568_v23 = vld [vmem:[%s9555_s5 + $0xc8] sm:$0xff]  }
 0x306   :  { %v7570_v24 = vld [vmem:[%s9555_s5 + $0x148] sm:$0xff]  }
 0x307   :  { %v1030_v28 = vmul.f32 1.442695, %v1027_v26  ;;  %v1043_v29 = vsel %vm379_vm0, %v1039_v27, 0.0  ;;  %v7571_v26 = vld [vmem:[%s9555_s5 + $0x108] sm:$0xff]   ;;  %v7572_v27 = vld [vmem:[%s9555_s5 + $0xc0] sm:$0xff]  }
 0x308   :  { %1044 = vadd.xlane.f32.xlu0 %v1043_v29  ;;  %v7573_v29 = vld [vmem:[%s9555_s5 + $0x80] sm:$0xff]  }
 0x309   :  { %7645 = vpow2.f32 %v1030_v28  ;;  %v7574_v28 = vld [vmem:[%s9555_s5 + $0x140] sm:$0xff]  }
 0x312   :  { %v7644_v34 = vpop.eup %7643 }
 0x313   :  { %v1032_v41 = vmul.f32 %v7644_v34, %v350_v7 }
 0x315   :  { %v1034_v42 = vadd.f32 %v1032_v41, %v850_v36 }
 0x316   :  { %v7646_v43 = vpop.eup %7645 }
 0x317   :  { %v1033_v45 = vmul.f32 %v7646_v43, %v351_v13  ;;  %v2324_v46 = vmul.f32 %v1034_v42, %v1034_v42 }
 0x319   :  { %v1035_v47 = vadd.f32 %v1033_v45, %v853_v44  ;;  %v2326_v48 = vsel %vm379_vm0, %v2324_v46, 0.0 }
 0x31a   :  { %2327 = vadd.xlane.f32.xlu1 %v2326_v48  ;;  %v7198_v7 = vpop.f32.mrf.mxu0 }
 0x31b   :  { %v9100_v49 = vpack.c.bf16 %v1035_v47, %v1034_v42  ;;  %v2325_v50 = vmul.f32 %v1035_v47, %v1035_v47 }
 0x31c   :  { %v7199_v9 = vpop.f32.mrf.mxu0 }
 0x31d   :  { %6606 = vmatmul.mubr.msk.bf16.vlgmr.msra.gmra.mxu1 %vm379_vm0, %v9100_v49  ;;  %6625 = vmatmul.mubr.msk.bf16.vlgmr.msra.gmra.mxu0 %vm379_vm0, %v9100_v49  ;;  %v2329_v51 = vsel %vm379_vm0, %v2325_v50, 0.0  ;;  %v7200_v10 = vadd.f32 %v7199_v9, %v7198_v7 }
 0x31e   :  { %2330 = vadd.xlane.f32.xlu1 %v2329_v51  ;;  %7205 = vmatpush3.bf16.msra.mxu1 %v7545_v53  ;;  %v7201_v11 = vpop.f32.mrf.mxu0  ;;  %v1298_v51 = vld [vmem:[#allocation13 + $0x6] ss:$8 sm:$0x3] }
 0x31f   :  { %7227 = vmatpush3.bf16.msra.mxu0 %v7547_v55  ;;  %7206 = vmatprep.subr.bf16.mxu1 %v7548_v56  ;;  %v9167_v12 = vadd.f32 %v7200_v10, %v1156_v8  ;;  %v1307_v55 = vrot.slane %v1298_v51, %v8949_v20  ;;  %v1554_v56 = vrot.slane %v1545_v52, %v8949_v20 }
 0x320   :  { %7228 = vmatprep.subr.bf16.mxu0 %v7550_v57  ;;  %v7202_v13 = vpop.f32.mrf.mxu0  ;;  %v1303_v57 = vrot.slane %v1298_v51, %v8952_v21  ;;  %v7594_v51 = vld [vmem:[%s9554_s4 + $0x180] ss:$8 sps:$4 sm:$0xff]  }
 0x321   :  { %v7203_v14 = vadd.f32 %v7202_v13, %v7201_v11 }
 0x322   :  { %7207 = vmatpush3.bf16.msra.mxu1 %v7549_v58  ;;  %v1550_v58 = vrot.slane %v1545_v52, %v8952_v21  ;;  %v7599_v52 = vld [vmem:[%s9554_s4 + $0x174] ss:$8 sps:$4 sm:$0xff]  }
 0x323   :  { %7229 = vmatpush3.bf16.msra.mxu0 %v7551_v59  ;;  %7208 = vmatprep.subr.bf16.mxu1 %v7552_v60  ;;  %v9175_v17 = vadd.f32 %v7203_v14, %v1156_v8 }
 0x324   :  { %7230 = vmatprep.subr.bf16.mxu0 %v7554_v61 }
 0x326   :  { %7209 = vmatpush3.bf16.msra.mxu1 %v7553_v62 }
 0x327   :  { %7231 = vmatpush3.bf16.msra.mxu0 %v7555_v63  ;;  %7210 = vmatprep.subr.bf16.mxu1 %v7556_v0 }
 0x328   :  { %7232 = vmatprep.subr.bf16.mxu0 %v7558_v1 }
 0x32a   :  { %7211 = vmatpush3.bf16.msra.mxu1 %v7557_v2 }
 0x32b   :  { %7233 = vmatpush3.bf16.msra.mxu0 %v7559_v3  ;;  %7212 = vmatprep.subr.bf16.mxu1 %v7560_v4 }
 0x32c   :  { %7234 = vmatprep.subr.bf16.mxu0 %v7562_v39 }
 0x32e   :  { %7213 = vmatpush3.bf16.msra.mxu1 %v7561_v5 }
 0x32f   :  { %7235 = vmatpush3.bf16.msra.mxu0 %v7563_v6  ;;  %7214 = vmatprep.subr.bf16.mxu1 %v7564_v15 }
 0x330   :  { %7236 = vmatprep.subr.bf16.mxu0 %v7566_v16 }
 0x332   :  { %7215 = vmatpush3.bf16.msra.mxu1 %v7565_v18 }
 0x333   :  { %7237 = vmatpush3.bf16.msra.mxu0 %v7567_v22  ;;  %7216 = vmatprep.subr.bf16.mxu1 %v7568_v23  ;;  %v7576_v23 = vld [vmem:[%s9554_s4 + $0x150] ss:$8 sps:$4 sm:$0xff]  }
 0x334   :  { %7238 = vmatprep.subr.bf16.mxu0 %v7570_v24 }
 0x336   :  { %7217 = vmatpush3.bf16.msra.mxu1 %v7569_v25 }
 0x337   :  { %7239 = vmatpush3.bf16.msra.mxu0 %v7571_v26  ;;  %7218 = vmatprep.subr.bf16.mxu1 %v7572_v27  ;;  %v7581_v26 = vld [vmem:[%s9554_s4 + $0x1d4] ss:$8 sps:$4 sm:$0xff]   ;;  %v7579_v27 = vld [vmem:[%s9554_s4 + $0x1d0] ss:$8 sps:$4 sm:$0xff]  }
 0x338   :  { %7240 = vmatprep.subr.bf16.mxu0 %v7574_v28  ;;  %v7584_v28 = vld [vmem:[%s9554_s4 + $0x1c4] ss:$8 sps:$4 sm:$0xff]  }
 0x33a   :  { %7219 = vmatpush3.bf16.msra.mxu1 %v7573_v29  ;;  %v7582_v29 = vld [vmem:[%s9554_s4 + $0x1c0] ss:$8 sps:$4 sm:$0xff]  }
 0x33b   :  { %7241 = vmatpush3.bf16.msra.mxu0 %v7575_v30  ;;  %1825 = vmatprep.subr.bf16.mxu1 %v7578_v31  ;;  %v7587_v30 = vld [vmem:[%s9554_s4 + $0x1b4] ss:$8 sps:$4 sm:$0xff]   ;;  %v7585_v31 = vld [vmem:[%s9554_s4 + $0x1b0] ss:$8 sps:$4 sm:$0xff]  }
 0x38d   :  { %v1042_v34 = vpop.xlane.xlu0 %1041 }
 0x38e   :  { %v9210_v36 = vmul.f32 0.5, %v1042_v34  ;;  %v7588_v34 = vld [vmem:[%s9554_s4 + $0x1a0] ss:$8 sps:$4 sm:$0xff]  }
 0x390   :  { %v1048_v40 = vsub.f32 -7.351508, %v9210_v36 }
 0x391   :  { %v1045_v41 = vpop.xlane.xlu0 %1044 }
 0x392   :  { %v9213_v42 = vmul.f32 0.5, %v1045_v41  ;;  %v7593_v41 = vld [vmem:[%s9554_s4 + $0x194] ss:$8 sps:$4 sm:$0xff]  }
 0x394   :  { %v1049_v43 = vsub.f32 -7.351508, %v9213_v42 }
 0x3a3   :  { %v2328_v44 = vpop.xlane.xlu1 %2327 }
 0x3a4   :  { %v9216_v45 = vmul.f32 0.5, %v2328_v44  ;;  %v7591_v44 = vld [vmem:[%s9554_s4 + $0x190] ss:$8 sps:$4 sm:$0xff]  }
 0x3a6   :  { %v2334_v46 = vsub.f32 -7.351508, %v9216_v45 }
 0x3a7   :  { %v2331_v47 = vpop.xlane.xlu1 %2330 }
 0x3a8   :  { %v9219_v48 = vmul.f32 0.5, %v2331_v47  ;;  %v7596_v47 = vld [vmem:[%s9554_s4 + $0x184] ss:$8 sps:$4 sm:$0xff]  }
 0x3aa   :  { %v2335_v50 = vsub.f32 -7.351508, %v9219_v48 }
 0x3dd   :  { %v1357_v53 = vpop.f32.mrf.mxu1  ;;  %v1601_v54 = vpop.f32.mrf.mxu0 }
 0x3de   :  { %v1358_v3 = vadd.f32 %v1357_v53, %v1303_v57  ;;  %v1602_v4 = vadd.f32 %v1601_v54, %v1550_v58  ;;  %v7597_v53 = vld [vmem:[%s9554_s4 + $0x170] ss:$8 sps:$4 sm:$0xff]   ;;  %v7602_v54 = vld [vmem:[%s9554_s4 + $0x164] ss:$8 sps:$4 sm:$0xff]  }
 0x3df   :  { %v1359_v59 = vpop.f32.mrf.mxu1  ;;  %v1603_v60 = vpop.f32.mrf.mxu0 }
 0x3e0   :  { %v1360_v63 = vadd.f32 %v1359_v59, %v1307_v55  ;;  %v1604_v0 = vadd.f32 %v1603_v60, %v1554_v56  ;;  %v1366_v15 = vmax.f32 %v1358_v3, 0.0  ;;  %v1610_v16 = vmax.f32 %v1602_v4, 0.0  ;;  %v7606_v59 = vld [vmem:[%s9554_s4 + $0x240] ss:$8 sps:$4 sm:$0xff]   ;;  %v7611_v60 = vld [vmem:[%s9554_s4 + $0x234] ss:$8 sps:$4 sm:$0xff]  }
 0x3e1   :  { %v1361_v61 = vpop.f32.mrf.mxu1  ;;  %v1605_v62 = vpop.f32.mrf.mxu0  ;;  %v7618_v3 = vld [vmem:[%s9554_s4 + $0x200] ss:$8 sps:$4 sm:$0xff]   ;;  %v7623_v4 = vld [vmem:[%s9554_s4 + $0x1f4] ss:$8 sps:$4 sm:$0xff]  }
 0x3e2   :  { %v1362_v1 = vadd.f32 %v1361_v61, %v1303_v57  ;;  %v1606_v2 = vadd.f32 %v1605_v62, %v1550_v58  ;;  %v1367_v10 = vmax.f32 %v1360_v63, 0.0  ;;  %v1611_v11 = vmax.f32 %v1604_v0, 0.0  ;;  %v7603_v57 = vld [vmem:[%s9554_s4 + $0x250] ss:$8 sps:$4 sm:$0xff]   ;;  %v7608_v58 = vld [vmem:[%s9554_s4 + $0x244] ss:$8 sps:$4 sm:$0xff]  }
 0x3e3   :  { %v1363_v39 = vpop.f32.mrf.mxu1  ;;  %v1607_v5 = vpop.f32.mrf.mxu0  ;;  %v7609_v61 = vld [vmem:[%s9554_s4 + $0x230] ss:$8 sps:$4 sm:$0xff]   ;;  %v7614_v62 = vld [vmem:[%s9554_s4 + $0x224] ss:$8 sps:$4 sm:$0xff]   ;;  %v7612_v63 = vld [vmem:[%s9554_s4 + $0x220] ss:$8 sps:$4 sm:$0xff]  }
 0x3e4   :  { %v1364_v6 = vadd.f32 %v1363_v39, %v1307_v55  ;;  %v1608_v7 = vadd.f32 %v1607_v5, %v1554_v56  ;;  %v1368_v8 = vmax.f32 %v1362_v1, 0.0  ;;  %v1612_v9 = vmax.f32 %v1606_v2, 0.0  ;;  %v7600_v55 = vld [vmem:[%s9554_s4 + $0x160] ss:$8 sps:$4 sm:$0xff]   ;;  %v7605_v56 = vld [vmem:[%s9554_s4 + $0x254] ss:$8 sps:$4 sm:$0xff]  }
 0x3e5   :  { %v7617_v0 = vld [vmem:[%s9554_s4 + $0x214] ss:$8 sps:$4 sm:$0xff]   ;;  %v7615_v1 = vld [vmem:[%s9554_s4 + $0x210] ss:$8 sps:$4 sm:$0xff]   ;;  %v7620_v2 = vld [vmem:[%s9554_s4 + $0x204] ss:$8 sps:$4 sm:$0xff]  }
 0x3e6   :  { %v1369_v13 = vmax.f32 %v1364_v6, 0.0  ;;  %v1613_v14 = vmax.f32 %v1608_v7, 0.0  ;;  %v1402_v24 = vpack.c.bf16 %v1368_v8, %v1366_v15  ;;  %v1646_v25 = vpack.c.bf16 %v1612_v9, %v1610_v16  ;;  %v7621_v39 = vld [vmem:[%s9554_s4 + $0x1f0] ss:$8 sps:$4 sm:$0xff]   ;;  %v7626_v5 = vld [vmem:[%s9554_s4 + $0x1e4] ss:$8 sps:$4 sm:$0xff]  }
 0x3e7   :  { %v7624_v6 = vld [vmem:[%s9554_s4 + $0x1e0] ss:$8 sps:$4 sm:$0xff]   ;;  %v7627_v7 = vld [vmem:[%s9556_s6 + $0x178] sm:$0xff]   ;;  %v7629_v9 = vld [vmem:[%s9556_s6 + $0x170] sm:$0xff]  }
 0x3e8   :  { %v1403_v18 = vpack.c.bf16 %v1369_v13, %v1367_v10  ;;  %v1647_v22 = vpack.c.bf16 %v1613_v14, %v1611_v11  ;;  %v7628_v8 = vld [vmem:[%s9556_s6 + $0x138] sm:$0xff]   ;;  %7248 = vmatprep.subr.bf16.mxu0 %v7627_v7  ;;  %v7630_v10 = vld [vmem:[%s9556_s6 + $0x130] sm:$0xff]   ;;  %v7631_v11 = vld [vmem:[%s9556_s6 + $0x168] sm:$0xff]  }
 0x3e9   :  { %v7632_v13 = vld [vmem:[%s9556_s6 + $0x128] sm:$0xff]   ;;  %v7633_v14 = vld [vmem:[%s9556_s6 + $0x160] sm:$0xff]   ;;  %v7635_v16 = vld [vmem:[%s9556_s6 + $0x158] sm:$0xff]  }
 0x3ea   :  { %1533 = vmatprep.mubr.bf16.mxu1 %v1403_v18  ;;  %1777 = vmatprep.mubr.bf16.mxu0 %v1647_v22  ;;  %v7634_v15 = vld [vmem:[%s9556_s6 + $0x120] sm:$0xff]   ;;  %v7636_v18 = vld [vmem:[%s9556_s6 + $0x118] sm:$0xff]   ;;  %v7638_v7 = vld [vmem:[%s9556_s6 + $0x110] sm:$0xff]  }
 0x3eb   :  { %1534 = vmatmul.mubr.bf16.vlgmr.msra.gmra.mxu1 %v1402_v24  ;;  %1778 = vmatmul.mubr.bf16.vlgmr.msra.gmra.mxu0 %v1646_v25  ;;  %v1404_v24 = vld [vmem:[#allocation13 + $0x7] ss:$0 sm:$0xff] }
 0x3ec   :  { %1826 = vmatpush1.bf16.msra.mxu1 %v7576_v23  ;;  %1843 = vmatprep.mubr.bf16.mxu1 %v8424_v35 }
 0x3ed   :  { %2065 = vmatprep.subr.bf16.mxu1 %v7581_v26  ;;  %7249 = vmatpush3.bf16.msra.mxu0 %v7628_v8  ;;  %v1648_v26 = vld [vmem:[#allocation13 + $0x21] ss:$0 sm:$0xff]  ;;  %v7639_v8 = vld [vmem:[%s9556_s6 + $0x148] sm:$0xff]  }
 0x3ee   :  { %7250 = vmatprep.subr.bf16.mxu0 %v7629_v9  ;;  %v7640_v9 = vld [vmem:[%s9556_s6 + $0x108] sm:$0xff]  }
 0x3f1   :  { %7251 = vmatpush3.bf16.msra.mxu0 %v7630_v10  ;;  %v7641_v10 = vld [vmem:[%s9556_s6 + $0x140] sm:$0xff]  }
 0x3f2   :  { %7252 = vmatprep.subr.bf16.mxu0 %v7631_v11  ;;  %v7642_v11 = vld [vmem:[%s9556_s6 + $0x100] sm:$0xff]  }
 0x3f3   :  { %6644 = vmatmul.mubr.msk.bf16.vlgmr.msra.gmra.mxu1 %vm379_vm0, %v9100_v49  ;;  %v7590_v49 = vld [vmem:[%s9554_s4 + $0x1a4] ss:$8 sps:$4 sm:$0xff]  }
 0x3f4   :  { %2066 = vmatpush1.bf16.msra.mxu1 %v7579_v27 }
 0x3f5   :  { %2067 = vmatprep.subr.bf16.mxu1 %v7584_v28  ;;  %7253 = vmatpush3.bf16.msra.mxu0 %v7632_v13  ;;  %v1893_v13 = vld [vmem:[#allocation13 + $0x41] ss:$8 sm:$0x3] }
 0x3f6   :  { %7254 = vmatprep.subr.bf16.mxu0 %v7633_v14 }
 0x3f8   :  { %2068 = vmatpush1.bf16.msra.mxu1 %v7582_v29 }
 0x3f9   :  { %2069 = vmatprep.subr.bf16.mxu1 %v7587_v30  ;;  %7255 = vmatpush3.bf16.msra.mxu0 %v7634_v15  ;;  %v1902_v15 = vrot.slane %v1893_v13, %v8949_v20 }
 0x3fa   :  { %7256 = vmatprep.subr.bf16.mxu0 %v7635_v16  ;;  %v1898_v16 = vrot.slane %v1893_v13, %v8952_v21 }
 0x3fc   :  { %2070 = vmatpush1.bf16.msra.mxu1 %v7585_v31 }
 0x3fd   :  { %2071 = vmatprep.subr.bf16.mxu1 %v7590_v49  ;;  %7257 = vmatpush3.bf16.msra.mxu0 %v7636_v18 }
 0x400   :  { %2072 = vmatpush1.bf16.msra.mxu1 %v7588_v34 }
 0x401   :  { %2073 = vmatprep.subr.bf16.mxu1 %v7593_v41 }
 0x404   :  { %2074 = vmatpush1.bf16.msra.mxu1 %v7591_v44 }
 0x405   :  { %2075 = vmatprep.subr.bf16.mxu1 %v7596_v47 }
 0x408   :  { %2076 = vmatpush1.bf16.msra.mxu1 %v7594_v51 }
 0x409   :  { %2077 = vmatprep.subr.bf16.mxu1 %v7599_v52  ;;  %v1789_v52 = vld [vmem:[#allocation13 + $0x40] ss:$8 sm:$0x3] }
 0x40c   :  { %2078 = vmatpush1.bf16.msra.mxu1 %v7597_v53 }
 0x40d   :  { %2079 = vmatprep.subr.bf16.mxu1 %v7602_v54 }
 0x410   :  { %2080 = vmatpush1.bf16.msra.mxu1 %v7600_v55 }
 0x411   :  { %2081 = vmatprep.subr.bf16.mxu1 %v7605_v56  ;;  %v1798_v56 = vrot.slane %v1789_v52, %v8949_v20 }
 0x414   :  { %2082 = vmatpush2.bf16.msra.mxu1 %v7603_v57  ;;  %v1794_v57 = vrot.slane %v1789_v52, %v8952_v21 }
 0x415   :  { %2083 = vmatprep.subr.bf16.mxu1 %v7608_v58 }
 0x418   :  { %2084 = vmatpush2.bf16.msra.mxu1 %v7606_v59 }
 0x419   :  { %2085 = vmatprep.subr.bf16.mxu1 %v7611_v60 }
 0x41c   :  { %2086 = vmatpush2.bf16.msra.mxu1 %v7609_v61 }
 0x41d   :  { %2087 = vmatprep.subr.bf16.mxu1 %v7614_v62 }
 0x420   :  { %2088 = vmatpush2.bf16.msra.mxu1 %v7612_v63 }
 0x421   :  { %2089 = vmatprep.subr.bf16.mxu1 %v7617_v0 }
 0x424   :  { %2090 = vmatpush2.bf16.msra.mxu1 %v7615_v1 }
 0x425   :  { %2091 = vmatprep.subr.bf16.mxu1 %v7620_v2 }
 0x428   :  { %2092 = vmatpush2.bf16.msra.mxu1 %v7618_v3 }
 0x429   :  { %2093 = vmatprep.subr.bf16.mxu1 %v7623_v4 }
 0x42c   :  { %2094 = vmatpush2.bf16.msra.mxu1 %v7621_v39 }
 0x42d   :  { %2095 = vmatprep.subr.bf16.mxu1 %v7626_v5 }
 0x430   :  { %2096 = vmatpush2.bf16.msra.mxu1 %v7624_v6  ;;  %v7637_v6 = vld [vmem:[%s9556_s6 + $0x150] sm:$0xff]  }
 0x431   :  { %7258 = vmatprep.subr.bf16.mxu0 %v7637_v6 }
 0x432   :  { %7259 = vmatpush3.bf16.msra.mxu0 %v7638_v7 }
 0x433   :  { %7260 = vmatprep.subr.bf16.mxu0 %v7639_v8 }
 0x436   :  { %7261 = vmatpush3.bf16.msra.mxu0 %v7640_v9 }
 0x437   :  { %7262 = vmatprep.subr.bf16.mxu0 %v7641_v10 }
 0x43a   :  { %7263 = vmatpush3.bf16.msra.mxu0 %v7642_v11  ;;  %v348_v11 = vld [vmem:[#allocation8] sm:$0xff] }
 0x4ab   :  { %v7220_v22 = vpop.f32.mrf.mxu1  ;;  %v7242_v23 = vpop.f32.mrf.mxu0 }
 0x4ad   :  { %v7221_v25 = vpop.f32.mrf.mxu1  ;;  %v7243_v27 = vpop.f32.mrf.mxu0 }
 0x4ae   :  { %v7222_v28 = vadd.f32 %v7221_v25, %v7220_v22  ;;  %v7244_v29 = vadd.f32 %v7243_v27, %v7242_v23 }
 0x4af   :  { %v7223_v30 = vpop.f32.mrf.mxu1  ;;  %v7245_v31 = vpop.f32.mrf.mxu0 }
 0x4b0   :  { %v9358_v49 = vadd.f32 %v7222_v28, %v1404_v24  ;;  %v9360_v34 = vadd.f32 %v7244_v29, %v1648_v26 }
 0x4b1   :  { %v7224_v41 = vpop.f32.mrf.mxu1  ;;  %v7246_v44 = vpop.f32.mrf.mxu0 }
 0x4b2   :  { %v7225_v47 = vadd.f32 %v7224_v41, %v7223_v30  ;;  %v7247_v51 = vadd.f32 %v7246_v44, %v7245_v31 }
 0x4b3   :  { %v1845_v53 = vpop.f32.mrf.mxu1 }
 0x4b4   :  { %v9362_v54 = vadd.f32 %v7225_v47, %v1404_v24  ;;  %v9364_v55 = vadd.f32 %v7247_v51, %v1648_v26  ;;  %v1846_v62 = vadd.f32 %v1845_v53, %v1794_v57  ;;  %v2146_v51 = vld [vmem:[#allocation13 + $0x42] ss:$0 sm:$0xff] }
 0x4b5   :  { %v1847_v58 = vpop.f32.mrf.mxu1 }
 0x4b6   :  { %v1848_v60 = vadd.f32 %v1847_v58, %v1798_v56  ;;  %v1854_v4 = vmax.f32 %v1846_v62, 0.0 }
 0x4b7   :  { %v1849_v59 = vpop.f32.mrf.mxu1 }
 0x4b8   :  { %v1850_v61 = vadd.f32 %v1849_v59, %v1794_v57  ;;  %v1855_v2 = vmax.f32 %v1848_v60, 0.0 }
 0x4b9   :  { %v1851_v63 = vpop.f32.mrf.mxu1 }
 0x4ba   :  { %v1852_v0 = vadd.f32 %v1851_v63, %v1798_v56  ;;  %v1856_v1 = vmax.f32 %v1850_v61, 0.0 }
 0x4bc   :  { %v1857_v3 = vmax.f32 %v1852_v0, 0.0  ;;  %v1890_v5 = vpack.c.bf16 %v1856_v1, %v1854_v4 }
 0x4be   :  { %v1891_v39 = vpack.c.bf16 %v1857_v3, %v1855_v2 }
 0x4c0   :  { %2097 = vmatprep.mubr.bf16.mxu1 %v1891_v39 }
 0x4c1   :  { %2098 = vmatmul.mubr.bf16.vlgmr.msra.gmra.mxu1 %v1890_v5 }
 0x581   :  { %v2099_v14 = vpop.f32.mrf.mxu1 }
 0x582   :  { %v2100_v25 = vadd.f32 %v2099_v14, %v1898_v16 }
 0x583   :  { %v2101_v18 = vpop.f32.mrf.mxu1 }
 0x584   :  { %v2102_v23 = vadd.f32 %v2101_v18, %v1902_v15  ;;  %v2108_v31 = vmax.f32 %v2100_v25, 0.0 }
 0x585   :  { %v2103_v22 = vpop.f32.mrf.mxu1 }
 0x586   :  { %v2104_v24 = vadd.f32 %v2103_v22, %v1898_v16  ;;  %v2109_v29 = vmax.f32 %v2102_v23, 0.0 }
 0x587   :  { %v2105_v26 = vpop.f32.mrf.mxu1 }
 0x588   :  { %v2106_v27 = vadd.f32 %v2105_v26, %v1902_v15  ;;  %v2110_v28 = vmax.f32 %v2104_v24, 0.0  ;;  %v349_v26 = vld [vmem:[#allocation8 + $0x8] sm:$0xff] }
 0x58a   :  { %v2111_v30 = vmax.f32 %v2106_v27, 0.0  ;;  %v2144_v44 = vpack.c.bf16 %v2110_v28, %v2108_v31 }
 0x58c   :  { %v2145_v41 = vpack.c.bf16 %v2111_v30, %v2109_v29 }
 0x58e   :  { %2275 = vmatprep.mubr.bf16.mxu0 %v2145_v41 }
 0x58f   :  { %2276 = vmatmul.mubr.bf16.vlgmr.msra.gmra.mxu0 %v2144_v44 }
 0x64f   :  { %v7264_v47 = vpop.f32.mrf.mxu0 }
 0x651   :  { %v7265_v52 = vpop.f32.mrf.mxu0 }
 0x652   :  { %v7266_v53 = vadd.f32 %v7265_v52, %v7264_v47 }
 0x653   :  { %v7267_v56 = vpop.f32.mrf.mxu0 }
 0x654   :  { %v2278_v57 = vadd.f32 %v7266_v53, %v2146_v51 }
 0x655   :  { %v7268_v58 = vpop.f32.mrf.mxu0 }
 0x656   :  { %v2288_v59 = vand.u32 2147483647, %v2278_v57  ;;  %v7269_v60 = vadd.f32 %v7268_v58, %v7267_v56  ;;  %v2286_v16 = vmax.f32 %v2278_v57, 0.0  ;;  %v2284_v24 = vmul.f32 %v2278_v57, %v348_v11 }
 0x658   :  { %v2290_v61 = vsub.f32 0.0, %v2288_v59  ;;  %v2281_v62 = vadd.f32 %v7269_v60, %v2146_v51 }
 0x65a   :  { %v2292_v63 = vmul.f32 1.442695, %v2290_v61  ;;  %v2289_v0 = vand.u32 2147483647, %v2281_v62  ;;  %v2287_v30 = vmax.f32 %v2281_v62, 0.0  ;;  %v2285_v44 = vmul.f32 %v2281_v62, %v349_v26 }
 0x65c   :  { %7647 = vpow2.f32 %v2292_v63  ;;  %v2291_v1 = vsub.f32 0.0, %v2289_v0 }
 0x65e   :  { %v2294_v2 = vmul.f32 1.442695, %v2291_v1 }
 0x660   :  { %7649 = vpow2.f32 %v2294_v2 }
 0x669   :  { %v7648_v3 = vpop.eup %7647 }
 0x66a   :  { %v2296_v4 = vadd.f32 1.0, %v7648_v3  ;;  %v2299_v6 = vmul.f32 -0.5, %v7648_v3  ;;  %v2302_v9 = vand.u32 2147483647, %v7648_v3 }
 0x66c   :  { %7651 = vlog2.f32 %v2296_v4  ;;  %v2300_v7 = vadd.f32 1.0, %v2299_v6  ;;  %vm2303_vm1 = vcmp.lt.f32.partialorder %v2302_v9, 0.0004427343 }
 0x66d   :  { %v7650_v39 = vpop.eup %7649 }
 0x66e   :  { %v2305_v5 = vadd.f32 1.0, %v7650_v39  ;;  %v2308_v8 = vmul.f32 -0.5, %v7650_v39  ;;  %v2301_v14 = vmul.f32 %v7648_v3, %v2300_v7  ;;  %v2311_v18 = vand.u32 2147483647, %v7650_v39 }
 0x670   :  { %7653 = vlog2.f32 %v2305_v5  ;;  %v2309_v15 = vadd.f32 1.0, %v2308_v8  ;;  %vm2312_vm2 = vcmp.lt.f32.partialorder %v2311_v18, 0.0004427343 }
 0x672   :  { %v2310_v28 = vmul.f32 %v7650_v39, %v2309_v15 }
 0x679   :  { %v7652_v10 = vpop.eup %7651 }
 0x67a   :  { %v2298_v13 = vmul.f32 0.6931472, %v7652_v10 }
 0x67c   :  { %v2304_v22 = vsel %vm2303_vm1, %v2301_v14, %v2298_v13 }
 0x67d   :  { %v7654_v23 = vpop.eup %7653  ;;  %v2314_v25 = vadd.f32 %v2304_v22, %v2286_v16 }
 0x67e   :  { %v2307_v27 = vmul.f32 0.6931472, %v7654_v23 }
 0x67f   :  { %v2316_v29 = vsub.f32 %v2284_v24, %v2314_v25 }
 0x680   :  { %v2313_v31 = vsel %vm2312_vm2, %v2310_v28, %v2307_v27 }
 0x681   :  { %v2318_v41 = vsel %vm379_vm0, %v2316_v29, 0.0  ;;  %v2315_v47 = vadd.f32 %v2313_v31, %v2287_v30 }
 0x682   :  { %2319 = vadd.xlane.f32.xlu0 %v2318_v41 }
 0x683   :  { %v2317_v51 = vsub.f32 %v2285_v44, %v2315_v47 }
 0x685   :  { %v2321_v52 = vsel %vm379_vm0, %v2317_v51, 0.0 }
 0x686   :  { %2322 = vadd.xlane.f32.xlu1 %v2321_v52 }
 0x70b   :  { %v9390_v53 = vpop.xlane.xlu0 %2319 }
 0x70f   :  { %v9392_v56 = vpop.xlane.xlu1 %2322 }
 0x710   :  { %8408 = dma.done.wait [#allocation4], 40960 }
 0x711   :  { %8409 = vsyncadd [#allocation4], 4294926336 }
 0x712   :  { %8410 = dma.done.wait [#allocation4 + $0x1], 12288 }
 0x713   :  { %8411 = vsyncadd [#allocation4 + $0x1], 4294955008  ;;  %2494 = vmatprep.mubr.bf16.mxu0 %v8424_v35  ;;  %2537 = vmatprep.mubr.bf16.mxu1 %v8424_v35  ;;  %v7655_v57 = vld [vmem:[#allocation2 + $0xe4] ss:$16 sps:$4 sm:$0xff]   ;;  %v7657_v58 = vld [vmem:[#allocation2 + $0xec] ss:$16 sps:$4 sm:$0xff]   ;;  %v2377_v10 = vpack.c.bf16 %v9362_v54, %v9358_v49  ;;  %v2360_v30 = vpack.c.bf16 %v9175_v17, %v9167_v12 }
 0x714   :  { %2470 = vmatprep.subr.bf16.mxu0 %v7655_v57  ;;  %v7659_v59 = vld [vmem:[#allocation2 + $0xe0] ss:$16 sps:$4 sm:$0xff]   ;;  %v7660_v60 = vld [vmem:[#allocation2 + $0xe8] ss:$16 sps:$4 sm:$0xff]   ;;  %2513 = vmatprep.subr.bf16.mxu1 %v7657_v58  ;;  %v7661_v61 = vld [vmem:[#allocation2 + $0xc4] ss:$16 sps:$4 sm:$0xff]  }
 0x715   :  { %2471 = vmatpush1.bf16.msra.mxu0 %v7659_v59  ;;  %2514 = vmatpush1.bf16.msra.mxu1 %v7660_v60  ;;  %v7663_v62 = vld [vmem:[#allocation2 + $0xcc] ss:$16 sps:$4 sm:$0xff]   ;;  %v7665_v63 = vld [vmem:[#allocation2 + $0xc0] ss:$16 sps:$4 sm:$0xff]   ;;  %v7666_v0 = vld [vmem:[#allocation2 + $0xc8] ss:$16 sps:$4 sm:$0xff]  }
 0x716   :  { %2472 = vmatprep.subr.bf16.mxu0 %v7661_v61  ;;  %2515 = vmatprep.subr.bf16.mxu1 %v7663_v62  ;;  %v7667_v1 = vld [vmem:[#allocation2 + $0xa4] ss:$16 sps:$4 sm:$0xff]   ;;  %v7669_v2 = vld [vmem:[#allocation2 + $0xac] ss:$16 sps:$4 sm:$0xff]   ;;  %v7671_v3 = vld [vmem:[#allocation2 + $0xa0] ss:$16 sps:$4 sm:$0xff]  }
 0x717   :  { %v7672_v4 = vld [vmem:[#allocation2 + $0xa8] ss:$16 sps:$4 sm:$0xff]   ;;  %v7673_v39 = vld [vmem:[#allocation2 + $0x84] ss:$16 sps:$4 sm:$0xff]   ;;  %v7675_v5 = vld [vmem:[#allocation2 + $0x8c] ss:$16 sps:$4 sm:$0xff]  }
 0x718   :  { %v7677_v6 = vld [vmem:[#allocation2 + $0x80] ss:$16 sps:$4 sm:$0xff]   ;;  %v7678_v7 = vld [vmem:[#allocation2 + $0x88] ss:$16 sps:$4 sm:$0xff]   ;;  %v7681_v8 = vld [vmem:[#allocation2 + $0x64] ss:$16 sps:$4 sm:$0xff]  }
 0x719   :  { %2473 = vmatpush1.bf16.msra.mxu0 %v7665_v63  ;;  %2516 = vmatpush1.bf16.msra.mxu1 %v7666_v0  ;;  %v7684_v9 = vld [vmem:[#allocation2 + $0x6c] ss:$16 sps:$4 sm:$0xff]   ;;  %v7679_v11 = vld [vmem:[#allocation2 + $0x60] ss:$16 sps:$4 sm:$0xff]   ;;  %v7682_v13 = vld [vmem:[#allocation2 + $0x68] ss:$16 sps:$4 sm:$0xff]  }
 0x71a   :  { %2474 = vmatprep.subr.bf16.mxu0 %v7667_v1  ;;  %2517 = vmatprep.subr.bf16.mxu1 %v7669_v2  ;;  %vm2458_vm3 = vcmask 523264   ;;  %v7687_v14 = vld [vmem:[#allocation2 + $0x44] ss:$16 sps:$4 sm:$0xff]   ;;  %v7690_v15 = vld [vmem:[#allocation2 + $0x4c] ss:$16 sps:$4 sm:$0xff]  }
 0x71b   :  { %v7685_v16 = vld [vmem:[#allocation2 + $0x40] ss:$16 sps:$4 sm:$0xff]   ;;  %v7688_v18 = vld [vmem:[#allocation2 + $0x48] ss:$16 sps:$4 sm:$0xff]   ;;  %v7693_v22 = vld [vmem:[#allocation2 + $0x24] ss:$16 sps:$4 sm:$0xff]  }
 0x71c   :  { %v7696_v49 = vld [vmem:[#allocation2 + $0x2c] ss:$16 sps:$4 sm:$0xff]   ;;  %v7691_v54 = vld [vmem:[#allocation2 + $0x20] ss:$16 sps:$4 sm:$0xff]   ;;  %v7694_v23 = vld [vmem:[#allocation2 + $0x28] ss:$16 sps:$4 sm:$0xff]  }
 0x71d   :  { %2475 = vmatpush1.bf16.msra.mxu0 %v7671_v3  ;;  %2518 = vmatpush1.bf16.msra.mxu1 %v7672_v4  ;;  %v7699_v24 = vld [vmem:[#allocation2 + $0x4] ss:$16 sps:$4 sm:$0xff]   ;;  %v7702_v25 = vld [vmem:[#allocation2 + $0xc] ss:$16 sps:$4 sm:$0xff]   ;;  %v7697_v26 = vld [vmem:[#allocation2] ss:$16 sps:$4 sm:$0xff]  }
 0x71e   :  { %2476 = vmatprep.subr.bf16.mxu0 %v7673_v39  ;;  %2519 = vmatprep.subr.bf16.mxu1 %v7675_v5  ;;  %v7700_v27 = vld [vmem:[#allocation2 + $0x8] ss:$16 sps:$4 sm:$0xff]   ;;  %v7705_v28 = vld [vmem:[#allocation2 + $0x1e4] ss:$16 sps:$4 sm:$0xff]   ;;  %v7703_v31 = vld [vmem:[#allocation2 + $0x1e0] ss:$16 sps:$4 sm:$0xff]  }
 0x71f   :  { %v7708_v29 = vld [vmem:[#allocation2 + $0x3e4] ss:$16 sps:$4 sm:$0xff]   ;;  %v7706_v41 = vld [vmem:[#allocation2 + $0x3e0] ss:$16 sps:$4 sm:$0xff]  }
 0x720   :  { %v7711_v44 = vld [vmem:[#allocation2 + $0x1c4] ss:$16 sps:$4 sm:$0xff]   ;;  %v7709_v51 = vld [vmem:[#allocation2 + $0x1c0] ss:$16 sps:$4 sm:$0xff]  }
 0x721   :  { %2477 = vmatpush1.bf16.msra.mxu0 %v7677_v6  ;;  %2520 = vmatpush1.bf16.msra.mxu1 %v7678_v7  ;;  %v7714_v47 = vld [vmem:[#allocation2 + $0x3c4] ss:$16 sps:$4 sm:$0xff]   ;;  %v7712_v52 = vld [vmem:[#allocation2 + $0x3c0] ss:$16 sps:$4 sm:$0xff]  }
 0x722   :  { %2639 = vmatprep.subr.bf16.mxu0 %v7681_v8  ;;  %2682 = vmatprep.subr.bf16.mxu1 %v7684_v9  ;;  %v7717_v57 = vld [vmem:[#allocation2 + $0x1a4] ss:$16 sps:$4 sm:$0xff]   ;;  %v7715_v17 = vld [vmem:[#allocation2 + $0x1a0] ss:$16 sps:$4 sm:$0xff]  }
 0x723   :  { %v7720_v12 = vld [vmem:[#allocation2 + $0x3a4] ss:$16 sps:$4 sm:$0xff]   ;;  %v7718_v58 = vld [vmem:[#allocation2 + $0x3a0] ss:$16 sps:$4 sm:$0xff]  }
 0x724   :  { %6709 = vmatmul.mubr.msk.bf16.vlgmr.msra.gmra.mxu0 %vm2458_vm3, %v2377_v10  ;;  %6710 = vmatmul.mubr.msk.bf16.vlgmr.msra.gmra.mxu1 %vm2458_vm3, %v2377_v10  ;;  %v7723_v59 = vld [vmem:[#allocation2 + $0x184] ss:$16 sps:$4 sm:$0xff]   ;;  %v7721_v61 = vld [vmem:[#allocation2 + $0x180] ss:$16 sps:$4 sm:$0xff]  }
 0x725   :  { %2640 = vmatpush1.bf16.msra.mxu0 %v7679_v11  ;;  %2683 = vmatpush1.bf16.msra.mxu1 %v7682_v13  ;;  %v7726_v60 = vld [vmem:[#allocation2 + $0x384] ss:$16 sps:$4 sm:$0xff]   ;;  %v7724_v62 = vld [vmem:[#allocation2 + $0x380] ss:$16 sps:$4 sm:$0xff]  }
 0x726   :  { %2641 = vmatprep.subr.bf16.mxu0 %v7687_v14  ;;  %2684 = vmatprep.subr.bf16.mxu1 %v7690_v15  ;;  %v7729_v63 = vld [vmem:[#allocation2 + $0x164] ss:$16 sps:$4 sm:$0xff]   ;;  %v7727_v1 = vld [vmem:[#allocation2 + $0x160] ss:$16 sps:$4 sm:$0xff]  }
 0x727   :  { %2663 = vmatprep.mubr.bf16.mxu0 %v8424_v35  ;;  %2706 = vmatprep.mubr.bf16.mxu1 %v8424_v35  ;;  %v7732_v0 = vld [vmem:[#allocation2 + $0x364] ss:$16 sps:$4 sm:$0xff]   ;;  %v7730_v2 = vld [vmem:[#allocation2 + $0x360] ss:$16 sps:$4 sm:$0xff]  }
 0x728   :  { %v7735_v3 = vld [vmem:[#allocation2 + $0x144] ss:$16 sps:$4 sm:$0xff]   ;;  %v7733_v39 = vld [vmem:[#allocation2 + $0x140] ss:$16 sps:$4 sm:$0xff]  }
 0x729   :  { %2642 = vmatpush1.bf16.msra.mxu0 %v7685_v16  ;;  %2685 = vmatpush1.bf16.msra.mxu1 %v7688_v18  ;;  %v7738_v4 = vld [vmem:[#allocation2 + $0x344] ss:$16 sps:$4 sm:$0xff]   ;;  %v7736_v5 = vld [vmem:[#allocation2 + $0x340] ss:$16 sps:$4 sm:$0xff]  }
 0x72a   :  { %2643 = vmatprep.subr.bf16.mxu0 %v7693_v22  ;;  %2686 = vmatprep.subr.bf16.mxu1 %v7696_v49  ;;  %v7741_v6 = vld [vmem:[#allocation2 + $0x124] ss:$16 sps:$4 sm:$0xff]   ;;  %v7739_v8 = vld [vmem:[#allocation2 + $0x120] ss:$16 sps:$4 sm:$0xff]  }
 0x72b   :  { %v7744_v7 = vld [vmem:[#allocation2 + $0x324] ss:$16 sps:$4 sm:$0xff]   ;;  %v7742_v9 = vld [vmem:[#allocation2 + $0x320] ss:$16 sps:$4 sm:$0xff]  }
 0x72c   :  { %v7747_v10 = vld [vmem:[#allocation2 + $0x104] ss:$16 sps:$4 sm:$0xff]   ;;  %v7745_v13 = vld [vmem:[#allocation2 + $0x100] ss:$16 sps:$4 sm:$0xff]  }
 0x72d   :  { %2644 = vmatpush1.bf16.msra.mxu0 %v7691_v54  ;;  %2687 = vmatpush1.bf16.msra.mxu1 %v7694_v23  ;;  %v7750_v11 = vld [vmem:[#allocation2 + $0x304] ss:$16 sps:$4 sm:$0xff]   ;;  %v7748_v14 = vld [vmem:[#allocation2 + $0x300] ss:$16 sps:$4 sm:$0xff]  }
 0x72e   :  { %2645 = vmatprep.subr.bf16.mxu0 %v7699_v24  ;;  %2688 = vmatprep.subr.bf16.mxu1 %v7702_v25  ;;  %v7753_v15 = vld [vmem:[#allocation2 + $0x2e4] ss:$16 sps:$4 sm:$0xff]   ;;  %v7751_v18 = vld [vmem:[#allocation2 + $0x2e0] ss:$16 sps:$4 sm:$0xff]  }
 0x72f   :  { %v7756_v16 = vld [vmem:[#allocation2 + $0x4e4] ss:$16 sps:$4 sm:$0xff]   ;;  %v7754_v22 = vld [vmem:[#allocation2 + $0x4e0] ss:$16 sps:$4 sm:$0xff]  }
 0x730   :  { %v7759_v49 = vld [vmem:[#allocation2 + $0x2c4] ss:$16 sps:$4 sm:$0xff]   ;;  %v7757_v23 = vld [vmem:[#allocation2 + $0x2c0] ss:$16 sps:$4 sm:$0xff]  }
 0x731   :  { %2646 = vmatpush1.bf16.msra.mxu0 %v7697_v26  ;;  %2689 = vmatpush1.bf16.msra.mxu1 %v7700_v27  ;;  %v7762_v54 = vld [vmem:[#allocation2 + $0x4c4] ss:$16 sps:$4 sm:$0xff]   ;;  %v7760_v24 = vld [vmem:[#allocation2 + $0x4c0] ss:$16 sps:$4 sm:$0xff]  }
 0x732   :  { %3551 = vmatprep.subr.bf16.mxu0 %v7705_v28  ;;  %3594 = vmatprep.subr.bf16.mxu1 %v7708_v29  ;;  %v7765_v25 = vld [vmem:[#allocation2 + $0x2a4] ss:$16 sps:$4 sm:$0xff]   ;;  %v7763_v27 = vld [vmem:[#allocation2 + $0x2a0] ss:$16 sps:$4 sm:$0xff]  }
 0x733   :  { %v7768_v26 = vld [vmem:[#allocation2 + $0x4a4] ss:$16 sps:$4 sm:$0xff]   ;;  %v7766_v28 = vld [vmem:[#allocation2 + $0x4a0] ss:$16 sps:$4 sm:$0xff]  }
 0x734   :  { %6727 = vmatmul.mubr.msk.bf16.vlgmr.msra.gmra.mxu0 %vm2458_vm3, %v2360_v30  ;;  %6728 = vmatmul.mubr.msk.bf16.vlgmr.msra.gmra.mxu1 %vm2458_vm3, %v2360_v30  ;;  %v7771_v29 = vld [vmem:[#allocation2 + $0x284] ss:$16 sps:$4 sm:$0xff]  }
 0x735   :  { %3552 = vmatpush1.bf16.msra.mxu0 %v7703_v31  ;;  %3595 = vmatpush1.bf16.msra.mxu1 %v7706_v41  ;;  %v7774_v30 = vld [vmem:[#allocation2 + $0x484] ss:$16 sps:$4 sm:$0xff]   ;;  %v7769_v31 = vld [vmem:[#allocation2 + $0x280] ss:$16 sps:$4 sm:$0xff]  }
 0x736   :  { %3553 = vmatprep.subr.bf16.mxu0 %v7711_v44  ;;  %3596 = vmatprep.subr.bf16.mxu1 %v7714_v47  ;;  %v7772_v41 = vld [vmem:[#allocation2 + $0x480] ss:$16 sps:$4 sm:$0xff]   ;;  %v7777_v44 = vld [vmem:[#allocation2 + $0x264] ss:$16 sps:$4 sm:$0xff]  }
 0x737   :  { %v7780_v47 = vld [vmem:[#allocation2 + $0x464] ss:$16 sps:$4 sm:$0xff]  }
 0x739   :  { %3554 = vmatpush1.bf16.msra.mxu0 %v7709_v51  ;;  %3597 = vmatpush1.bf16.msra.mxu1 %v7712_v52  ;;  %v7775_v51 = vld [vmem:[#allocation2 + $0x260] ss:$16 sps:$4 sm:$0xff]  }
 0x73a   :  { %3555 = vmatprep.subr.bf16.mxu0 %v7717_v57  ;;  %3598 = vmatprep.subr.bf16.mxu1 %v7720_v12  ;;  %v7778_v52 = vld [vmem:[#allocation2 + $0x460] ss:$16 sps:$4 sm:$0xff]   ;;  %v7783_v57 = vld [vmem:[#allocation2 + $0x244] ss:$16 sps:$4 sm:$0xff]  }
 0x73b   :  { %v7786_v12 = vld [vmem:[#allocation2 + $0x444] ss:$16 sps:$4 sm:$0xff]  }
 0x73d   :  { %3556 = vmatpush1.bf16.msra.mxu0 %v7715_v17  ;;  %3599 = vmatpush1.bf16.msra.mxu1 %v7718_v58  ;;  %v7781_v17 = vld [vmem:[#allocation2 + $0x240] ss:$16 sps:$4 sm:$0xff]  }
 0x73e   :  { %3557 = vmatprep.subr.bf16.mxu0 %v7723_v59  ;;  %3600 = vmatprep.subr.bf16.mxu1 %v7726_v60  ;;  %v7784_v58 = vld [vmem:[#allocation2 + $0x440] ss:$16 sps:$4 sm:$0xff]   ;;  %v7789_v59 = vld [vmem:[#allocation2 + $0x224] ss:$16 sps:$4 sm:$0xff]  }
 0x73f   :  { %v7792_v60 = vld [vmem:[#allocation2 + $0x424] ss:$16 sps:$4 sm:$0xff]  }
 0x741   :  { %3558 = vmatpush1.bf16.msra.mxu0 %v7721_v61  ;;  %3601 = vmatpush1.bf16.msra.mxu1 %v7724_v62  ;;  %v7787_v61 = vld [vmem:[#allocation2 + $0x220] ss:$16 sps:$4 sm:$0xff]  }
 0x742   :  { %3559 = vmatprep.subr.bf16.mxu0 %v7729_v63  ;;  %3602 = vmatprep.subr.bf16.mxu1 %v7732_v0  ;;  %v7790_v62 = vld [vmem:[#allocation2 + $0x420] ss:$16 sps:$4 sm:$0xff]   ;;  %v7795_v63 = vld [vmem:[#allocation2 + $0x204] ss:$16 sps:$4 sm:$0xff]  }
 0x743   :  { %v7798_v0 = vld [vmem:[#allocation2 + $0x404] ss:$16 sps:$4 sm:$0xff]  }
 0x745   :  { %3560 = vmatpush1.bf16.msra.mxu0 %v7727_v1  ;;  %3603 = vmatpush1.bf16.msra.mxu1 %v7730_v2  ;;  %v7793_v1 = vld [vmem:[#allocation2 + $0x200] ss:$16 sps:$4 sm:$0xff]  }
 0x746   :  { %3561 = vmatprep.subr.bf16.mxu0 %v7735_v3  ;;  %3604 = vmatprep.subr.bf16.mxu1 %v7738_v4  ;;  %v7796_v2 = vld [vmem:[#allocation2 + $0x400] ss:$16 sps:$4 sm:$0xff]   ;;  %v7801_v3 = vld [vmem:[#allocation2 + $0x1ec] ss:$16 sps:$4 sm:$0xff]  }
 0x747   :  { %v7804_v4 = vld [vmem:[#allocation2 + $0x3ec] ss:$16 sps:$4 sm:$0xff]  }
 0x749   :  { %3562 = vmatpush1.bf16.msra.mxu0 %v7733_v39  ;;  %3605 = vmatpush1.bf16.msra.mxu1 %v7736_v5 }
 0x74a   :  { %3563 = vmatprep.subr.bf16.mxu0 %v7741_v6  ;;  %3606 = vmatprep.subr.bf16.mxu1 %v7744_v7 }
 0x74d   :  { %3564 = vmatpush1.bf16.msra.mxu0 %v7739_v8  ;;  %3607 = vmatpush1.bf16.msra.mxu1 %v7742_v9  ;;  %v9407_v8 = vsub.s32 2, %v8946_v19  ;;  %v9410_v9 = vsub.s32 3, %v8946_v19 }
 0x74e   :  { %3565 = vmatprep.subr.bf16.mxu0 %v7747_v10  ;;  %3608 = vmatprep.subr.bf16.mxu1 %v7750_v11 }
 0x751   :  { %3566 = vmatpush1.bf16.msra.mxu0 %v7745_v13  ;;  %3609 = vmatpush1.bf16.msra.mxu1 %v7748_v14  ;;  %v2718_v13 = vld [vmem:[#allocation13 + $0x24] ss:$8 sm:$0xf] }
 0x752   :  { %3567 = vmatprep.subr.bf16.mxu0 %v7753_v15  ;;  %3610 = vmatprep.subr.bf16.mxu1 %v7756_v16  ;;  %v2723_v16 = vrot.slane %v2718_v13, %v8952_v21 }
 0x755   :  { %3568 = vmatpush2.bf16.msra.mxu0 %v7751_v18  ;;  %3611 = vmatpush2.bf16.msra.mxu1 %v7754_v22  ;;  %v2731_v18 = vrot.slane %v2718_v13, %v9407_v8 }
 0x756   :  { %3569 = vmatprep.subr.bf16.mxu0 %v7759_v49  ;;  %3612 = vmatprep.subr.bf16.mxu1 %v7762_v54 }
 0x759   :  { %3570 = vmatpush2.bf16.msra.mxu0 %v7757_v23  ;;  %3613 = vmatpush2.bf16.msra.mxu1 %v7760_v24  ;;  %v2727_v24 = vrot.slane %v2718_v13, %v8949_v20 }
 0x75a   :  { %3571 = vmatprep.subr.bf16.mxu0 %v7765_v25  ;;  %3614 = vmatprep.subr.bf16.mxu1 %v7768_v26  ;;  %v2735_v25 = vrot.slane %v2718_v13, %v9410_v9  ;;  %v7799_v13 = vld [vmem:[#allocation2 + $0x1e8] ss:$16 sps:$4 sm:$0xff]  }
 0x75d   :  { %3572 = vmatpush2.bf16.msra.mxu0 %v7763_v27  ;;  %3615 = vmatpush2.bf16.msra.mxu1 %v7766_v28 }
 0x75e   :  { %3573 = vmatprep.subr.bf16.mxu0 %v7771_v29  ;;  %3616 = vmatprep.subr.bf16.mxu1 %v7774_v30 }
 0x761   :  { %3574 = vmatpush2.bf16.msra.mxu0 %v7769_v31  ;;  %3617 = vmatpush2.bf16.msra.mxu1 %v7772_v41 }
 0x762   :  { %3575 = vmatprep.subr.bf16.mxu0 %v7777_v44  ;;  %3618 = vmatprep.subr.bf16.mxu1 %v7780_v47 }
 0x765   :  { %3576 = vmatpush2.bf16.msra.mxu0 %v7775_v51  ;;  %3619 = vmatpush2.bf16.msra.mxu1 %v7778_v52 }
 0x766   :  { %3577 = vmatprep.subr.bf16.mxu0 %v7783_v57  ;;  %3620 = vmatprep.subr.bf16.mxu1 %v7786_v12 }
 0x769   :  { %3578 = vmatpush2.bf16.msra.mxu0 %v7781_v17  ;;  %3621 = vmatpush2.bf16.msra.mxu1 %v7784_v58 }
 0x76a   :  { %3579 = vmatprep.subr.bf16.mxu0 %v7789_v59  ;;  %3622 = vmatprep.subr.bf16.mxu1 %v7792_v60 }
 0x76d   :  { %3580 = vmatpush2.bf16.msra.mxu0 %v7787_v61  ;;  %3623 = vmatpush2.bf16.msra.mxu1 %v7790_v62 }
 0x76e   :  { %3581 = vmatprep.subr.bf16.mxu0 %v7795_v63  ;;  %3624 = vmatprep.subr.bf16.mxu1 %v7798_v0 }
 0x771   :  { %3582 = vmatpush2.bf16.msra.mxu0 %v7793_v1  ;;  %3625 = vmatpush2.bf16.msra.mxu1 %v7796_v2 }
 0x772   :  { %3637 = vmatprep.subr.bf16.mxu0 %v7801_v3  ;;  %3680 = vmatprep.subr.bf16.mxu1 %v7804_v4 }
 0x7e4   :  { %v2496_v39 = vpop.f32.mrf.mxu0  ;;  %v2539_v5 = vpop.f32.mrf.mxu1 }
 0x7e6   :  { %v2498_v6 = vpop.f32.mrf.mxu0  ;;  %v2541_v7 = vpop.f32.mrf.mxu1 }
 0x7e8   :  { %v2500_v10 = vpop.f32.mrf.mxu0  ;;  %v2543_v11 = vpop.f32.mrf.mxu1 }
 0x7ea   :  { %v2502_v14 = vpop.f32.mrf.mxu0  ;;  %v2545_v15 = vpop.f32.mrf.mxu1 }
 0x7f4   :  { %v2665_v22 = vpop.f32.mrf.mxu0  ;;  %v2708_v49 = vpop.f32.mrf.mxu1 }
 0x7f5   :  { %v2666_v54 = vadd.f32 %v2665_v22, %v2496_v39  ;;  %v2709_v23 = vadd.f32 %v2708_v49, %v2539_v5  ;;  %v7802_v22 = vld [vmem:[#allocation2 + $0x3e8] ss:$16 sps:$4 sm:$0xff]   ;;  %v7813_v49 = vld [vmem:[#allocation2 + $0x1ac] ss:$16 sps:$4 sm:$0xff]  }
 0x7f6   :  { %v2667_v26 = vpop.f32.mrf.mxu0  ;;  %v2710_v19 = vpop.f32.mrf.mxu1 }
 0x7f7   :  { %v2740_v27 = vadd.f32 %v2723_v16, %v2666_v54  ;;  %v2742_v28 = vadd.f32 %v2731_v18, %v2709_v23  ;;  %v2668_v29 = vadd.f32 %v2667_v26, %v2498_v6  ;;  %v2711_v30 = vadd.f32 %v2710_v19, %v2541_v7  ;;  %v7816_v54 = vld [vmem:[#allocation2 + $0x3ac] ss:$16 sps:$4 sm:$0xff]   ;;  %v7811_v23 = vld [vmem:[#allocation2 + $0x1a8] ss:$16 sps:$4 sm:$0xff]  }
 0x7f8   :  { %v2669_v31 = vpop.f32.mrf.mxu0  ;;  %v2712_v41 = vpop.f32.mrf.mxu1  ;;  %v7822_v26 = vld [vmem:[#allocation2 + $0x38c] ss:$16 sps:$4 sm:$0xff]   ;;  %v7817_v19 = vld [vmem:[#allocation2 + $0x188] ss:$16 sps:$4 sm:$0xff]  }
 0x7f9   :  { %v2748_v44 = vmax.f32 %v2740_v27, 0.0  ;;  %v2750_v47 = vmax.f32 %v2742_v28, 0.0  ;;  %v2741_v51 = vadd.f32 %v2727_v24, %v2668_v29  ;;  %v2743_v52 = vadd.f32 %v2735_v25, %v2711_v30  ;;  %v7820_v27 = vld [vmem:[#allocation2 + $0x388] ss:$16 sps:$4 sm:$0xff]   ;;  %v7825_v28 = vld [vmem:[#allocation2 + $0x16c] ss:$16 sps:$4 sm:$0xff]  }
 0x7fa   :  { %v2670_v57 = vadd.f32 %v2669_v31, %v2500_v10  ;;  %v2713_v12 = vadd.f32 %v2712_v41, %v2543_v11  ;;  %v2671_v17 = vpop.f32.mrf.mxu0  ;;  %v2714_v58 = vpop.f32.mrf.mxu1  ;;  %v7828_v29 = vld [vmem:[#allocation2 + $0x36c] ss:$16 sps:$4 sm:$0xff]   ;;  %v7823_v30 = vld [vmem:[#allocation2 + $0x168] ss:$16 sps:$4 sm:$0xff]  }
 0x7fb   :  { %v2749_v59 = vmax.f32 %v2741_v51, 0.0  ;;  %v2751_v60 = vmax.f32 %v2743_v52, 0.0  ;;  %v2672_v61 = vadd.f32 %v2671_v17, %v2502_v14  ;;  %v2715_v62 = vadd.f32 %v2714_v58, %v2545_v15  ;;  %v7807_v14 = vld [vmem:[#allocation2 + $0x1cc] ss:$16 sps:$4 sm:$0xff]   ;;  %v7826_v31 = vld [vmem:[#allocation2 + $0x368] ss:$16 sps:$4 sm:$0xff]  }
 0x7fc   :  { %v2744_v63 = vadd.f32 %v2723_v16, %v2670_v57  ;;  %v2746_v0 = vadd.f32 %v2731_v18, %v2713_v12  ;;  %v7810_v15 = vld [vmem:[#allocation2 + $0x3cc] ss:$16 sps:$4 sm:$0xff]   ;;  %v7805_v16 = vld [vmem:[#allocation2 + $0x1c8] ss:$16 sps:$4 sm:$0xff]  }
 0x7fd   :  { %v2745_v1 = vadd.f32 %v2727_v24, %v2672_v61  ;;  %v2747_v2 = vadd.f32 %v2735_v25, %v2715_v62  ;;  %v7808_v18 = vld [vmem:[#allocation2 + $0x3c8] ss:$16 sps:$4 sm:$0xff]   ;;  %v7819_v25 = vld [vmem:[#allocation2 + $0x18c] ss:$16 sps:$4 sm:$0xff]  }
 0x7fe   :  { %v2752_v3 = vmax.f32 %v2744_v63, 0.0  ;;  %v2754_v4 = vmax.f32 %v2746_v0, 0.0  ;;  %v7814_v24 = vld [vmem:[#allocation2 + $0x3a8] ss:$16 sps:$4 sm:$0xff]   ;;  %v7831_v41 = vld [vmem:[#allocation2 + $0x14c] ss:$16 sps:$4 sm:$0xff]  }
 0x7ff   :  { %v2753_v39 = vmax.f32 %v2745_v1, 0.0  ;;  %v2755_v5 = vmax.f32 %v2747_v2, 0.0  ;;  %v7832_v51 = vld [vmem:[#allocation2 + $0x348] ss:$16 sps:$4 sm:$0xff]   ;;  %v7837_v52 = vld [vmem:[#allocation2 + $0x12c] ss:$16 sps:$4 sm:$0xff]  }
 0x800   :  { %v9416_v10 = vpack.c.bf16 %v2752_v3, %v2748_v44  ;;  %v9418_v11 = vpack.c.bf16 %v2754_v4, %v2750_v47  ;;  %v7834_v44 = vld [vmem:[#allocation2 + $0x34c] ss:$16 sps:$4 sm:$0xff]   ;;  %v7829_v47 = vld [vmem:[#allocation2 + $0x148] ss:$16 sps:$4 sm:$0xff]  }
 0x801   :  { %v2885_v6 = vpack.c.bf16 %v2753_v39, %v2749_v59  ;;  %v2887_v7 = vpack.c.bf16 %v2755_v5, %v2751_v60  ;;  %v7840_v57 = vld [vmem:[#allocation2 + $0x32c] ss:$16 sps:$4 sm:$0xff]   ;;  %v7835_v12 = vld [vmem:[#allocation2 + $0x128] ss:$16 sps:$4 sm:$0xff]  }
 0x802   :  { %v7838_v17 = vld [vmem:[#allocation2 + $0x328] ss:$16 sps:$4 sm:$0xff]   ;;  %v7843_v58 = vld [vmem:[#allocation2 + $0x10c] ss:$16 sps:$4 sm:$0xff]  }
 0x803   :  { %3583 = vmatprep.mubr.bf16.mxu0 %v2885_v6  ;;  %3626 = vmatprep.mubr.bf16.mxu1 %v2887_v7  ;;  %v7846_v59 = vld [vmem:[#allocation2 + $0x30c] ss:$16 sps:$4 sm:$0xff]   ;;  %v7841_v60 = vld [vmem:[#allocation2 + $0x108] ss:$16 sps:$4 sm:$0xff]  }
 0x804   :  { %3584 = vmatmul.mubr.bf16.vlgmr.msra.gmra.mxu0 %v9416_v10  ;;  %3627 = vmatmul.mubr.bf16.vlgmr.msra.gmra.mxu1 %v9418_v11  ;;  %v7844_v61 = vld [vmem:[#allocation2 + $0x308] ss:$16 sps:$4 sm:$0xff]   ;;  %v7849_v62 = vld [vmem:[#allocation2 + $0x2ec] ss:$16 sps:$4 sm:$0xff]  }
 0x805   :  { %3638 = vmatpush1.bf16.msra.mxu0 %v7799_v13  ;;  %3681 = vmatpush1.bf16.msra.mxu1 %v7802_v22  ;;  %v7852_v63 = vld [vmem:[#allocation2 + $0x4ec] ss:$16 sps:$4 sm:$0xff]   ;;  %v7847_v0 = vld [vmem:[#allocation2 + $0x2e8] ss:$16 sps:$4 sm:$0xff]  }
 0x806   :  { %3669 = vmatprep.mubr.bf16.mxu0 %v2885_v6  ;;  %3712 = vmatprep.mubr.bf16.mxu1 %v2887_v7  ;;  %v7850_v1 = vld [vmem:[#allocation2 + $0x4e8] ss:$16 sps:$4 sm:$0xff]   ;;  %v7855_v2 = vld [vmem:[#allocation2 + $0x2cc] ss:$16 sps:$4 sm:$0xff]  }
 0x807   :  { %3639 = vmatprep.subr.bf16.mxu0 %v7807_v14  ;;  %3682 = vmatprep.subr.bf16.mxu1 %v7810_v15  ;;  %v7858_v3 = vld [vmem:[#allocation2 + $0x4cc] ss:$16 sps:$4 sm:$0xff]   ;;  %v7853_v4 = vld [vmem:[#allocation2 + $0x2c8] ss:$16 sps:$4 sm:$0xff]  }
 0x808   :  { %v7856_v39 = vld [vmem:[#allocation2 + $0x4c8] ss:$16 sps:$4 sm:$0xff]   ;;  %v7861_v5 = vld [vmem:[#allocation2 + $0x2ac] ss:$16 sps:$4 sm:$0xff]  }
 0x809   :  { %3640 = vmatpush1.bf16.msra.mxu0 %v7805_v16  ;;  %3683 = vmatpush1.bf16.msra.mxu1 %v7808_v18  ;;  %v7864_v6 = vld [vmem:[#allocation2 + $0x4ac] ss:$16 sps:$4 sm:$0xff]   ;;  %v7859_v7 = vld [vmem:[#allocation2 + $0x2a8] ss:$16 sps:$4 sm:$0xff]  }
 0x80a   :  { %3641 = vmatprep.subr.bf16.mxu0 %v7813_v49  ;;  %3684 = vmatprep.subr.bf16.mxu1 %v7816_v54  ;;  %v7862_v13 = vld [vmem:[#allocation2 + $0x4a8] ss:$16 sps:$4 sm:$0xff]   ;;  %v7867_v22 = vld [vmem:[#allocation2 + $0x28c] ss:$16 sps:$4 sm:$0xff]  }
 0x80b   :  { %v7870_v14 = vld [vmem:[#allocation2 + $0x48c] ss:$16 sps:$4 sm:$0xff]   ;;  %v7865_v15 = vld [vmem:[#allocation2 + $0x288] ss:$16 sps:$4 sm:$0xff]  }
 0x80c   :  { %v7868_v16 = vld [vmem:[#allocation2 + $0x488] ss:$16 sps:$4 sm:$0xff]   ;;  %v7873_v18 = vld [vmem:[#allocation2 + $0x26c] ss:$16 sps:$4 sm:$0xff]  }
 0x80d   :  { %3642 = vmatpush1.bf16.msra.mxu0 %v7811_v23  ;;  %3685 = vmatpush1.bf16.msra.mxu1 %v7814_v24  ;;  %v7876_v49 = vld [vmem:[#allocation2 + $0x46c] ss:$16 sps:$4 sm:$0xff]   ;;  %v7871_v54 = vld [vmem:[#allocation2 + $0x268] ss:$16 sps:$4 sm:$0xff]  }
 0x80e   :  { %3643 = vmatprep.subr.bf16.mxu0 %v7819_v25  ;;  %3686 = vmatprep.subr.bf16.mxu1 %v7822_v26  ;;  %v7874_v23 = vld [vmem:[#allocation2 + $0x468] ss:$16 sps:$4 sm:$0xff]   ;;  %v7879_v24 = vld [vmem:[#allocation2 + $0x24c] ss:$16 sps:$4 sm:$0xff]  }
 0x80f   :  { %v7882_v25 = vld [vmem:[#allocation2 + $0x44c] ss:$16 sps:$4 sm:$0xff]   ;;  %v7877_v26 = vld [vmem:[#allocation2 + $0x248] ss:$16 sps:$4 sm:$0xff]  }
 0x811   :  { %3644 = vmatpush1.bf16.msra.mxu0 %v7817_v19  ;;  %3687 = vmatpush1.bf16.msra.mxu1 %v7820_v27  ;;  %v7880_v19 = vld [vmem:[#allocation2 + $0x448] ss:$16 sps:$4 sm:$0xff]   ;;  %v7885_v27 = vld [vmem:[#allocation2 + $0x22c] ss:$16 sps:$4 sm:$0xff]  }
 0x812   :  { %3645 = vmatprep.subr.bf16.mxu0 %v7825_v28  ;;  %3688 = vmatprep.subr.bf16.mxu1 %v7828_v29  ;;  %v7888_v28 = vld [vmem:[#allocation2 + $0x42c] ss:$16 sps:$4 sm:$0xff]   ;;  %v7883_v29 = vld [vmem:[#allocation2 + $0x228] ss:$16 sps:$4 sm:$0xff]  }
 0x815   :  { %3646 = vmatpush1.bf16.msra.mxu0 %v7823_v30  ;;  %3689 = vmatpush1.bf16.msra.mxu1 %v7826_v31  ;;  %v7886_v30 = vld [vmem:[#allocation2 + $0x428] ss:$16 sps:$4 sm:$0xff]   ;;  %v7891_v31 = vld [vmem:[#allocation2 + $0x20c] ss:$16 sps:$4 sm:$0xff]  }
 0x816   :  { %3647 = vmatprep.subr.bf16.mxu0 %v7831_v41  ;;  %3690 = vmatprep.subr.bf16.mxu1 %v7834_v44  ;;  %v7894_v41 = vld [vmem:[#allocation2 + $0x40c] ss:$16 sps:$4 sm:$0xff]   ;;  %v7889_v44 = vld [vmem:[#allocation2 + $0x208] ss:$16 sps:$4 sm:$0xff]  }
 0x819   :  { %3648 = vmatpush1.bf16.msra.mxu0 %v7829_v47  ;;  %3691 = vmatpush1.bf16.msra.mxu1 %v7832_v51  ;;  %v7892_v47 = vld [vmem:[#allocation2 + $0x408] ss:$16 sps:$4 sm:$0xff]  }
 0x81a   :  { %3649 = vmatprep.subr.bf16.mxu0 %v7837_v52  ;;  %3692 = vmatprep.subr.bf16.mxu1 %v7840_v57  ;;  %v7895_v51 = vld [vmem:[#allocation3 + $0x78] sm:$0xff]   ;;  %v7897_v57 = vld [vmem:[#allocation3 + $0x70] sm:$0xff]  }
 0x81b   :  { %v7896_v52 = vld [vmem:[#allocation3 + $0x38] sm:$0xff]  }
 0x81d   :  { %3650 = vmatpush1.bf16.msra.mxu0 %v7835_v12  ;;  %3693 = vmatpush1.bf16.msra.mxu1 %v7838_v17  ;;  %v7898_v12 = vld [vmem:[#allocation3 + $0x30] sm:$0xff]   ;;  %v7899_v17 = vld [vmem:[#allocation3 + $0x68] sm:$0xff]  }
 0x81e   :  { %3651 = vmatprep.subr.bf16.mxu0 %v7843_v58  ;;  %3694 = vmatprep.subr.bf16.mxu1 %v7846_v59  ;;  %v7900_v58 = vld [vmem:[#allocation3 + $0x28] sm:$0xff]   ;;  %v7901_v59 = vld [vmem:[#allocation3 + $0x60] sm:$0xff]  }
 0x821   :  { %3652 = vmatpush1.bf16.msra.mxu0 %v7841_v60  ;;  %3695 = vmatpush1.bf16.msra.mxu1 %v7844_v61  ;;  %v7902_v60 = vld [vmem:[#allocation3 + $0x20] sm:$0xff]   ;;  %v7903_v61 = vld [vmem:[#allocation3 + $0x58] sm:$0xff]  }
 0x822   :  { %3653 = vmatprep.subr.bf16.mxu0 %v7849_v62  ;;  %3696 = vmatprep.subr.bf16.mxu1 %v7852_v63  ;;  %v7904_v62 = vld [vmem:[#allocation3 + $0x18] sm:$0xff]   ;;  %v7905_v63 = vld [vmem:[#allocation3 + $0x50] sm:$0xff]  }
 0x825   :  { %3654 = vmatpush2.bf16.msra.mxu0 %v7847_v0  ;;  %3697 = vmatpush2.bf16.msra.mxu1 %v7850_v1  ;;  %v7908_v0 = vld [vmem:[#allocation3 + $0x8] sm:$0xff]   ;;  %v7909_v1 = vld [vmem:[#allocation3 + $0x40] sm:$0xff]  }
 0x826   :  { %3655 = vmatprep.subr.bf16.mxu0 %v7855_v2  ;;  %3698 = vmatprep.subr.bf16.mxu1 %v7858_v3  ;;  %v7910_v2 = vld [vmem:[#allocation3] sm:$0xff]   ;;  %v7911_v3 = vld [vmem:[#allocation3 + $0x178] sm:$0xff]  }
 0x829   :  { %3656 = vmatpush2.bf16.msra.mxu0 %v7853_v4  ;;  %3699 = vmatpush2.bf16.msra.mxu1 %v7856_v39  ;;  %v7927_v4 = vld [vmem:[#allocation3 + $0xf8] sm:$0xff]  }
 0x82a   :  { %3657 = vmatprep.subr.bf16.mxu0 %v7861_v5  ;;  %3700 = vmatprep.subr.bf16.mxu1 %v7864_v6  ;;  %v7928_v39 = vld [vmem:[#allocation3 + $0xb8] sm:$0xff]   ;;  %v7929_v5 = vld [vmem:[#allocation3 + $0xf0] sm:$0xff]  }
 0x82b   :  { %v7930_v6 = vld [vmem:[#allocation3 + $0xb0] sm:$0xff]  }
 0x82d   :  { %3658 = vmatpush2.bf16.msra.mxu0 %v7859_v7  ;;  %3701 = vmatpush2.bf16.msra.mxu1 %v7862_v13  ;;  %v7931_v7 = vld [vmem:[#allocation3 + $0xe8] sm:$0xff]  }
 0x82e   :  { %3659 = vmatprep.subr.bf16.mxu0 %v7867_v22  ;;  %3702 = vmatprep.subr.bf16.mxu1 %v7870_v14  ;;  %v7932_v13 = vld [vmem:[#allocation3 + $0xa8] sm:$0xff]   ;;  %v7933_v22 = vld [vmem:[#allocation3 + $0xe0] sm:$0xff]  }
 0x82f   :  { %v7934_v14 = vld [vmem:[#allocation3 + $0xa0] sm:$0xff]  }
 0x831   :  { %3660 = vmatpush2.bf16.msra.mxu0 %v7865_v15  ;;  %3703 = vmatpush2.bf16.msra.mxu1 %v7868_v16  ;;  %v7935_v15 = vld [vmem:[#allocation3 + $0xd8] sm:$0xff]  }
 0x832   :  { %3661 = vmatprep.subr.bf16.mxu0 %v7873_v18  ;;  %3704 = vmatprep.subr.bf16.mxu1 %v7876_v49  ;;  %v7936_v16 = vld [vmem:[#allocation3 + $0x98] sm:$0xff]   ;;  %v7937_v18 = vld [vmem:[#allocation3 + $0xd0] sm:$0xff]  }
 0x833   :  { %v7938_v49 = vld [vmem:[#allocation3 + $0x90] sm:$0xff]  }
 0x835   :  { %3662 = vmatpush2.bf16.msra.mxu0 %v7871_v54  ;;  %3705 = vmatpush2.bf16.msra.mxu1 %v7874_v23  ;;  %v7939_v54 = vld [vmem:[#allocation3 + $0xc8] sm:$0xff]  }
 0x836   :  { %3663 = vmatprep.subr.bf16.mxu0 %v7879_v24  ;;  %3706 = vmatprep.subr.bf16.mxu1 %v7882_v25  ;;  %v7940_v23 = vld [vmem:[#allocation3 + $0x88] sm:$0xff]   ;;  %v7941_v24 = vld [vmem:[#allocation3 + $0xc0] sm:$0xff]  }
 0x837   :  { %v7942_v25 = vld [vmem:[#allocation3 + $0x80] sm:$0xff]  }
 0x839   :  { %3664 = vmatpush2.bf16.msra.mxu0 %v7877_v26  ;;  %3707 = vmatpush2.bf16.msra.mxu1 %v7880_v19  ;;  %v7943_v26 = vld [vmem:[#allocation3 + $0x1f8] sm:$0xff]  }
 0x83a   :  { %3665 = vmatprep.subr.bf16.mxu0 %v7885_v27  ;;  %3708 = vmatprep.subr.bf16.mxu1 %v7888_v28  ;;  %v2889_v19 = vld [vmem:[#allocation13 + $0x25] ss:$8 sm:$0xf] }
 0x83b   :  { %v2898_v27 = vrot.slane %v2889_v19, %v8949_v20  ;;  %v2894_v28 = vrot.slane %v2889_v19, %v8952_v21 }
 0x83d   :  { %3666 = vmatpush2.bf16.msra.mxu0 %v7883_v29  ;;  %3709 = vmatpush2.bf16.msra.mxu1 %v7886_v30 }
 0x83e   :  { %3667 = vmatprep.subr.bf16.mxu0 %v7891_v31  ;;  %3710 = vmatprep.subr.bf16.mxu1 %v7894_v41 }
 0x841   :  { %3668 = vmatpush2.bf16.msra.mxu0 %v7889_v44  ;;  %3711 = vmatpush2.bf16.msra.mxu1 %v7892_v47 }
 0x842   :  { %7270 = vmatprep.subr.bf16.mxu0 %v7895_v51  ;;  %7292 = vmatprep.subr.bf16.mxu1 %v7927_v4  ;;  %v7913_v4 = vld [vmem:[#allocation3 + $0x170] sm:$0xff]  }
 0x844   :  { %3670 = vmatmul.mubr.bf16.vlgmr.msra.gmra.mxu0 %v9416_v10  ;;  %3713 = vmatmul.mubr.bf16.vlgmr.msra.gmra.mxu1 %v9418_v11  ;;  %v7906_v10 = vld [vmem:[#allocation3 + $0x10] sm:$0xff]   ;;  %v7907_v11 = vld [vmem:[#allocation3 + $0x48] sm:$0xff]  }
 0x845   :  { %7271 = vmatpush3.bf16.msra.mxu0 %v7896_v52  ;;  %7293 = vmatpush3.bf16.msra.mxu1 %v7928_v39  ;;  %v7914_v39 = vld [vmem:[#allocation3 + $0x130] sm:$0xff]  }
 0x846   :  { %7272 = vmatprep.subr.bf16.mxu0 %v7897_v57  ;;  %7294 = vmatprep.subr.bf16.mxu1 %v7929_v5  ;;  %v7915_v5 = vld [vmem:[#allocation3 + $0x168] sm:$0xff]  }
 0x849   :  { %7273 = vmatpush3.bf16.msra.mxu0 %v7898_v12  ;;  %7295 = vmatpush3.bf16.msra.mxu1 %v7930_v6  ;;  %v7916_v6 = vld [vmem:[#allocation3 + $0x128] sm:$0xff]  }
 0x84a   :  { %7274 = vmatprep.subr.bf16.mxu0 %v7899_v17  ;;  %7296 = vmatprep.subr.bf16.mxu1 %v7931_v7  ;;  %v7917_v7 = vld [vmem:[#allocation3 + $0x160] sm:$0xff]  }
 0x84d   :  { %7275 = vmatpush3.bf16.msra.mxu0 %v7900_v58  ;;  %7297 = vmatpush3.bf16.msra.mxu1 %v7932_v13  ;;  %v7918_v13 = vld [vmem:[#allocation3 + $0x120] sm:$0xff]  }
 0x84e   :  { %7276 = vmatprep.subr.bf16.mxu0 %v7901_v59  ;;  %7298 = vmatprep.subr.bf16.mxu1 %v7933_v22  ;;  %v7919_v22 = vld [vmem:[#allocation3 + $0x158] sm:$0xff]  }
 0x851   :  { %7277 = vmatpush3.bf16.msra.mxu0 %v7902_v60  ;;  %7299 = vmatpush3.bf16.msra.mxu1 %v7934_v14  ;;  %v7920_v14 = vld [vmem:[#allocation3 + $0x118] sm:$0xff]  }
 0x852   :  { %7278 = vmatprep.subr.bf16.mxu0 %v7903_v61  ;;  %7300 = vmatprep.subr.bf16.mxu1 %v7935_v15  ;;  %v7921_v15 = vld [vmem:[#allocation3 + $0x150] sm:$0xff]  }
 0x855   :  { %7279 = vmatpush3.bf16.msra.mxu0 %v7904_v62  ;;  %7301 = vmatpush3.bf16.msra.mxu1 %v7936_v16  ;;  %v7922_v16 = vld [vmem:[#allocation3 + $0x110] sm:$0xff]  }
 0x856   :  { %7280 = vmatprep.subr.bf16.mxu0 %v7905_v63  ;;  %7302 = vmatprep.subr.bf16.mxu1 %v7937_v18  ;;  %v7923_v18 = vld [vmem:[#allocation3 + $0x148] sm:$0xff]  }
 0x859   :  { %7281 = vmatpush3.bf16.msra.mxu0 %v7906_v10  ;;  %7303 = vmatpush3.bf16.msra.mxu1 %v7938_v49  ;;  %v7924_v49 = vld [vmem:[#allocation3 + $0x108] sm:$0xff]  }
 0x85a   :  { %7282 = vmatprep.subr.bf16.mxu0 %v7907_v11  ;;  %7304 = vmatprep.subr.bf16.mxu1 %v7939_v54  ;;  %v7925_v54 = vld [vmem:[#allocation3 + $0x140] sm:$0xff]  }
 0x85d   :  { %7283 = vmatpush3.bf16.msra.mxu0 %v7908_v0  ;;  %7305 = vmatpush3.bf16.msra.mxu1 %v7940_v23  ;;  %v7926_v23 = vld [vmem:[#allocation3 + $0x100] sm:$0xff]  }
 0x85e   :  { %7284 = vmatprep.subr.bf16.mxu0 %v7909_v1  ;;  %7306 = vmatprep.subr.bf16.mxu1 %v7941_v24  ;;  %v2906_v24 = vrot.slane %v2889_v19, %v9410_v9 }
 0x861   :  { %7285 = vmatpush3.bf16.msra.mxu0 %v7910_v2  ;;  %7307 = vmatpush3.bf16.msra.mxu1 %v7942_v25  ;;  %v7912_v2 = vld [vmem:[#allocation3 + $0x138] sm:$0xff]   ;;  %v2902_v25 = vrot.slane %v2889_v19, %v9407_v8 }
 0x862   :  { %7314 = vmatprep.subr.bf16.mxu0 %v7911_v3  ;;  %7336 = vmatprep.subr.bf16.mxu1 %v7943_v26 }
 0x8c4   :  { %v3585_v29 = vpop.f32.mrf.mxu0  ;;  %v3628_v30 = vpop.f32.mrf.mxu1 }
 0x8c5   :  { %v3586_v47 = vadd.f32 %v3585_v29, %v2894_v28 }
 0x8c6   :  { %v3587_v31 = vpop.f32.mrf.mxu0  ;;  %v3630_v41 = vpop.f32.mrf.mxu1 }
 0x8c7   :  { %v3588_v44 = vadd.f32 %v3587_v31, %v2898_v27  ;;  %v3629_v60 = vadd.f32 %v3628_v30, %v3586_v47 }
 0x8c8   :  { %v3589_v51 = vpop.f32.mrf.mxu0  ;;  %v3632_v52 = vpop.f32.mrf.mxu1 }
 0x8c9   :  { %v3590_v57 = vadd.f32 %v3589_v51, %v2894_v28  ;;  %v3631_v17 = vadd.f32 %v3630_v41, %v3588_v44  ;;  %v3723_v0 = vmax.f32 %v3629_v60, 0.0 }
 0x8ca   :  { %v3591_v12 = vpop.f32.mrf.mxu0  ;;  %v3634_v61 = vpop.f32.mrf.mxu1 }
 0x8cb   :  { %v3633_v58 = vadd.f32 %v3632_v52, %v3590_v57  ;;  %v3592_v59 = vadd.f32 %v3591_v12, %v2898_v27  ;;  %v3724_v10 = vmax.f32 %v3631_v17, 0.0 }
 0x8cd   :  { %v3635_v62 = vadd.f32 %v3634_v61, %v3592_v59  ;;  %v3727_v63 = vmax.f32 %v3633_v58, 0.0 }
 0x8cf   :  { %v3728_v11 = vmax.f32 %v3635_v62, 0.0  ;;  %v3795_v3 = vpack.c.bf16 %v3727_v63, %v3723_v0  ;;  %v7945_v0 = vld [vmem:[#allocation3 + $0x1f0] sm:$0xff]  }
 0x8d1   :  { %v3796_v1 = vpack.c.bf16 %v3728_v11, %v3724_v10  ;;  %v7944_v10 = vld [vmem:[#allocation3 + $0x1b8] sm:$0xff]  }
 0x8d3   :  { %4024 = vmatprep.mubr.bf16.mxu0 %v3796_v1 }
 0x8d4   :  { %4025 = vmatmul.mubr.bf16.vlgmr.msra.gmra.mxu0 %v3795_v3 }
 0x8d5   :  { %7315 = vmatpush3.bf16.msra.mxu0 %v7912_v2  ;;  %4363 = vmatprep.mubr.bf16.mxu0 %v3796_v1  ;;  %v7946_v1 = vld [vmem:[#allocation3 + $0x1b0] sm:$0xff]   ;;  %v7947_v2 = vld [vmem:[#allocation3 + $0x1e8] sm:$0xff]  }
 0x8d6   :  { %7316 = vmatprep.subr.bf16.mxu0 %v7913_v4  ;;  %v7949_v4 = vld [vmem:[#allocation3 + $0x1e0] sm:$0xff]  }
 0x8d9   :  { %7317 = vmatpush3.bf16.msra.mxu0 %v7914_v39  ;;  %v7950_v39 = vld [vmem:[#allocation3 + $0x1a0] sm:$0xff]  }
 0x8da   :  { %7318 = vmatprep.subr.bf16.mxu0 %v7915_v5  ;;  %v7951_v5 = vld [vmem:[#allocation3 + $0x1d8] sm:$0xff]  }
 0x8dd   :  { %7319 = vmatpush3.bf16.msra.mxu0 %v7916_v6  ;;  %v7952_v6 = vld [vmem:[#allocation3 + $0x198] sm:$0xff]  }
 0x8de   :  { %7320 = vmatprep.subr.bf16.mxu0 %v7917_v7  ;;  %v7953_v7 = vld [vmem:[#allocation3 + $0x1d0] sm:$0xff]  }
 0x8e1   :  { %7321 = vmatpush3.bf16.msra.mxu0 %v7918_v13  ;;  %v7954_v13 = vld [vmem:[#allocation3 + $0x190] sm:$0xff]  }
 0x8e2   :  { %7322 = vmatprep.subr.bf16.mxu0 %v7919_v22  ;;  %v7955_v22 = vld [vmem:[#allocation3 + $0x1c8] sm:$0xff]  }
 0x8e5   :  { %7323 = vmatpush3.bf16.msra.mxu0 %v7920_v14  ;;  %v7956_v14 = vld [vmem:[#allocation3 + $0x188] sm:$0xff]  }
 0x8e6   :  { %7324 = vmatprep.subr.bf16.mxu0 %v7921_v15  ;;  %v7957_v15 = vld [vmem:[#allocation3 + $0x1c0] sm:$0xff]  }
 0x8e9   :  { %7325 = vmatpush3.bf16.msra.mxu0 %v7922_v16  ;;  %v7958_v16 = vld [vmem:[#allocation3 + $0x180] sm:$0xff]  }
 0x8ea   :  { %7326 = vmatprep.subr.bf16.mxu0 %v7923_v18  ;;  %v7959_v18 = vld [vmem:[%s9554_s4 + $0x140] ss:$8 sps:$4 sm:$0xff]  }
 0x8ed   :  { %7327 = vmatpush3.bf16.msra.mxu0 %v7924_v49  ;;  %v7961_v49 = vld [vmem:[%s9554_s4 + $0x144] ss:$8 sps:$4 sm:$0xff]  }
 0x8ee   :  { %7328 = vmatprep.subr.bf16.mxu0 %v7925_v54 }
 0x8f1   :  { %7329 = vmatpush3.bf16.msra.mxu0 %v7926_v23 }
 0x8f2   :  { %4492 = vmatprep.subr.bf16.mxu0 %v7961_v49 }
 0x8f4   :  { %4364 = vmatmul.mubr.bf16.vlgmr.msra.gmra.mxu0 %v3795_v3  ;;  %v7948_v3 = vld [vmem:[#allocation3 + $0x1a8] sm:$0xff]  }
 0x8f5   :  { %4510 = vmatprep.mubr.bf16.mxu0 %v8424_v35  ;;  %4493 = vmatpush1.bf16.msra.mxu0 %v7959_v18 }
 0x904   :  { %v3671_v26 = vpop.f32.mrf.mxu0  ;;  %v3714_v27 = vpop.f32.mrf.mxu1 }
 0x905   :  { %v3672_v31 = vadd.f32 %v3671_v26, %v2902_v25 }
 0x906   :  { %v3673_v28 = vpop.f32.mrf.mxu0  ;;  %v3716_v29 = vpop.f32.mrf.mxu1 }
 0x907   :  { %v3674_v30 = vadd.f32 %v3673_v28, %v2906_v24  ;;  %v3715_v17 = vadd.f32 %v3714_v27, %v3672_v31 }
 0x908   :  { %v3675_v41 = vpop.f32.mrf.mxu0  ;;  %v3718_v44 = vpop.f32.mrf.mxu1 }
 0x909   :  { %v3676_v47 = vadd.f32 %v3675_v41, %v2902_v25  ;;  %v3717_v52 = vadd.f32 %v3716_v29, %v3674_v30  ;;  %v3725_v19 = vmax.f32 %v3715_v17, 0.0 }
 0x90a   :  { %v3677_v51 = vpop.f32.mrf.mxu0  ;;  %v3720_v58 = vpop.f32.mrf.mxu1 }
 0x90b   :  { %v3719_v57 = vadd.f32 %v3718_v44, %v3676_v47  ;;  %v3678_v12 = vadd.f32 %v3677_v51, %v2906_v24  ;;  %v3726_v61 = vmax.f32 %v3717_v52, 0.0  ;;  %v4138_v47 = vld [vmem:[#allocation13 + $0x27] ss:$0 sm:$0xff] }
 0x90d   :  { %v3721_v59 = vadd.f32 %v3720_v58, %v3678_v12  ;;  %v3729_v60 = vmax.f32 %v3719_v57, 0.0 }
 0x90f   :  { %v3730_v62 = vmax.f32 %v3721_v59, 0.0  ;;  %v3797_v11 = vpack.c.bf16 %v3729_v60, %v3725_v19 }
 0x911   :  { %v3798_v63 = vpack.c.bf16 %v3730_v62, %v3726_v61 }
 0x913   :  { %4065 = vmatprep.mubr.bf16.mxu1 %v3798_v63 }
 0x914   :  { %4066 = vmatmul.mubr.bf16.vlgmr.msra.gmra.mxu1 %v3797_v11 }
 0x915   :  { %7337 = vmatpush3.bf16.msra.mxu1 %v7944_v10  ;;  %4404 = vmatprep.mubr.bf16.mxu1 %v3798_v63 }
 0x916   :  { %7338 = vmatprep.subr.bf16.mxu1 %v7945_v0 }
 0x919   :  { %7339 = vmatpush3.bf16.msra.mxu1 %v7946_v1 }
 0x91a   :  { %7340 = vmatprep.subr.bf16.mxu1 %v7947_v2 }
 0x91d   :  { %7341 = vmatpush3.bf16.msra.mxu1 %v7948_v3  ;;  %v3799_v3 = vld [vmem:[#allocation13 + $0x26] ss:$0 sm:$0xff] }
 0x91e   :  { %7342 = vmatprep.subr.bf16.mxu1 %v7949_v4 }
 0x921   :  { %7343 = vmatpush3.bf16.msra.mxu1 %v7950_v39 }
 0x922   :  { %7344 = vmatprep.subr.bf16.mxu1 %v7951_v5 }
 0x925   :  { %7345 = vmatpush3.bf16.msra.mxu1 %v7952_v6 }
 0x926   :  { %7346 = vmatprep.subr.bf16.mxu1 %v7953_v7 }
 0x929   :  { %7347 = vmatpush3.bf16.msra.mxu1 %v7954_v13 }
 0x92a   :  { %7348 = vmatprep.subr.bf16.mxu1 %v7955_v22 }
 0x92d   :  { %7349 = vmatpush3.bf16.msra.mxu1 %v7956_v14 }
 0x92e   :  { %7350 = vmatprep.subr.bf16.mxu1 %v7957_v15 }
 0x931   :  { %7351 = vmatpush3.bf16.msra.mxu1 %v7958_v16 }
 0x934   :  { %4405 = vmatmul.mubr.bf16.vlgmr.msra.gmra.mxu1 %v3797_v11 }
 0x935   :  { %4846 = vmatprep.mubr.bf16.mxu1 %v8424_v35 }
 0x994   :  { %v7286_v54 = vpop.f32.mrf.mxu0 }
 0x996   :  { %v7287_v23 = vpop.f32.mrf.mxu0 }
 0x997   :  { %v7288_v2 = vadd.f32 %v7287_v23, %v7286_v54  ;;  %v4423_v54 = vmul.f32 %v8799_v32, %v8799_v32 }
 0x998   :  { %v7289_v24 = vpop.f32.mrf.mxu0 }
 0x999   :  { %v4027_v39 = vadd.f32 %v7288_v2, %v3799_v3 }
 0x99a   :  { %v7290_v25 = vpop.f32.mrf.mxu0 }
 0x99b   :  { %v7291_v5 = vadd.f32 %v7290_v25, %v7289_v24 }
 0x99d   :  { %v4030_v14 = vadd.f32 %v7291_v5, %v3799_v3 }
 0x9b4   :  { %v7330_v27 = vpop.f32.mrf.mxu0 }
 0x9b6   :  { %v7331_v29 = vpop.f32.mrf.mxu0 }
 0x9b7   :  { %v7332_v44 = vadd.f32 %v7331_v29, %v7330_v27 }
 0x9b8   :  { %v7333_v31 = vpop.f32.mrf.mxu0 }
 0x9b9   :  { %v4366_v12 = vadd.f32 %v7332_v44, %v4138_v47  ;;  %v7965_v44 = vld [vmem:[%s9555_s5 + $0x1b0] sm:$0xff]  }
 0x9ba   :  { %v7334_v51 = vpop.f32.mrf.mxu0 }
 0x9bb   :  { %v7335_v17 = vadd.f32 %v7334_v51, %v7333_v31  ;;  %v7967_v51 = vld [vmem:[%s9555_s5 + $0x1a8] sm:$0xff]  }
 0x9bd   :  { %v4369_v62 = vadd.f32 %v7335_v17, %v4138_v47  ;;  %v7966_v47 = vld [vmem:[%s9555_s5 + $0x1e8] sm:$0xff]   ;;  %v7971_v17 = vld [vmem:[%s9555_s5 + $0x198] sm:$0xff]  }
 0x9d4   :  { %v7308_v26 = vpop.f32.mrf.mxu1 }
 0x9d6   :  { %v7309_v28 = vpop.f32.mrf.mxu1 }
 0x9d7   :  { %v7310_v4 = vadd.f32 %v7309_v28, %v7308_v26 }
 0x9d8   :  { %v7311_v30 = vpop.f32.mrf.mxu1 }
 0x9d9   :  { %v4068_v7 = vadd.f32 %v7310_v4, %v4027_v39 }
 0x9da   :  { %v7312_v41 = vpop.f32.mrf.mxu1 }
 0x9db   :  { %v7313_v13 = vadd.f32 %v7312_v41, %v7311_v30  ;;  %v7962_v30 = vld [vmem:[%s9555_s5 + $0x1f8] sm:$0xff]   ;;  %v7964_v41 = vld [vmem:[%s9555_s5 + $0x1f0] sm:$0xff]  }
 0x9dc   :  { %7358 = vmatprep.subr.bf16.mxu0 %v7962_v30  ;;  %v7995_v30 = vld [vmem:[#allocation2 + $0x524] ss:$16 sps:$4 sm:$0xff]  }
 0x9dd   :  { %v4071_v18 = vadd.f32 %v7313_v13, %v4030_v14 }
 0x9f4   :  { %v7352_v52 = vpop.f32.mrf.mxu1 }
 0x9f6   :  { %v7353_v57 = vpop.f32.mrf.mxu1 }
 0x9f7   :  { %v7354_v58 = vadd.f32 %v7353_v57, %v7352_v52  ;;  %v7968_v52 = vld [vmem:[%s9555_s5 + $0x1e0] sm:$0xff]  }
 0x9f8   :  { %v7355_v59 = vpop.f32.mrf.mxu1  ;;  %v7969_v57 = vld [vmem:[%s9555_s5 + $0x1a0] sm:$0xff]  }
 0x9f9   :  { %v4407_v60 = vadd.f32 %v7354_v58, %v4366_v12  ;;  %v7970_v12 = vld [vmem:[%s9555_s5 + $0x1d8] sm:$0xff]   ;;  %v7972_v58 = vld [vmem:[%s9555_s5 + $0x1d0] sm:$0xff]  }
 0x9fa   :  { %v7356_v61 = vpop.f32.mrf.mxu1 }
 0x9fb   :  { %v4413_v19 = vmul.f32 0.5, %v4407_v60  ;;  %v7357_v63 = vadd.f32 %v7356_v61, %v7355_v59  ;;  %v4425_v26 = vadd.f32 %v4423_v54, %v4407_v60  ;;  %v7973_v59 = vld [vmem:[%s9555_s5 + $0x190] sm:$0xff]   ;;  %v7974_v60 = vld [vmem:[%s9555_s5 + $0x1c8] sm:$0xff]  }
 0x9fc   :  { %v7975_v61 = vld [vmem:[%s9555_s5 + $0x188] sm:$0xff]   ;;  %v7986_v54 = vld [vmem:[#allocation2 + $0x5c4] ss:$16 sps:$4 sm:$0xff]  }
 0x9fd   :  { %v4415_v10 = vmul.f32 1.442695, %v4413_v19  ;;  %v9436_v11 = vadd.f32 %v7357_v63, %v4369_v62  ;;  %v4427_v28 = vsel %vm379_vm0, %v4425_v26, 0.0  ;;  %v7976_v62 = vld [vmem:[%s9555_s5 + $0x1c0] sm:$0xff]  }
 0x9fe   :  { %v7977_v19 = vld [vmem:[%s9555_s5 + $0x180] sm:$0xff]  }
 0x9ff   :  { %8250 = vpow2.f32 %v4415_v10  ;;  %v4414_v0 = vmul.f32 0.5, %v9436_v11  ;;  %v7978_v63 = vld [vmem:[#allocation2 + $0x5e0] ss:$16 sps:$4 sm:$0xff]   ;;  %v7980_v10 = vld [vmem:[#allocation2 + $0x5e4] ss:$16 sps:$4 sm:$0xff]  }
 0xa00   :  { %4822 = vmatprep.subr.bf16.mxu1 %v7980_v10  ;;  %v7992_v26 = vld [vmem:[#allocation2 + $0x5a4] ss:$16 sps:$4 sm:$0xff]   ;;  %v8041_v10 = vld [vmem:[#allocation2 + $0x640] ss:$16 sps:$4 sm:$0xff]  }
 0xa01   :  { %v4417_v1 = vmul.f32 1.442695, %v4414_v0  ;;  %v7983_v0 = vld [vmem:[#allocation2 + $0x564] ss:$16 sps:$4 sm:$0xff]   ;;  %4823 = vmatpush1.bf16.msra.mxu1 %v7978_v63 }
 0xa02   :  { %4824 = vmatprep.subr.bf16.mxu1 %v7986_v54  ;;  %v8043_v63 = vld [vmem:[#allocation2 + $0x644] ss:$16 sps:$4 sm:$0xff]  }
 0xa03   :  { %8252 = vpow2.f32 %v4417_v1  ;;  %v4453_v1 = vld [vmem:[#allocation13 + $0x22] ss:$8 sm:$0x3] }
 0xa04   :  { %v4462_v3 = vrot.slane %v4453_v1, %v8949_v20  ;;  %v4458_v4 = vrot.slane %v4453_v1, %v8952_v21  ;;  %v8044_v1 = vld [vmem:[#allocation2 + $0x620] ss:$16 sps:$4 sm:$0xff]  }
 0xa0c   :  { %v8251_v6 = vpop.eup %8250 }
 0xa0d   :  { %v4419_v22 = vmul.f32 %v8251_v6, %v8799_v32  ;;  %v7963_v32 = vld [vmem:[%s9555_s5 + $0x1b8] sm:$0xff]   ;;  %s8425_s5 = smov [#allocation14]  }
 0xa0e   :  { %s6483_s22 = sshll.u32 %s8425_s5, 4  ;;  %s6484_s22 = int_to_ptr.vmem [resolvable:$true] %s6483_s22 }
 0xa0f   :  { %v4421_v15 = vadd.f32 %v4419_v22, %v4068_v7  ;;  %s8382_s23 = scalar_lea.vmem %s6484_s22, 256  ;;  %p8387_p3 = scmp.lt.s32.totalorder %s6484_s22, %s6484_s22 }
 0xa10   :  { %v8253_v16 = vpop.eup %8252  ;;  %p8383_p2 = scmp.ne.s32.totalorder %s6484_s22, %s8382_s23  ;;  %p8388_p4 = scmp.lt.s32.totalorder %s8382_s23, %s8382_s23 }
 0xa11   :  { %v4420_v49 = vmul.f32 %v8253_v16, %v8801_v33  ;;  %v4437_v27 = vmul.f32 %v4421_v15, %v4421_v15 }
 0xa12   :  { %p8389_p5 = por %p8388_p4, %p8387_p3 }
 0xa13   :  { %v4422_v29 = vadd.f32 %v4420_v49, %v4071_v18  ;;  %v4439_v31 = vsel %vm379_vm0, %v4437_v27, 0.0 }
 0xa14   :  { %4440 = vadd.xlane.f32.xlu0 %v4439_v31  ;;  %p8390_p6 = pnand %p8389_p5, %p8383_p2 }
 0xa15   :  { %v4451_v23 = vpack.c.bf16 %v4422_v29, %v4421_v15  ;;  %v4438_v24 = vmul.f32 %v4422_v29, %v4422_v29  ;;  %v7981_v29 = vld [vmem:[#allocation2 + $0x560] ss:$16 sps:$4 sm:$0xff]  }
 0xa17   :  { %6923 = vmatmul.mubr.msk.bf16.vlgmr.msra.gmra.mxu0 %vm379_vm0, %v4451_v23  ;;  %v4442_v25 = vsel %vm379_vm0, %v4438_v24, 0.0  ;;  %v7984_v23 = vld [vmem:[#allocation2 + $0x5c0] ss:$16 sps:$4 sm:$0xff]   ;;  %v7989_v24 = vld [vmem:[#allocation2 + $0x544] ss:$16 sps:$4 sm:$0xff]  }
 0xa18   :  { %4443 = vadd.xlane.f32.xlu0 %v4442_v25  ;;  %7359 = vmatpush3.bf16.msra.mxu0 %v7963_v32  ;;  %v7987_v25 = vld [vmem:[#allocation2 + $0x540] ss:$16 sps:$4 sm:$0xff]  }
 0xa19   :  { %7360 = vmatprep.subr.bf16.mxu0 %v7964_v41  ;;  %4825 = vmatpush1.bf16.msra.mxu1 %v7984_v23  ;;  %v7993_v32 = vld [vmem:[#allocation2 + $0x520] ss:$16 sps:$4 sm:$0xff]   ;;  %v7998_v41 = vld [vmem:[#allocation2 + $0x584] ss:$16 sps:$4 sm:$0xff]  }
 0xa1a   :  { %4826 = vmatprep.subr.bf16.mxu1 %v7992_v26  ;;  %v8002_v26 = vld [vmem:[#allocation2 + $0x5e8] ss:$16 sps:$4 sm:$0xff]  }
 0xa1c   :  { %4428 = vadd.xlane.f32.xlu0 %v4427_v28  ;;  %7361 = vmatpush3.bf16.msra.mxu0 %v7965_v44  ;;  %v7990_v28 = vld [vmem:[#allocation2 + $0x5a0] ss:$16 sps:$4 sm:$0xff]  }
 0xa1d   :  { %7362 = vmatprep.subr.bf16.mxu0 %v7966_v47  ;;  %4827 = vmatpush1.bf16.msra.mxu1 %v7990_v28  ;;  %v7996_v44 = vld [vmem:[#allocation2 + $0x580] ss:$16 sps:$4 sm:$0xff]   ;;  %v8001_v47 = vld [vmem:[#allocation2 + $0x504] ss:$16 sps:$4 sm:$0xff]  }
 0xa1e   :  { %4828 = vmatprep.subr.bf16.mxu1 %v7998_v41  ;;  %v8010_v41 = vld [vmem:[#allocation2 + $0x5ac] ss:$16 sps:$4 sm:$0xff]  }
 0xa20   :  { %7363 = vmatpush3.bf16.msra.mxu0 %v7967_v51  ;;  %v7999_v51 = vld [vmem:[#allocation2 + $0x500] ss:$16 sps:$4 sm:$0xff]  }
 0xa21   :  { %7364 = vmatprep.subr.bf16.mxu0 %v7968_v52  ;;  %4829 = vmatpush1.bf16.msra.mxu1 %v7996_v44  ;;  %v8004_v52 = vld [vmem:[#allocation2 + $0x5ec] ss:$16 sps:$4 sm:$0xff]   ;;  %v8008_v44 = vld [vmem:[#allocation2 + $0x5a8] ss:$16 sps:$4 sm:$0xff]  }
 0xa22   :  { %4865 = vmatprep.subr.bf16.mxu1 %v8004_v52  ;;  %v8016_v52 = vld [vmem:[#allocation2 + $0x56c] ss:$16 sps:$4 sm:$0xff]  }
 0xa24   :  { %7365 = vmatpush3.bf16.msra.mxu0 %v7969_v57  ;;  %v9500_v57 = vpack.c.bf16 %v9364_v55, %v9360_v34  ;;  %v8040_v34 = vld [vmem:[#allocation2 + $0x664] ss:$16 sps:$4 sm:$0xff]   ;;  %v8038_v55 = vld [vmem:[#allocation2 + $0x660] ss:$16 sps:$4 sm:$0xff]  }
 0xa25   :  { %7366 = vmatprep.subr.bf16.mxu0 %v7970_v12  ;;  %v8026_v12 = vld [vmem:[#allocation2 + $0x6e0] ss:$16 sps:$4 sm:$0xff]  }
 0xa28   :  { %7367 = vmatpush3.bf16.msra.mxu0 %v7971_v17  ;;  %v8028_v17 = vld [vmem:[#allocation2 + $0x6e4] ss:$16 sps:$4 sm:$0xff]  }
 0xa29   :  { %7368 = vmatprep.subr.bf16.mxu0 %v7972_v58  ;;  %v8031_v58 = vld [vmem:[#allocation2 + $0x6c4] ss:$16 sps:$4 sm:$0xff]  }
 0xa2c   :  { %7369 = vmatpush3.bf16.msra.mxu0 %v7973_v59  ;;  %v8029_v59 = vld [vmem:[#allocation2 + $0x6c0] ss:$16 sps:$4 sm:$0xff]  }
 0xa2d   :  { %7370 = vmatprep.subr.bf16.mxu0 %v7974_v60  ;;  %v8034_v60 = vld [vmem:[#allocation2 + $0x6a4] ss:$16 sps:$4 sm:$0xff]  }
 0xa30   :  { %7371 = vmatpush3.bf16.msra.mxu0 %v7975_v61  ;;  %v8032_v61 = vld [vmem:[#allocation2 + $0x6a0] ss:$16 sps:$4 sm:$0xff]  }
 0xa31   :  { %7372 = vmatprep.subr.bf16.mxu0 %v7976_v62  ;;  %v8037_v62 = vld [vmem:[#allocation2 + $0x684] ss:$16 sps:$4 sm:$0xff]  }
 0xa34   :  { %7373 = vmatpush3.bf16.msra.mxu0 %v7977_v19  ;;  %v8035_v19 = vld [vmem:[#allocation2 + $0x680] ss:$16 sps:$4 sm:$0xff]  }
 0xa35   :  { %4991 = vmatprep.subr.bf16.mxu0 %v7983_v0  ;;  %v8046_v0 = vld [vmem:[#allocation2 + $0x624] ss:$16 sps:$4 sm:$0xff]  }
 0xad7   :  { %v4512_v2 = vpop.f32.mrf.mxu0 }
 0xad8   :  { %v4513_v13 = vadd.f32 %v4512_v2, %v4458_v4  ;;  %v8049_v2 = vld [vmem:[#allocation2 + $0x604] ss:$16 sps:$4 sm:$0xff]  }
 0xad9   :  { %v4514_v39 = vpop.f32.mrf.mxu0 }
 0xada   :  { %v4515_v6 = vadd.f32 %v4514_v39, %v4462_v3  ;;  %v4521_v49 = vmax.f32 %v4513_v13, 0.0  ;;  %v8053_v39 = vld [vmem:[#allocation2 + $0x7e0] ss:$16 sps:$4 sm:$0xff]  }
 0xadb   :  { %v4516_v5 = vpop.f32.mrf.mxu0  ;;  %v8065_v13 = vld [vmem:[#allocation2 + $0x7a0] ss:$16 sps:$4 sm:$0xff]  }
 0xadc   :  { %v4517_v7 = vadd.f32 %v4516_v5, %v4458_v4  ;;  %v4522_v16 = vmax.f32 %v4515_v6, 0.0  ;;  %v8055_v4 = vld [vmem:[#allocation2 + $0x7e4] ss:$16 sps:$4 sm:$0xff]   ;;  %v8059_v6 = vld [vmem:[#allocation2 + $0x7c0] ss:$16 sps:$4 sm:$0xff]  }
 0xadd   :  { %v4518_v22 = vpop.f32.mrf.mxu0  ;;  %v8061_v5 = vld [vmem:[#allocation2 + $0x7c4] ss:$16 sps:$4 sm:$0xff]  }
 0xade   :  { %v4519_v14 = vadd.f32 %v4518_v22, %v4462_v3  ;;  %v4523_v15 = vmax.f32 %v4517_v7, 0.0  ;;  %v8047_v3 = vld [vmem:[#allocation2 + $0x600] ss:$16 sps:$4 sm:$0xff]   ;;  %v8067_v7 = vld [vmem:[#allocation2 + $0x7a4] ss:$16 sps:$4 sm:$0xff]  }
 0xadf   :  { %v8073_v22 = vld [vmem:[#allocation2 + $0x784] ss:$16 sps:$4 sm:$0xff]  }
 0xae0   :  { %v4524_v18 = vmax.f32 %v4519_v14, 0.0  ;;  %v4557_v31 = vpack.c.bf16 %v4523_v15, %v4521_v49  ;;  %v8071_v14 = vld [vmem:[#allocation2 + $0x780] ss:$16 sps:$4 sm:$0xff]   ;;  %v8079_v15 = vld [vmem:[#allocation2 + $0x764] ss:$16 sps:$4 sm:$0xff]  }
 0xae2   :  { %v4558_v27 = vpack.c.bf16 %v4524_v18, %v4522_v16  ;;  %v8077_v16 = vld [vmem:[#allocation2 + $0x760] ss:$16 sps:$4 sm:$0xff]  }
 0xae4   :  { %4688 = vmatprep.mubr.bf16.mxu0 %v4558_v27 }
 0xae5   :  { %4689 = vmatmul.mubr.bf16.vlgmr.msra.gmra.mxu0 %v4557_v31  ;;  %v4559_v31 = vld [vmem:[#allocation13 + $0x23] ss:$0 sm:$0xff] }
 0xae6   :  { %4992 = vmatpush1.bf16.msra.mxu0 %v7981_v29  ;;  %5015 = vmatprep.mubr.bf16.mxu0 %v8424_v35 }
 0xae7   :  { %4993 = vmatprep.subr.bf16.mxu0 %v7989_v24 }
 0xaea   :  { %4994 = vmatpush1.bf16.msra.mxu0 %v7987_v25 }
 0xaeb   :  { %4995 = vmatprep.subr.bf16.mxu0 %v7995_v30  ;;  %v8007_v30 = vld [vmem:[#allocation2 + $0x5cc] ss:$16 sps:$4 sm:$0xff]  }
 0xaee   :  { %4996 = vmatpush1.bf16.msra.mxu0 %v7993_v32  ;;  %v8005_v32 = vld [vmem:[#allocation2 + $0x5c8] ss:$16 sps:$4 sm:$0xff]  }
 0xaef   :  { %4997 = vmatprep.subr.bf16.mxu0 %v8001_v47  ;;  %v8013_v47 = vld [vmem:[#allocation2 + $0x58c] ss:$16 sps:$4 sm:$0xff]  }
 0xaf2   :  { %4998 = vmatpush1.bf16.msra.mxu0 %v7999_v51  ;;  %v8011_v51 = vld [vmem:[#allocation2 + $0x588] ss:$16 sps:$4 sm:$0xff]  }
 0xaf3   :  { %5903 = vmatprep.subr.bf16.mxu0 %v8028_v17  ;;  %v8019_v17 = vld [vmem:[#allocation2 + $0x54c] ss:$16 sps:$4 sm:$0xff]  }
 0xaf5   :  { %6974 = vmatmul.mubr.msk.bf16.vlgmr.msra.gmra.mxu0 %vm2458_vm3, %v9500_v57 }
 0xaf6   :  { %5904 = vmatpush1.bf16.msra.mxu0 %v8026_v12  ;;  %v8014_v12 = vld [vmem:[#allocation2 + $0x568] ss:$16 sps:$4 sm:$0xff]  }
 0xaf7   :  { %5905 = vmatprep.subr.bf16.mxu0 %v8031_v58  ;;  %v8017_v58 = vld [vmem:[#allocation2 + $0x548] ss:$16 sps:$4 sm:$0xff]  }
 0xafa   :  { %5906 = vmatpush1.bf16.msra.mxu0 %v8029_v59  ;;  %v8022_v59 = vld [vmem:[#allocation2 + $0x52c] ss:$16 sps:$4 sm:$0xff]  }
 0xafb   :  { %5907 = vmatprep.subr.bf16.mxu0 %v8034_v60  ;;  %v8020_v60 = vld [vmem:[#allocation2 + $0x528] ss:$16 sps:$4 sm:$0xff]  }
 0xafe   :  { %5908 = vmatpush1.bf16.msra.mxu0 %v8032_v61  ;;  %v8025_v61 = vld [vmem:[#allocation2 + $0x50c] ss:$16 sps:$4 sm:$0xff]  }
 0xaff   :  { %5909 = vmatprep.subr.bf16.mxu0 %v8037_v62  ;;  %v8023_v62 = vld [vmem:[#allocation2 + $0x508] ss:$16 sps:$4 sm:$0xff]  }
 0xb02   :  { %5910 = vmatpush1.bf16.msra.mxu0 %v8035_v19  ;;  %v8052_v19 = vld [vmem:[#allocation2 + $0x8e4] ss:$16 sps:$4 sm:$0xff]  }
 0xb03   :  { %5911 = vmatprep.subr.bf16.mxu0 %v8040_v34  ;;  %v8050_v34 = vld [vmem:[#allocation2 + $0x8e0] ss:$16 sps:$4 sm:$0xff]  }
 0xb06   :  { %5912 = vmatpush1.bf16.msra.mxu0 %v8038_v55  ;;  %v8058_v55 = vld [vmem:[#allocation2 + $0x8c4] ss:$16 sps:$4 sm:$0xff]  }
 0xb07   :  { %5913 = vmatprep.subr.bf16.mxu0 %v8043_v63  ;;  %v8056_v63 = vld [vmem:[#allocation2 + $0x8c0] ss:$16 sps:$4 sm:$0xff]  }
 0xb0a   :  { %5914 = vmatpush1.bf16.msra.mxu0 %v8041_v10  ;;  %v8062_v10 = vld [vmem:[#allocation2 + $0x8a0] ss:$16 sps:$4 sm:$0xff]  }
 0xb0b   :  { %5915 = vmatprep.subr.bf16.mxu0 %v8046_v0  ;;  %v8070_v0 = vld [vmem:[#allocation2 + $0x884] ss:$16 sps:$4 sm:$0xff]  }
 0xb0e   :  { %5916 = vmatpush1.bf16.msra.mxu0 %v8044_v1  ;;  %v8068_v1 = vld [vmem:[#allocation2 + $0x880] ss:$16 sps:$4 sm:$0xff]  }
 0xb0f   :  { %5917 = vmatprep.subr.bf16.mxu0 %v8049_v2  ;;  %v8076_v2 = vld [vmem:[#allocation2 + $0x864] ss:$16 sps:$4 sm:$0xff]  }
 0xb12   :  { %5918 = vmatpush1.bf16.msra.mxu0 %v8047_v3  ;;  %v8074_v3 = vld [vmem:[#allocation2 + $0x860] ss:$16 sps:$4 sm:$0xff]  }
 0xb13   :  { %5919 = vmatprep.subr.bf16.mxu0 %v8055_v4  ;;  %v8082_v4 = vld [vmem:[#allocation2 + $0x844] ss:$16 sps:$4 sm:$0xff]  }
 0xb16   :  { %5920 = vmatpush2.bf16.msra.mxu0 %v8053_v39  ;;  %v8080_v39 = vld [vmem:[#allocation2 + $0x840] ss:$16 sps:$4 sm:$0xff]  }
 0xb17   :  { %5921 = vmatprep.subr.bf16.mxu0 %v8061_v5  ;;  %v8085_v5 = vld [vmem:[#allocation2 + $0x744] ss:$16 sps:$4 sm:$0xff]  }
 0xb1a   :  { %5922 = vmatpush2.bf16.msra.mxu0 %v8059_v6  ;;  %v8088_v6 = vld [vmem:[#allocation2 + $0x824] ss:$16 sps:$4 sm:$0xff]  }
 0xb1b   :  { %5923 = vmatprep.subr.bf16.mxu0 %v8067_v7  ;;  %v8086_v7 = vld [vmem:[#allocation2 + $0x820] ss:$16 sps:$4 sm:$0xff]  }
 0xb1e   :  { %5924 = vmatpush2.bf16.msra.mxu0 %v8065_v13  ;;  %v8091_v13 = vld [vmem:[#allocation2 + $0x724] ss:$16 sps:$4 sm:$0xff]  }
 0xb1f   :  { %5925 = vmatprep.subr.bf16.mxu0 %v8073_v22  ;;  %v8089_v22 = vld [vmem:[#allocation2 + $0x720] ss:$16 sps:$4 sm:$0xff]  }
 0xb22   :  { %5926 = vmatpush2.bf16.msra.mxu0 %v8071_v14  ;;  %v8094_v14 = vld [vmem:[#allocation2 + $0x804] ss:$16 sps:$4 sm:$0xff]  }
 0xb23   :  { %5927 = vmatprep.subr.bf16.mxu0 %v8079_v15  ;;  %v8092_v15 = vld [vmem:[#allocation2 + $0x800] ss:$16 sps:$4 sm:$0xff]  }
 0xb26   :  { %5928 = vmatpush2.bf16.msra.mxu0 %v8077_v16  ;;  %v8097_v16 = vld [vmem:[#allocation2 + $0x704] ss:$16 sps:$4 sm:$0xff]  }
 0xb27   :  { %5929 = vmatprep.subr.bf16.mxu0 %v8085_v5 }
 0xba5   :  { %v7374_v18 = vpop.f32.mrf.mxu0 }
 0xba7   :  { %v7375_v49 = vpop.f32.mrf.mxu0 }
 0xba8   :  { %v7376_v29 = vadd.f32 %v7375_v49, %v7374_v18  ;;  %v8095_v18 = vld [vmem:[#allocation2 + $0x700] ss:$16 sps:$4 sm:$0xff]   ;;  %v8100_v49 = vld [vmem:[#allocation2 + $0x9e4] ss:$16 sps:$4 sm:$0xff]  }
 0xba9   :  { %v7377_v27 = vpop.f32.mrf.mxu0 }
 0xbaa   :  { %v4691_v24 = vadd.f32 %v7376_v29, %v4559_v31  ;;  %v8103_v29 = vld [vmem:[#allocation2 + $0x6ec] ss:$16 sps:$4 sm:$0xff]  }
 0xbab   :  { %v7378_v54 = vpop.f32.mrf.mxu0 }
 0xbac   :  { %v7379_v23 = vadd.f32 %v7378_v54, %v7377_v27  ;;  %v8098_v27 = vld [vmem:[#allocation2 + $0x9e0] ss:$16 sps:$4 sm:$0xff]  }
 0xbad   :  { %v8104_v54 = vld [vmem:[#allocation2 + $0x9c0] ss:$16 sps:$4 sm:$0xff]  }
 0xbae   :  { %v4694_v25 = vadd.f32 %v7379_v23, %v4559_v31  ;;  %v8106_v31 = vld [vmem:[#allocation2 + $0x9c4] ss:$16 sps:$4 sm:$0xff]  }
 0xbaf   :  { %v8112_v23 = vld [vmem:[#allocation2 + $0x9a4] ss:$16 sps:$4 sm:$0xff]  }
 0xbb0   :  { %v4730_v28 = vpack.c.bf16 %v4694_v25, %v4691_v24  ;;  %v8110_v24 = vld [vmem:[#allocation2 + $0x9a0] ss:$16 sps:$4 sm:$0xff]  }
 0xbb1   :  { %v8116_v25 = vld [vmem:[#allocation2 + $0x980] ss:$16 sps:$4 sm:$0xff]  }
 0xbb2   :  { %6956 = vmatmul.mubr.msk.bf16.vlgmr.msra.gmra.mxu1 %vm2458_vm3, %v4730_v28 }
 0xbb3   :  { %4866 = vmatpush1.bf16.msra.mxu1 %v8002_v26  ;;  %4889 = vmatprep.mubr.bf16.mxu1 %v8424_v35  ;;  %v8118_v26 = vld [vmem:[#allocation2 + $0x984] ss:$16 sps:$4 sm:$0xff]  }
 0xbb4   :  { %4867 = vmatprep.subr.bf16.mxu1 %v8007_v30  ;;  %v8124_v30 = vld [vmem:[#allocation2 + $0x964] ss:$16 sps:$4 sm:$0xff]  }
 0xbb7   :  { %4868 = vmatpush1.bf16.msra.mxu1 %v8005_v32  ;;  %v8130_v32 = vld [vmem:[#allocation2 + $0x944] ss:$16 sps:$4 sm:$0xff]  }
 0xbb8   :  { %4869 = vmatprep.subr.bf16.mxu1 %v8010_v41  ;;  %v8128_v41 = vld [vmem:[#allocation2 + $0x940] ss:$16 sps:$4 sm:$0xff]  }
 0xbbb   :  { %4870 = vmatpush1.bf16.msra.mxu1 %v8008_v44  ;;  %v8136_v44 = vld [vmem:[#allocation2 + $0x924] ss:$16 sps:$4 sm:$0xff]  }
 0xbbc   :  { %4871 = vmatprep.subr.bf16.mxu1 %v8013_v47  ;;  %v8134_v47 = vld [vmem:[#allocation2 + $0x920] ss:$16 sps:$4 sm:$0xff]  }
 0xbbf   :  { %4872 = vmatpush1.bf16.msra.mxu1 %v8011_v51  ;;  %v8142_v51 = vld [vmem:[#allocation2 + $0x904] ss:$16 sps:$4 sm:$0xff]  }
 0xbc0   :  { %5034 = vmatprep.subr.bf16.mxu1 %v8016_v52  ;;  %v8140_v52 = vld [vmem:[#allocation2 + $0x900] ss:$16 sps:$4 sm:$0xff]  }
 0xbc2   :  { %6957 = vmatmul.mubr.msk.bf16.vlgmr.msra.gmra.mxu1 %vm2458_vm3, %v4730_v28  ;;  %v8122_v28 = vld [vmem:[#allocation2 + $0x960] ss:$16 sps:$4 sm:$0xff]  }
 0xbc3   :  { %5035 = vmatpush1.bf16.msra.mxu1 %v8014_v12  ;;  %5058 = vmatprep.mubr.bf16.mxu1 %v8424_v35  ;;  %v8064_v35 = vld [vmem:[#allocation2 + $0x8a4] ss:$16 sps:$4 sm:$0xff]   ;;  %v8148_v12 = vld [vmem:[#allocation2 + $0x8ec] ss:$16 sps:$4 sm:$0xff]  }
 0xbc4   :  { %5036 = vmatprep.subr.bf16.mxu1 %v8019_v17  ;;  %v5017_v17 = vpop.f32.mrf.mxu0 }
 0xbc7   :  { %5037 = vmatpush1.bf16.msra.mxu1 %v8017_v58  ;;  %v5019_v58 = vpop.f32.mrf.mxu0 }
 0xbc8   :  { %5038 = vmatprep.subr.bf16.mxu1 %v8022_v59 }
 0xbcb   :  { %5039 = vmatpush1.bf16.msra.mxu1 %v8020_v60  ;;  %v5021_v60 = vpop.f32.mrf.mxu0 }
 0xbcc   :  { %5040 = vmatprep.subr.bf16.mxu1 %v8025_v61  ;;  %v5070_v61 = vld [vmem:[#allocation13 + $0x43] ss:$8 sm:$0xf] }
 0xbcf   :  { %5041 = vmatpush1.bf16.msra.mxu1 %v8023_v62 }
 0xbd0   :  { %5946 = vmatprep.subr.bf16.mxu1 %v8052_v19 }
 0xbd2   :  { %6975 = vmatmul.mubr.msk.bf16.vlgmr.msra.gmra.mxu1 %vm2458_vm3, %v9500_v57  ;;  %v8083_v57 = vld [vmem:[#allocation2 + $0x740] ss:$16 sps:$4 sm:$0xff]  }
 0xbd3   :  { %5947 = vmatpush1.bf16.msra.mxu1 %v8050_v34  ;;  %5930 = vmatpush2.bf16.msra.mxu0 %v8083_v57  ;;  %v5079_v34 = vrot.slane %v5070_v61, %v8949_v20 }
 0xbd4   :  { %5948 = vmatprep.subr.bf16.mxu1 %v8058_v55  ;;  %5931 = vmatprep.subr.bf16.mxu0 %v8091_v13 }
 0xbd7   :  { %5949 = vmatpush1.bf16.msra.mxu1 %v8056_v63  ;;  %5932 = vmatpush2.bf16.msra.mxu0 %v8089_v22  ;;  %v5075_v63 = vrot.slane %v5070_v61, %v8952_v21 }
 0xbd8   :  { %5950 = vmatprep.subr.bf16.mxu1 %v8064_v35  ;;  %5933 = vmatprep.subr.bf16.mxu0 %v8097_v16  ;;  %v8109_v16 = vld [vmem:[#allocation2 + $0x6cc] ss:$16 sps:$4 sm:$0xff]  }
 0xbdb   :  { %5951 = vmatpush1.bf16.msra.mxu1 %v8062_v10  ;;  %5934 = vmatpush2.bf16.msra.mxu0 %v8095_v18  ;;  %v5023_v10 = vpop.f32.mrf.mxu0  ;;  %v8107_v18 = vld [vmem:[#allocation2 + $0x6c8] ss:$16 sps:$4 sm:$0xff]  }
 0xbdc   :  { %5952 = vmatprep.subr.bf16.mxu1 %v8070_v0  ;;  %5989 = vmatprep.subr.bf16.mxu0 %v8103_v29  ;;  %v8113_v29 = vld [vmem:[#allocation2 + $0x6a8] ss:$16 sps:$4 sm:$0xff]  }
 0xbdf   :  { %5953 = vmatpush1.bf16.msra.mxu1 %v8068_v1 }
 0xbe0   :  { %5954 = vmatprep.subr.bf16.mxu1 %v8076_v2 }
 0xbe3   :  { %5955 = vmatpush1.bf16.msra.mxu1 %v8074_v3 }
 0xbe4   :  { %5956 = vmatprep.subr.bf16.mxu1 %v8082_v4 }
 0xbe7   :  { %5957 = vmatpush1.bf16.msra.mxu1 %v8080_v39 }
 0xbe8   :  { %5958 = vmatprep.subr.bf16.mxu1 %v8088_v6 }
 0xbeb   :  { %5959 = vmatpush1.bf16.msra.mxu1 %v8086_v7 }
 0xbec   :  { %5960 = vmatprep.subr.bf16.mxu1 %v8094_v14  ;;  %v8101_v14 = vld [vmem:[#allocation2 + $0x6e8] ss:$16 sps:$4 sm:$0xff]  }
 0xbef   :  { %5961 = vmatpush1.bf16.msra.mxu1 %v8092_v15 }
 0xbf0   :  { %5962 = vmatprep.subr.bf16.mxu1 %v8100_v49 }
 0xbf3   :  { %5963 = vmatpush2.bf16.msra.mxu1 %v8098_v27  ;;  %v8115_v27 = vld [vmem:[#allocation2 + $0x6ac] ss:$16 sps:$4 sm:$0xff]  }
 0xbf4   :  { %5964 = vmatprep.subr.bf16.mxu1 %v8106_v31 }
 0xbf7   :  { %5965 = vmatpush2.bf16.msra.mxu1 %v8104_v54  ;;  %v8121_v54 = vld [vmem:[#allocation2 + $0x68c] ss:$16 sps:$4 sm:$0xff]  }
 0xbf8   :  { %5966 = vmatprep.subr.bf16.mxu1 %v8112_v23  ;;  %v8119_v23 = vld [vmem:[#allocation2 + $0x688] ss:$16 sps:$4 sm:$0xff]  }
 0xbfb   :  { %5967 = vmatpush2.bf16.msra.mxu1 %v8110_v24 }
 0xbfc   :  { %5968 = vmatprep.subr.bf16.mxu1 %v8118_v26  ;;  %v8125_v26 = vld [vmem:[#allocation2 + $0x668] ss:$16 sps:$4 sm:$0xff]  }
 0xbff   :  { %5969 = vmatpush2.bf16.msra.mxu1 %v8116_v25  ;;  %v8127_v25 = vld [vmem:[#allocation2 + $0x66c] ss:$16 sps:$4 sm:$0xff]  }
 0xc00   :  { %5970 = vmatprep.subr.bf16.mxu1 %v8124_v30  ;;  %v8133_v30 = vld [vmem:[#allocation2 + $0x64c] ss:$16 sps:$4 sm:$0xff]  }
 0xc03   :  { %5971 = vmatpush2.bf16.msra.mxu1 %v8122_v28 }
 0xc04   :  { %5972 = vmatprep.subr.bf16.mxu1 %v8130_v32 }
 0xc07   :  { %5973 = vmatpush2.bf16.msra.mxu1 %v8128_v41  ;;  %v8131_v41 = vld [vmem:[#allocation2 + $0x648] ss:$16 sps:$4 sm:$0xff]  }
 0xc08   :  { %5974 = vmatprep.subr.bf16.mxu1 %v8136_v44 }
 0xc0b   :  { %5975 = vmatpush2.bf16.msra.mxu1 %v8134_v47  ;;  %v8139_v47 = vld [vmem:[#allocation2 + $0x62c] ss:$16 sps:$4 sm:$0xff]  }
 0xc0c   :  { %5976 = vmatprep.subr.bf16.mxu1 %v8142_v51 }
 0xc0f   :  { %5977 = vmatpush2.bf16.msra.mxu1 %v8140_v52  ;;  %v5087_v52 = vrot.slane %v5070_v61, %v9410_v9 }
 0xc10   :  { %6032 = vmatprep.subr.bf16.mxu1 %v8148_v12 }
 0xc72   :  { %v4848_v59 = vpop.f32.mrf.mxu1 }
 0xc73   :  { %v5018_v55 = vadd.f32 %v5017_v17, %v4848_v59  ;;  %v5083_v17 = vrot.slane %v5070_v61, %v9407_v8 }
 0xc74   :  { %v4850_v62 = vpop.f32.mrf.mxu1 }
 0xc75   :  { %v5020_v19 = vadd.f32 %v5019_v58, %v4850_v62  ;;  %v5092_v39 = vadd.f32 %v5075_v63, %v5018_v55 }
 0xc76   :  { %v4852_v35 = vpop.f32.mrf.mxu1 }
 0xc77   :  { %v5022_v0 = vadd.f32 %v5021_v60, %v4852_v35  ;;  %v5093_v2 = vadd.f32 %v5079_v34, %v5020_v19  ;;  %v5100_v13 = vmax.f32 %v5092_v39, 0.0  ;;  %v8137_v60 = vld [vmem:[#allocation2 + $0x628] ss:$16 sps:$4 sm:$0xff]   ;;  %v8145_v19 = vld [vmem:[#allocation2 + $0x60c] ss:$16 sps:$4 sm:$0xff]  }
 0xc78   :  { %v4854_v1 = vpop.f32.mrf.mxu1 }
 0xc79   :  { %v5096_v3 = vadd.f32 %v5075_v63, %v5022_v0  ;;  %v5024_v4 = vadd.f32 %v5023_v10, %v4854_v1  ;;  %v5101_v6 = vmax.f32 %v5093_v2, 0.0  ;;  %v8143_v0 = vld [vmem:[#allocation2 + $0x608] ss:$16 sps:$4 sm:$0xff]   ;;  %v8151_v2 = vld [vmem:[#allocation2 + $0x7ec] ss:$16 sps:$4 sm:$0xff]  }
 0xc7b   :  { %v5097_v5 = vadd.f32 %v5079_v34, %v5024_v4  ;;  %v5104_v57 = vmax.f32 %v5096_v3, 0.0 }
 0xc7d   :  { %v5105_v7 = vmax.f32 %v5097_v5, 0.0  ;;  %v9512_v15 = vpack.c.bf16 %v5104_v57, %v5100_v13  ;;  %v8146_v5 = vld [vmem:[#allocation2 + $0x8e8] ss:$16 sps:$4 sm:$0xff]   ;;  %v8157_v13 = vld [vmem:[#allocation2 + $0x7cc] ss:$16 sps:$4 sm:$0xff]  }
 0xc7e   :  { %v8149_v57 = vld [vmem:[#allocation2 + $0x7e8] ss:$16 sps:$4 sm:$0xff]  }
 0xc7f   :  { %v5237_v22 = vpack.c.bf16 %v5105_v7, %v5101_v6  ;;  %v8154_v7 = vld [vmem:[#allocation2 + $0x8cc] ss:$16 sps:$4 sm:$0xff]  }
 0xc81   :  { %5935 = vmatprep.mubr.bf16.mxu0 %v5237_v22 }
 0xc82   :  { %5936 = vmatmul.mubr.bf16.vlgmr.msra.gmra.mxu0 %v9512_v15  ;;  %v4891_v49 = vpop.f32.mrf.mxu1 }
 0xc83   :  { %5990 = vmatpush1.bf16.msra.mxu0 %v8101_v14  ;;  %6021 = vmatprep.mubr.bf16.mxu0 %v5237_v22  ;;  %v8152_v22 = vld [vmem:[#allocation2 + $0x8c8] ss:$16 sps:$4 sm:$0xff]  }
 0xc84   :  { %5991 = vmatprep.subr.bf16.mxu0 %v8109_v16  ;;  %v4893_v31 = vpop.f32.mrf.mxu1  ;;  %v8155_v14 = vld [vmem:[#allocation2 + $0x7c8] ss:$16 sps:$4 sm:$0xff]   ;;  %v8160_v16 = vld [vmem:[#allocation2 + $0x8ac] ss:$16 sps:$4 sm:$0xff]  }
 0xc86   :  { %v4895_v24 = vpop.f32.mrf.mxu1 }
 0xc87   :  { %5992 = vmatpush1.bf16.msra.mxu0 %v8107_v18  ;;  %v8163_v18 = vld [vmem:[#allocation2 + $0x7ac] ss:$16 sps:$4 sm:$0xff]  }
 0xc88   :  { %5993 = vmatprep.subr.bf16.mxu0 %v8115_v27  ;;  %v4897_v28 = vpop.f32.mrf.mxu1  ;;  %v8161_v27 = vld [vmem:[#allocation2 + $0x7a8] ss:$16 sps:$4 sm:$0xff]  }
 0xc8b   :  { %5994 = vmatpush1.bf16.msra.mxu0 %v8113_v29  ;;  %v8166_v29 = vld [vmem:[#allocation2 + $0x88c] ss:$16 sps:$4 sm:$0xff]  }
 0xc8c   :  { %5995 = vmatprep.subr.bf16.mxu0 %v8121_v54  ;;  %v8164_v54 = vld [vmem:[#allocation2 + $0x888] ss:$16 sps:$4 sm:$0xff]  }
 0xc8f   :  { %5996 = vmatpush1.bf16.msra.mxu0 %v8119_v23  ;;  %v8167_v23 = vld [vmem:[#allocation2 + $0x788] ss:$16 sps:$4 sm:$0xff]  }
 0xc90   :  { %5997 = vmatprep.subr.bf16.mxu0 %v8127_v25  ;;  %v8175_v25 = vld [vmem:[#allocation2 + $0x76c] ss:$16 sps:$4 sm:$0xff]  }
 0xc92   :  { %v5060_v32 = vpop.f32.mrf.mxu1 }
 0xc93   :  { %5998 = vmatpush1.bf16.msra.mxu0 %v8125_v26  ;;  %v5061_v12 = vadd.f32 %v5060_v32, %v4891_v49  ;;  %v8158_v49 = vld [vmem:[#allocation2 + $0x8a8] ss:$16 sps:$4 sm:$0xff]   ;;  %v8181_v32 = vld [vmem:[#allocation2 + $0x74c] ss:$16 sps:$4 sm:$0xff]  }
 0xc94   :  { %v5062_v44 = vpop.f32.mrf.mxu1  ;;  %5999 = vmatprep.subr.bf16.mxu0 %v8133_v30  ;;  %v8170_v26 = vld [vmem:[#allocation2 + $0x868] ss:$16 sps:$4 sm:$0xff]   ;;  %v8178_v30 = vld [vmem:[#allocation2 + $0x84c] ss:$16 sps:$4 sm:$0xff]  }
 0xc95   :  { %v5063_v51 = vadd.f32 %v5062_v44, %v4893_v31  ;;  %v5094_v35 = vadd.f32 %v5083_v17, %v5061_v12  ;;  %v8169_v31 = vld [vmem:[#allocation2 + $0x78c] ss:$16 sps:$4 sm:$0xff]   ;;  %v8179_v44 = vld [vmem:[#allocation2 + $0x748] ss:$16 sps:$4 sm:$0xff]  }
 0xc96   :  { %v5064_v58 = vpop.f32.mrf.mxu1  ;;  %v8185_v12 = vld [vmem:[#allocation2 + $0x728] ss:$16 sps:$4 sm:$0xff]  }
 0xc97   :  { %v5065_v59 = vadd.f32 %v5064_v58, %v4895_v24  ;;  %6000 = vmatpush1.bf16.msra.mxu0 %v8131_v41  ;;  %v5095_v34 = vadd.f32 %v5087_v52, %v5063_v51  ;;  %v5102_v61 = vmax.f32 %v5094_v35, 0.0  ;;  %v8172_v24 = vld [vmem:[#allocation2 + $0x86c] ss:$16 sps:$4 sm:$0xff]   ;;  %v8176_v41 = vld [vmem:[#allocation2 + $0x848] ss:$16 sps:$4 sm:$0xff]  }
 0xc98   :  { %v5066_v62 = vpop.f32.mrf.mxu1  ;;  %6001 = vmatprep.subr.bf16.mxu0 %v8139_v47  ;;  %v8184_v47 = vld [vmem:[#allocation2 + $0x82c] ss:$16 sps:$4 sm:$0xff]   ;;  %v8200_v35 = vld [vmem:[#allocation2 + $0x9a8] ss:$16 sps:$4 sm:$0xff]  }
 0xc99   :  { %v5098_v55 = vadd.f32 %v5083_v17, %v5065_v59  ;;  %v5067_v63 = vadd.f32 %v5066_v62, %v4897_v28  ;;  %v5103_v3 = vmax.f32 %v5095_v34, 0.0  ;;  %v8173_v28 = vld [vmem:[#allocation2 + $0x768] ss:$16 sps:$4 sm:$0xff]   ;;  %v8187_v51 = vld [vmem:[#allocation2 + $0x72c] ss:$16 sps:$4 sm:$0xff]  }
 0xc9a   :  { %v8190_v17 = vld [vmem:[#allocation2 + $0x80c] ss:$16 sps:$4 sm:$0xff]   ;;  %v8188_v59 = vld [vmem:[#allocation2 + $0x808] ss:$16 sps:$4 sm:$0xff]  }
 0xc9b   :  { %v5099_v10 = vadd.f32 %v5087_v52, %v5067_v63  ;;  %6002 = vmatpush1.bf16.msra.mxu0 %v8137_v60  ;;  %v5106_v1 = vmax.f32 %v5098_v55, 0.0  ;;  %v8182_v52 = vld [vmem:[#allocation2 + $0x828] ss:$16 sps:$4 sm:$0xff]   ;;  %v8193_v58 = vld [vmem:[#allocation2 + $0x70c] ss:$16 sps:$4 sm:$0xff]  }
 0xc9c   :  { %6003 = vmatprep.subr.bf16.mxu0 %v8145_v19  ;;  %v8191_v60 = vld [vmem:[#allocation2 + $0x708] ss:$16 sps:$4 sm:$0xff]   ;;  %v8196_v62 = vld [vmem:[#allocation2 + $0x9ec] ss:$16 sps:$4 sm:$0xff]  }
 0xc9d   :  { %v5107_v4 = vmax.f32 %v5099_v10, 0.0  ;;  %v9517_v6 = vpack.c.bf16 %v5106_v1, %v5102_v61  ;;  %v8194_v19 = vld [vmem:[#allocation2 + $0x9e8] ss:$16 sps:$4 sm:$0xff]   ;;  %v8199_v34 = vld [vmem:[#allocation2 + $0x9cc] ss:$16 sps:$4 sm:$0xff]   ;;  %v8221_v61 = vld [vmem:[#allocation3 + $0x230] sm:$0xff]  }
 0xc9e   :  { %v8197_v55 = vld [vmem:[#allocation2 + $0x9c8] ss:$16 sps:$4 sm:$0xff]   ;;  %v8202_v63 = vld [vmem:[#allocation2 + $0x9ac] ss:$16 sps:$4 sm:$0xff]  }
 0xc9f   :  { %6004 = vmatpush1.bf16.msra.mxu0 %v8143_v0  ;;  %v5239_v39 = vpack.c.bf16 %v5107_v4, %v5103_v3  ;;  %v8205_v10 = vld [vmem:[#allocation2 + $0x98c] ss:$16 sps:$4 sm:$0xff]   ;;  %v8203_v3 = vld [vmem:[#allocation2 + $0x988] ss:$16 sps:$4 sm:$0xff]  }
 0xca0   :  { %6005 = vmatprep.subr.bf16.mxu0 %v8151_v2  ;;  %v8218_v0 = vld [vmem:[#allocation3 + $0x278] sm:$0xff]   ;;  %v8220_v2 = vld [vmem:[#allocation3 + $0x270] sm:$0xff]  }
 0xca1   :  { %5978 = vmatprep.mubr.bf16.mxu1 %v5239_v39  ;;  %v8219_v1 = vld [vmem:[#allocation3 + $0x238] sm:$0xff]  }
 0xca2   :  { %5979 = vmatmul.mubr.bf16.vlgmr.msra.gmra.mxu1 %v9517_v6  ;;  %v8208_v4 = vld [vmem:[#allocation2 + $0x96c] ss:$16 sps:$4 sm:$0xff]  }
 0xca3   :  { %6033 = vmatpush1.bf16.msra.mxu1 %v8146_v5  ;;  %6006 = vmatpush2.bf16.msra.mxu0 %v8149_v57  ;;  %v8211_v5 = vld [vmem:[#allocation2 + $0x94c] ss:$16 sps:$4 sm:$0xff]  }
 0xca4   :  { %6064 = vmatprep.mubr.bf16.mxu1 %v5239_v39  ;;  %6034 = vmatprep.subr.bf16.mxu1 %v8154_v7  ;;  %v8206_v39 = vld [vmem:[#allocation2 + $0x968] ss:$16 sps:$4 sm:$0xff]   ;;  %v8224_v7 = vld [vmem:[#allocation3 + $0x260] sm:$0xff]  }
 0xca5   :  { %6007 = vmatprep.subr.bf16.mxu0 %v8157_v13  ;;  %v8223_v57 = vld [vmem:[#allocation3 + $0x228] sm:$0xff]  }
 0xca6   :  { %v8209_v13 = vld [vmem:[#allocation2 + $0x948] ss:$16 sps:$4 sm:$0xff]  }
 0xca7   :  { %6035 = vmatpush1.bf16.msra.mxu1 %v8152_v22  ;;  %6008 = vmatpush2.bf16.msra.mxu0 %v8155_v14  ;;  %v8214_v22 = vld [vmem:[#allocation2 + $0x92c] ss:$16 sps:$4 sm:$0xff]   ;;  %v8225_v14 = vld [vmem:[#allocation3 + $0x220] sm:$0xff]  }
 0xca8   :  { %6036 = vmatprep.subr.bf16.mxu1 %v8160_v16  ;;  %6009 = vmatprep.subr.bf16.mxu0 %v8163_v18  ;;  %v8226_v16 = vld [vmem:[#allocation3 + $0x258] sm:$0xff]  }
 0xca9   :  { %v8212_v18 = vld [vmem:[#allocation2 + $0x928] ss:$16 sps:$4 sm:$0xff]  }
 0xcab   :  { %6037 = vmatpush1.bf16.msra.mxu1 %v8158_v49  ;;  %6010 = vmatpush2.bf16.msra.mxu0 %v8161_v27  ;;  %v8217_v49 = vld [vmem:[#allocation2 + $0x90c] ss:$16 sps:$4 sm:$0xff]  }
 0xcac   :  { %6038 = vmatprep.subr.bf16.mxu1 %v8166_v29  ;;  %6011 = vmatprep.subr.bf16.mxu0 %v8169_v31  ;;  %v8227_v27 = vld [vmem:[#allocation3 + $0x218] sm:$0xff]   ;;  %v8228_v31 = vld [vmem:[#allocation3 + $0x250] sm:$0xff]  }
 0xcad   :  { %v8215_v29 = vld [vmem:[#allocation2 + $0x908] ss:$16 sps:$4 sm:$0xff]  }
 0xcaf   :  { %6039 = vmatpush1.bf16.msra.mxu1 %v8164_v54  ;;  %6012 = vmatpush2.bf16.msra.mxu0 %v8167_v23  ;;  %v8229_v54 = vld [vmem:[#allocation3 + $0x210] sm:$0xff]   ;;  %v8230_v23 = vld [vmem:[#allocation3 + $0x248] sm:$0xff]  }
 0xcb0   :  { %6040 = vmatprep.subr.bf16.mxu1 %v8172_v24  ;;  %6013 = vmatprep.subr.bf16.mxu0 %v8175_v25  ;;  %v8231_v24 = vld [vmem:[#allocation3 + $0x208] sm:$0xff]   ;;  %v8232_v25 = vld [vmem:[#allocation3 + $0x240] sm:$0xff]  }
 0xcb3   :  { %6041 = vmatpush1.bf16.msra.mxu1 %v8170_v26  ;;  %6014 = vmatpush2.bf16.msra.mxu0 %v8173_v28  ;;  %v8233_v26 = vld [vmem:[#allocation3 + $0x200] sm:$0xff]   ;;  %v8234_v28 = vld [vmem:[#allocation3 + $0x2f8] sm:$0xff]  }
 0xcb4   :  { %6042 = vmatprep.subr.bf16.mxu1 %v8178_v30  ;;  %6015 = vmatprep.subr.bf16.mxu0 %v8181_v32  ;;  %v8235_v30 = vld [vmem:[#allocation3 + $0x2b8] sm:$0xff]   ;;  %v8236_v32 = vld [vmem:[#allocation3 + $0x2f0] sm:$0xff]  }
 0xcb7   :  { %6043 = vmatpush1.bf16.msra.mxu1 %v8176_v41  ;;  %6016 = vmatpush2.bf16.msra.mxu0 %v8179_v44  ;;  %v8237_v41 = vld [vmem:[#allocation3 + $0x2b0] sm:$0xff]   ;;  %v8239_v44 = vld [vmem:[#allocation3 + $0x2a8] sm:$0xff]  }
 0xcb8   :  { %6044 = vmatprep.subr.bf16.mxu1 %v8184_v47  ;;  %6017 = vmatprep.subr.bf16.mxu0 %v8187_v51  ;;  %v8240_v47 = vld [vmem:[#allocation3 + $0x2e0] sm:$0xff]  }
 0xcb9   :  { %v8241_v51 = vld [vmem:[#allocation3 + $0x2a0] sm:$0xff]  }
 0xcbb   :  { %6045 = vmatpush1.bf16.msra.mxu1 %v8182_v52  ;;  %6018 = vmatpush2.bf16.msra.mxu0 %v8185_v12  ;;  %v8242_v52 = vld [vmem:[#allocation3 + $0x2d8] sm:$0xff]  }
 0xcbc   :  { %6046 = vmatprep.subr.bf16.mxu1 %v8190_v17  ;;  %6019 = vmatprep.subr.bf16.mxu0 %v8193_v58  ;;  %v8243_v12 = vld [vmem:[#allocation3 + $0x298] sm:$0xff]   ;;  %v8244_v17 = vld [vmem:[#allocation3 + $0x2d0] sm:$0xff]  }
 0xcbd   :  { %v8245_v58 = vld [vmem:[#allocation3 + $0x290] sm:$0xff]  }
 0xcbf   :  { %6047 = vmatpush1.bf16.msra.mxu1 %v8188_v59  ;;  %6020 = vmatpush2.bf16.msra.mxu0 %v8191_v60  ;;  %v8246_v59 = vld [vmem:[#allocation3 + $0x2c8] sm:$0xff]  }
 0xcc0   :  { %6048 = vmatprep.subr.bf16.mxu1 %v8196_v62  ;;  %7380 = vmatprep.subr.bf16.mxu0 %v8218_v0  ;;  %v8247_v60 = vld [vmem:[#allocation3 + $0x288] sm:$0xff]   ;;  %v8248_v62 = vld [vmem:[#allocation3 + $0x2c0] sm:$0xff]  }
 0xcc2   :  { %6022 = vmatmul.mubr.bf16.vlgmr.msra.gmra.mxu0 %v9512_v15  ;;  %v8222_v15 = vld [vmem:[#allocation3 + $0x268] sm:$0xff]  }
 0xcc3   :  { %6049 = vmatpush2.bf16.msra.mxu1 %v8194_v19  ;;  %7381 = vmatpush3.bf16.msra.mxu0 %v8219_v1  ;;  %v8249_v19 = vld [vmem:[#allocation3 + $0x280] sm:$0xff]  }
 0xcc4   :  { %6050 = vmatprep.subr.bf16.mxu1 %v8199_v34  ;;  %7382 = vmatprep.subr.bf16.mxu0 %v8220_v2 }
 0xcc7   :  { %6051 = vmatpush2.bf16.msra.mxu1 %v8197_v55  ;;  %7383 = vmatpush3.bf16.msra.mxu0 %v8221_v61 }
 0xcc8   :  { %6052 = vmatprep.subr.bf16.mxu1 %v8202_v63  ;;  %7384 = vmatprep.subr.bf16.mxu0 %v8222_v15  ;;  %v5241_v63 = vld [vmem:[#allocation13 + $0x44] ss:$8 sm:$0xf] }
 0xcc9   :  { %v5246_v0 = vrot.slane %v5241_v63, %v8952_v21 }
 0xccb   :  { %6053 = vmatpush2.bf16.msra.mxu1 %v8200_v35  ;;  %7385 = vmatpush3.bf16.msra.mxu0 %v8223_v57 }
 0xccc   :  { %6054 = vmatprep.subr.bf16.mxu1 %v8205_v10  ;;  %7386 = vmatprep.subr.bf16.mxu0 %v8224_v7  ;;  %v5250_v10 = vrot.slane %v5241_v63, %v8949_v20 }
 0xccf   :  { %6055 = vmatpush2.bf16.msra.mxu1 %v8203_v3  ;;  %7387 = vmatpush3.bf16.msra.mxu0 %v8225_v14 }
 0xcd0   :  { %6056 = vmatprep.subr.bf16.mxu1 %v8208_v4  ;;  %7388 = vmatprep.subr.bf16.mxu0 %v8226_v16 }
 0xcd3   :  { %6057 = vmatpush2.bf16.msra.mxu1 %v8206_v39  ;;  %7389 = vmatpush3.bf16.msra.mxu0 %v8227_v27 }
 0xcd4   :  { %6058 = vmatprep.subr.bf16.mxu1 %v8211_v5  ;;  %7390 = vmatprep.subr.bf16.mxu0 %v8228_v31 }
 0xcd7   :  { %6059 = vmatpush2.bf16.msra.mxu1 %v8209_v13  ;;  %7391 = vmatpush3.bf16.msra.mxu0 %v8229_v54 }
 0xcd8   :  { %6060 = vmatprep.subr.bf16.mxu1 %v8214_v22  ;;  %7392 = vmatprep.subr.bf16.mxu0 %v8230_v23  ;;  %v5258_v23 = vrot.slane %v5241_v63, %v9410_v9 }
 0xcdb   :  { %6061 = vmatpush2.bf16.msra.mxu1 %v8212_v18  ;;  %7393 = vmatpush3.bf16.msra.mxu0 %v8231_v24  ;;  %v5254_v24 = vrot.slane %v5241_v63, %v9407_v8 }
 0xcdc   :  { %6062 = vmatprep.subr.bf16.mxu1 %v8217_v49  ;;  %7394 = vmatprep.subr.bf16.mxu0 %v8232_v25 }
 0xcdf   :  { %6063 = vmatpush2.bf16.msra.mxu1 %v8215_v29  ;;  %7395 = vmatpush3.bf16.msra.mxu0 %v8233_v26 }
 0xce0   :  { %7402 = vmatprep.subr.bf16.mxu1 %v8234_v28 }
 0xce2   :  { %6065 = vmatmul.mubr.bf16.vlgmr.msra.gmra.mxu1 %v9517_v6  ;;  %v8238_v6 = vld [vmem:[#allocation3 + $0x2e8] sm:$0xff]  }
 0xce3   :  { %7403 = vmatpush3.bf16.msra.mxu1 %v8235_v30 }
 0xce4   :  { %7404 = vmatprep.subr.bf16.mxu1 %v8236_v32 }
 0xce7   :  { %7405 = vmatpush3.bf16.msra.mxu1 %v8237_v41 }
 0xce8   :  { %7406 = vmatprep.subr.bf16.mxu1 %v8238_v6 }
 0xceb   :  { %7407 = vmatpush3.bf16.msra.mxu1 %v8239_v44 }
 0xcec   :  { %7408 = vmatprep.subr.bf16.mxu1 %v8240_v47 }
 0xcef   :  { %7409 = vmatpush3.bf16.msra.mxu1 %v8241_v51 }
 0xcf0   :  { %7410 = vmatprep.subr.bf16.mxu1 %v8242_v52 }
 0xcf3   :  { %7411 = vmatpush3.bf16.msra.mxu1 %v8243_v12 }
 0xcf4   :  { %7412 = vmatprep.subr.bf16.mxu1 %v8244_v17 }
 0xcf7   :  { %7413 = vmatpush3.bf16.msra.mxu1 %v8245_v58 }
 0xcf8   :  { %7414 = vmatprep.subr.bf16.mxu1 %v8246_v59 }
 0xcfb   :  { %7415 = vmatpush3.bf16.msra.mxu1 %v8247_v60 }
 0xcfc   :  { %7416 = vmatprep.subr.bf16.mxu1 %v8248_v62 }
 0xcff   :  { %7417 = vmatpush3.bf16.msra.mxu1 %v8249_v19 }
 0xd42   :  { %v5937_v34 = vpop.f32.mrf.mxu0 }
 0xd43   :  { %v5938_v15 = vadd.f32 %v5937_v34, %v5246_v0 }
 0xd44   :  { %v5939_v55 = vpop.f32.mrf.mxu0 }
 0xd45   :  { %v5940_v4 = vadd.f32 %v5939_v55, %v5250_v10 }
 0xd46   :  { %v5941_v35 = vpop.f32.mrf.mxu0 }
 0xd47   :  { %v5942_v61 = vadd.f32 %v5941_v35, %v5246_v0  ;;  %v6151_v35 = vld [vmem:[#allocation13 + $0x45] ss:$0 sm:$0xff] }
 0xd48   :  { %v5943_v2 = vpop.f32.mrf.mxu0 }
 0xd49   :  { %v5944_v5 = vadd.f32 %v5943_v2, %v5250_v10 }
 0xd62   :  { %v5980_v1 = vpop.f32.mrf.mxu1 }
 0xd63   :  { %v5981_v13 = vadd.f32 %v5980_v1, %v5938_v15 }
 0xd64   :  { %v5982_v3 = vpop.f32.mrf.mxu1 }
 0xd65   :  { %v5983_v57 = vadd.f32 %v5982_v3, %v5940_v4  ;;  %v6075_v27 = vmax.f32 %v5981_v13, 0.0 }
 0xd66   :  { %v5984_v39 = vpop.f32.mrf.mxu1 }
 0xd67   :  { %v5985_v7 = vadd.f32 %v5984_v39, %v5942_v61  ;;  %v6076_v18 = vmax.f32 %v5983_v57, 0.0 }
 0xd68   :  { %v5986_v22 = vpop.f32.mrf.mxu1 }
 0xd69   :  { %v5987_v14 = vadd.f32 %v5986_v22, %v5944_v5  ;;  %v6079_v16 = vmax.f32 %v5985_v7, 0.0 }
 0xd6b   :  { %v6080_v49 = vmax.f32 %v5987_v14, 0.0  ;;  %v6147_v29 = vpack.c.bf16 %v6079_v16, %v6075_v27 }
 0xd6d   :  { %v6148_v20 = vpack.c.bf16 %v6080_v49, %v6076_v18 }
 0xd6f   :  { %6376 = vmatprep.mubr.bf16.mxu0 %v6148_v20 }
 0xd70   :  { %6377 = vmatmul.mubr.bf16.vlgmr.msra.gmra.mxu0 %v6147_v29 }
 0xd82   :  { %v6023_v21 = vpop.f32.mrf.mxu0 }
 0xd83   :  { %v6024_v41 = vadd.f32 %v6023_v21, %v5254_v24 }
 0xd84   :  { %v6025_v31 = vpop.f32.mrf.mxu0 }
 0xd85   :  { %v6026_v30 = vadd.f32 %v6025_v31, %v5258_v23 }
 0xd86   :  { %v6027_v54 = vpop.f32.mrf.mxu0 }
 0xd87   :  { %v6028_v32 = vadd.f32 %v6027_v54, %v5254_v24 }
 0xd88   :  { %v6029_v26 = vpop.f32.mrf.mxu0 }
 0xd89   :  { %v6030_v44 = vadd.f32 %v6029_v26, %v5258_v23 }
 0xda2   :  { %v6066_v25 = vpop.f32.mrf.mxu1 }
 0xda3   :  { %v6067_v52 = vadd.f32 %v6066_v25, %v6024_v41 }
 0xda4   :  { %v6068_v28 = vpop.f32.mrf.mxu1 }
 0xda5   :  { %v6069_v47 = vadd.f32 %v6068_v28, %v6026_v30  ;;  %v6077_v62 = vmax.f32 %v6067_v52, 0.0 }
 0xda6   :  { %v6070_v6 = vpop.f32.mrf.mxu1 }
 0xda7   :  { %v6071_v51 = vadd.f32 %v6070_v6, %v6028_v32  ;;  %v6078_v59 = vmax.f32 %v6069_v47, 0.0 }
 0xda8   :  { %v6072_v12 = vpop.f32.mrf.mxu1 }
 0xda9   :  { %v6073_v17 = vadd.f32 %v6072_v12, %v6030_v44  ;;  %v6081_v58 = vmax.f32 %v6071_v51, 0.0 }
 0xdab   :  { %v6082_v60 = vmax.f32 %v6073_v17, 0.0  ;;  %v6149_v19 = vpack.c.bf16 %v6081_v58, %v6077_v62 }
 0xdad   :  { %v6150_v9 = vpack.c.bf16 %v6082_v60, %v6078_v59 }
 0xdaf   :  { %6417 = vmatprep.mubr.bf16.mxu1 %v6150_v9 }
 0xdb0   :  { %6418 = vmatmul.mubr.bf16.vlgmr.msra.gmra.mxu1 %v6149_v19  ;;  %v4424_v19 = vmul.f32 %v8801_v33, %v8801_v33 }
 0xe30   :  { %v7396_v8 = vpop.f32.mrf.mxu0 }
 0xe32   :  { %v7397_v34 = vpop.f32.mrf.mxu0 }
 0xe33   :  { %v7398_v63 = vadd.f32 %v7397_v34, %v7396_v8 }
 0xe34   :  { %v7399_v55 = vpop.f32.mrf.mxu0 }
 0xe35   :  { %v6379_v2 = vadd.f32 %v7398_v63, %v6151_v35  ;;  %v4441_v63 = vpop.xlane.xlu0 %4440 }
 0xe36   :  { %v7400_v10 = vpop.f32.mrf.mxu0 }
 0xe37   :  { %v7401_v3 = vadd.f32 %v7400_v10, %v7399_v55  ;;  %v4445_v10 = vmul.f32 0.5, %v4441_v63 }
 0xe39   :  { %v6382_v5 = vadd.f32 %v7401_v3, %v6151_v35  ;;  %v4444_v35 = vpop.xlane.xlu0 %4443 }
 0xe3a   :  { %v4446_v3 = vmul.f32 0.5, %v4444_v35 }
 0xe70   :  { %v7418_v0 = vpop.f32.mrf.mxu1 }
 0xe72   :  { %v7419_v1 = vpop.f32.mrf.mxu1 }
 0xe73   :  { %v7420_v4 = vadd.f32 %v7419_v1, %v7418_v0  ;;  %v4429_v0 = vpop.xlane.xlu0 %4428 }
 0xe74   :  { %v7421_v61 = vpop.f32.mrf.mxu1  ;;  %v4433_v33 = vmul.f32 0.5, %v4429_v0 }
 0xe75   :  { %v6420_v15 = vadd.f32 %v7420_v4, %v6379_v2  ;;  %v4447_v2 = vsub.f32 -7.351508, %v4445_v10 }
 0xe76   :  { %v7422_v39 = vpop.f32.mrf.mxu1 }
 0xe77   :  { %v6430_v57 = vand.u32 2147483647, %v6420_v15  ;;  %v7423_v7 = vadd.f32 %v7422_v39, %v7421_v61  ;;  %v6428_v32 = vmax.f32 %v6420_v15, 0.0  ;;  %v6426_v47 = vmul.f32 %v6420_v15, %v8810_v37 }
 0xe78   :  { %v4426_v37 = vadd.f32 %v4424_v19, %v9436_v11  ;;  %v4448_v39 = vsub.f32 -7.351508, %v4446_v3 }
 0xe79   :  { %v6432_v13 = vsub.f32 0.0, %v6430_v57  ;;  %v6423_v22 = vadd.f32 %v7423_v7, %v6382_v5  ;;  %v4435_v5 = vsub.f32 -7.351508, %v4433_v33 }
 0xe7a   :  { %v4430_v55 = vsel %vm379_vm0, %v4426_v37, 0.0 }
 0xe7b   :  { %v6434_v14 = vmul.f32 1.442695, %v6432_v13  ;;  %v6431_v16 = vand.u32 2147483647, %v6423_v22  ;;  %v6429_v58 = vmax.f32 %v6423_v22, 0.0  ;;  %v6427_v62 = vmul.f32 %v6423_v22, %v8812_v38 }
 0xe7d   :  { %8254 = vpow2.f32 %v6434_v14  ;;  %v6433_v18 = vsub.f32 0.0, %v6431_v16 }
 0xe7f   :  { %v6436_v49 = vmul.f32 1.442695, %v6433_v18 }
 0xe81   :  { %8256 = vpow2.f32 %v6436_v49 }
 0xe8a   :  { %v8255_v27 = vpop.eup %8254 }
 0xe8b   :  { %v6438_v20 = vadd.f32 1.0, %v8255_v27  ;;  %v6441_v31 = vmul.f32 -0.5, %v8255_v27  ;;  %v6444_v24 = vand.u32 2147483647, %v8255_v27 }
 0xe8d   :  { %8258 = vlog2.f32 %v6438_v20  ;;  %v6442_v54 = vadd.f32 1.0, %v6441_v31  ;;  %vm6445_vm4 = vcmp.lt.f32.partialorder %v6444_v24, 0.0004427343 }
 0xe8e   :  { %v8257_v29 = vpop.eup %8256 }
 0xe8f   :  { %v6447_v21 = vadd.f32 1.0, %v8257_v29  ;;  %v6450_v23 = vmul.f32 -0.5, %v8257_v29  ;;  %v6443_v28 = vmul.f32 %v8255_v27, %v6442_v54  ;;  %v6453_v41 = vand.u32 2147483647, %v8257_v29 }
 0xe91   :  { %8260 = vlog2.f32 %v6447_v21  ;;  %v6451_v30 = vadd.f32 1.0, %v6450_v23  ;;  %vm6454_vm5 = vcmp.lt.f32.partialorder %v6453_v41, 0.0004427343 }
 0xe93   :  { %v6452_v12 = vmul.f32 %v8257_v29, %v6451_v30 }
 0xe9a   :  { %v8259_v25 = vpop.eup %8258 }
 0xe9b   :  { %v6440_v26 = vmul.f32 0.6931472, %v8259_v25 }
 0xe9d   :  { %v6446_v6 = vsel %vm6445_vm4, %v6443_v28, %v6440_v26 }
 0xe9e   :  { %v8261_v44 = vpop.eup %8260  ;;  %v6456_v51 = vadd.f32 %v6446_v6, %v6428_v32 }
 0xe9f   :  { %v6449_v52 = vmul.f32 0.6931472, %v8261_v44 }
 0xea0   :  { %v6458_v17 = vsub.f32 %v6426_v47, %v6456_v51 }
 0xea1   :  { %v6455_v59 = vsel %vm6454_vm5, %v6452_v12, %v6449_v52 }
 0xea2   :  { %v6460_v60 = vsel %vm379_vm0, %v6458_v17, 0.0  ;;  %v6457_v9 = vadd.f32 %v6455_v59, %v6429_v58 }
 0xea3   :  { %6461 = vadd.xlane.f32.xlu1 %v6460_v60 }
 0xea4   :  { %v6459_v8 = vsub.f32 %v6427_v62, %v6457_v9 }
 0xea6   :  { %v6463_v34 = vsel %vm379_vm0, %v6459_v8, 0.0 }
 0xea7   :  { %6464 = vadd.xlane.f32.xlu1 %v6463_v34 }
 0xeab   :  { %4431 = vadd.xlane.f32.xlu1 %v4430_v55 }
 0xf2c   :  { %v6462_v1 = vpop.xlane.xlu1 %6461 }
 0xf2d   :  { %v6466_v38 = vadd.f32 %v6462_v1, %v9390_v53 }
 0xf2f   :  { %v6468_v4 = vadd.f32 %v6466_v38, %v2334_v46 }
 0xf30   :  { %v6465_v61 = vpop.xlane.xlu1 %6464 }
 0xf31   :  { %v6470_v15 = vadd.f32 %v6468_v4, %v4447_v2  ;;  %v6467_v11 = vadd.f32 %v6465_v61, %v9392_v56 }
 0xf33   :  { %v6472_v57 = vsub.f32 %v6470_v15, %v1048_v40  ;;  %v6469_v7 = vadd.f32 %v6467_v11, %v2335_v50 }
 0xf34   :  { %v4432_v13 = vpop.xlane.xlu1 %4431 }
 0xf35   :  { %v6471_v53 = vadd.f32 %v6469_v7, %v4448_v39  ;;  %v4434_v22 = vmul.f32 0.5, %v4432_v13  ;;  %v6474_v14 = vsub.f32 %v6472_v57, %v4435_v5 }
 0xf37   :  { %v6473_v45 = vsub.f32 %v6471_v53, %v1049_v43  ;;  %v4436_v46 = vsub.f32 -7.351508, %v4434_v22  ;;  %6476 = vst [vmem:[#allocation14] sm:$0xff] %v6474_v14 }
 0xf39   :  { %v6475_v56 = vsub.f32 %v6473_v45, %v4436_v46 }
 0xf3b   :  { %6477 = vst [vmem:[#allocation14 + $0x8] sm:$0xff] %v6475_v56 }
 0xf3c   :  { %8393 = shalt.err (!%p8390_p6)
}
 0xf3d   :  { %6489 = dma.vmem_to_hbm [thread:$0]  %s6484_s22, 256, %s9560_s10, [#allocation7], %s8416_s18, %s8416_s18, %s8417_s19  }
 0xf3e   :  { %8412 = dma.done.wait [#allocation7], 256  }
 0xf3f   :  { %8413 = vsyncadd [#allocation7], 4294967040 }
 0xf40   :  { %6493 = vsyncpa [#allocation6], 1 }
 0xf41   :  { %6494 = vsyncpa [#allocation9], 1 }
 0xf42   :  { %6495 = vsyncpa [#allocation12], 1 }
 0xf43   :  { %6496 = vsyncpa [#allocation7], 1 }
 0xf44   :  { %6497 = vsyncmov [#allocation4] }
 0xf47   :  { %s6498_s25 = vpop.sfrf %6497 }
 0xf48   :  { %p7136_p7 = scmp.ne.s32.totalorder %s6498_s25, 0 }
 0xf4a   :  { %6502 = shalt.err (%p7136_p7)  }
 0xf4b   :  { %6504 = vsyncmov [#allocation4 + $0x1] }
 0xf4e   :  { %s6505_s26 = vpop.sfrf %6504 }
 0xf4f   :  { %p7137_p8 = scmp.ne.s32.totalorder %s6505_s26, 0 }
 0xf51   :  { %6509 = shalt.err (%p7137_p8)  }

</bundles_post_ra>
